<compile_context>
chip_gen: v6e
topology: v6e:2x2x1
jax: 0.10.0
libtpu: 0.0.40
codegen_flags: <defaults>
</compile_context>

<pallas_src>
import jax
import jax.numpy as jnp
from jax.experimental import pallas as pl
from jax.experimental.pallas import tpu as pltpu

N_LAYERS = 8
_RELU_LAYERS = (0, 1, 2, 4, 5, 6)
_ENCODE_LAYER = 3          # no activation
# layer 7 -> sigmoid


def _round_up(x, m):
    return ((x + m - 1) // m) * m


def _layer_dims(input_dim, encoding_dim):
    return [
        (input_dim, 128), (128, 64), (64, 32), (32, encoding_dim),   # encoder
        (encoding_dim, 32), (32, 64), (64, 128), (128, input_dim),   # decoder
    ]


def _ae_kernel(x_ref, w_ref, b_ref, out_ref):
    """One batch tile through the whole 8-layer MLP.

    x_ref:   [TILE_B, P] f32
    w_ref:   [8, P, P]   bf16  (zero-padded, resident across grid steps)
    b_ref:   [8, P]      f32   (zero-padded)
    out_ref: [TILE_B, P] f32
    """
    tile_b = x_ref.shape[0]
    half = tile_b // 2
    biases = b_ref[...]                     # tiny; load once (f32)

    # Two independent sub-tiles: per layer the two dots are independent,
    # letting the MXU drain of one overlap the push of the other.
    h0 = x_ref[:half, :]
    h1 = x_ref[half:, :]

    for layer in range(N_LAYERS):
        w = w_ref[layer]                    # [P, P] bf16
        b = biases[layer:layer + 1, :]      # [1, P] f32
        y0 = jnp.dot(h0.astype(jnp.bfloat16), w,
                     preferred_element_type=jnp.float32) + b
        y1 = jnp.dot(h1.astype(jnp.bfloat16), w,
                     preferred_element_type=jnp.float32) + b
        if layer in _RELU_LAYERS:
            h0 = jnp.maximum(y0, 0.0)
            h1 = jnp.maximum(y1, 0.0)
        elif layer == _ENCODE_LAYER:
            h0, h1 = y0, y1
        else:                               # final layer -> sigmoid
            h0 = jax.nn.sigmoid(y0)
            h1 = jax.nn.sigmoid(y1)

    out_ref[:half, :] = h0.astype(out_ref.dtype)
    out_ref[half:, :] = h1.astype(out_ref.dtype)


@jax.jit
def autoencoder_forward(x, w_slab, b_slab):
    """x: [B, input_dim] f32.  w_slab: [8, P, P] bf16.  b_slab: [8, P] f32."""
    batch, feat = x.shape
    p = w_slab.shape[-1]

    # Tile batch (sublane) only; keep the full P lanes in the output.
    tile_b = 256 if batch >= 256 else _round_up(max(batch, 16), 16)
    padded_batch = _round_up(batch, tile_b)

    xp = jnp.zeros((padded_batch, p), jnp.float32)
    xp = xp.at[:batch, :feat].set(x.astype(jnp.float32))

    out = pl.pallas_call(
        _ae_kernel,
        out_shape=jax.ShapeDtypeStruct((padded_batch, p), jnp.float32),
        grid=(padded_batch // tile_b,),
        in_specs=[
            pl.BlockSpec((tile_b, p), lambda i: (i, 0)),
            pl.BlockSpec((N_LAYERS, p, p), lambda i: (0, 0, 0)),   # resident
            pl.BlockSpec((N_LAYERS, p), lambda i: (0, 0)),          # resident
        ],
        out_specs=pl.BlockSpec((tile_b, p), lambda i: (i, 0)),
        compiler_params=pltpu.CompilerParams(
            dimension_semantics=("parallel",),
            vmem_limit_bytes=32 * 1024 * 1024,
        ),
    )(xp, w_slab, b_slab)
    return out[:batch, :feat]


def init_params(key, input_dim, encoding_dim):
    """Deterministic PyTorch-style init (uniform +-1/sqrt(fan_in)).

    Weights are stored transposed to [in, out]; biases as [1, out].  f32.
    """
    params = []
    for (fan_in, fan_out) in _layer_dims(input_dim, encoding_dim):
        key, kw, kb = jax.random.split(key, 3)
        bound = 1.0 / jnp.sqrt(jnp.float32(fan_in))
        w = jax.random.uniform(kw, (fan_in, fan_out), jnp.float32,
                               minval=-bound, maxval=bound)
        b = jax.random.uniform(kb, (1, fan_out), jnp.float32,
                               minval=-bound, maxval=bound)
        params += [w, b]
    return params


def pack_params(params, input_dim, encoding_dim):
    """Coalesce 16 params into one padded bf16 weight slab + one f32 bias slab."""
    dims = _layer_dims(input_dim, encoding_dim)
    p = _round_up(max(max(d) for d in dims), 128)
    w_slab = jnp.zeros((N_LAYERS, p, p), jnp.bfloat16)
    b_slab = jnp.zeros((N_LAYERS, p), jnp.float32)
    for layer, (fan_in, fan_out) in enumerate(dims):
        w = params[2 * layer].astype(jnp.bfloat16)
        b = params[2 * layer + 1].reshape(-1).astype(jnp.float32)
        w_slab = w_slab.at[layer, :fan_in, :fan_out].set(w)
        b_slab = b_slab.at[layer, :fan_out].set(b)
    return w_slab, b_slab


def reference_forward(x, params):
    """Pure-JAX reference with the same bf16-operand / f32-accumulate math."""
    h = x.astype(jnp.float32)
    for layer in range(N_LAYERS):
        w = params[2 * layer].astype(jnp.bfloat16)
        b = params[2 * layer + 1].astype(jnp.float32)
        y = jnp.dot(h.astype(jnp.bfloat16), w,
                    preferred_element_type=jnp.float32) + b
        if layer in _RELU_LAYERS:
            h = jnp.maximum(y, 0.0)
        elif layer == _ENCODE_LAYER:
            h = y
        else:
            h = jax.nn.sigmoid(y)
    return h


if __name__ == "__main__":
    INPUT_DIM = 256
    ENCODING_DIM = 16
    BATCH = 512          # 2 batch tiles of 256 -> exercises the grid

    key = jax.random.PRNGKey(0)
    key, kx = jax.random.split(key)
    x = jax.random.uniform(kx, (BATCH, INPUT_DIM), jnp.float32)

    params = init_params(key, INPUT_DIM, ENCODING_DIM)
    w_slab, b_slab = pack_params(params, INPUT_DIM, ENCODING_DIM)

    out = autoencoder_forward(x, w_slab, b_slab)
    out = jax.block_until_ready(out)

    ref = reference_forward(x, params)
    assert out.shape == (BATCH, INPUT_DIM)
    assert jnp.allclose(out, ref, atol=1e-3, rtol=1e-3), "mismatch vs reference"

    print("KERNEL_OK")
</pallas_src>

<mosaic_0001>
module attributes {stable_mosaic.version = 11 : i64} {
  func.func @_ae_kernel(%arg0: i32, %arg1: memref<256x256xf32, #tpu.memory_space<vmem>>, %arg2: memref<8x256x256xbf16, #tpu.memory_space<vmem>>, %arg3: memref<8x256xf32, #tpu.memory_space<vmem>>, %arg4: memref<256x256xf32, #tpu.memory_space<vmem>>) attributes {dimension_semantics = [#tpu.dimension_semantics<parallel>], iteration_bounds = array<i64: 2>, scalar_prefetch = 0 : i64, scratch_operands = 0 : i64, tpu.core_type = #tpu.core_type<tc>, window_params = [{transform_indices = @transform_0, window_bounds = array<i64: 256, 256>}, {pipeline_mode = #tpu.pipeline_mode<synchronous>, transform_indices = @transform_1, window_bounds = array<i64: 8, 256, 256>}, {pipeline_mode = #tpu.pipeline_mode<synchronous>, transform_indices = @transform_2, window_bounds = array<i64: 8, 256>}, {transform_indices = @transform_3, window_bounds = array<i64: 256, 256>}]} {
    %c0 = arith.constant 0 : index
    %c0_0 = arith.constant 0 : index
    %0 = vector.load %arg3[%c0, %c0_0] : memref<8x256xf32, #tpu.memory_space<vmem>>, vector<8x256xf32>
    %c0_1 = arith.constant 0 : index
    %c0_2 = arith.constant 0 : index
    %1 = vector.load %arg1[%c0_1, %c0_2] : memref<256x256xf32, #tpu.memory_space<vmem>>, vector<128x256xf32>
    %c128 = arith.constant 128 : index
    %c0_3 = arith.constant 0 : index
    %2 = vector.load %arg1[%c128, %c0_3] : memref<256x256xf32, #tpu.memory_space<vmem>>, vector<128x256xf32>
    %c0_4 = arith.constant 0 : index
    %c0_5 = arith.constant 0 : index
    %c0_6 = arith.constant 0 : index
    %3 = vector.load %arg2[%c0_4, %c0_5, %c0_6] : memref<8x256x256xbf16, #tpu.memory_space<vmem>>, vector<1x256x256xbf16>
    %4 = vector.shape_cast %3 : vector<1x256x256xbf16> to vector<256x256xbf16>
    %5 = vector.extract_strided_slice %0 {offsets = [0, 0], sizes = [1, 256], strides = [1, 1]} : vector<8x256xf32> to vector<1x256xf32>
    %6 = arith.truncf %1 : vector<128x256xf32> to vector<128x256xbf16>
    %cst = arith.constant dense<0.000000e+00> : vector<128x256xf32>
    %7 = tpu.matmul %6, %4, %cst {dimension_numbers = #tpu.dot_dimension_numbers<[1], [0], [0], [1], [0, 0, 1, 1], [], []>} : vector<128x256xbf16>, vector<256x256xbf16>, vector<128x256xf32> -> vector<128x256xf32>
    %8 = vector.broadcast %5 : vector<1x256xf32> to vector<128x256xf32>
    %9 = arith.addf %7, %8 : vector<128x256xf32>
    %10 = arith.truncf %2 : vector<128x256xf32> to vector<128x256xbf16>
    %cst_7 = arith.constant dense<0.000000e+00> : vector<128x256xf32>
    %11 = tpu.matmul %10, %4, %cst_7 {dimension_numbers = #tpu.dot_dimension_numbers<[1], [0], [0], [1], [0, 0, 1, 1], [], []>} : vector<128x256xbf16>, vector<256x256xbf16>, vector<128x256xf32> -> vector<128x256xf32>
    %12 = vector.broadcast %5 : vector<1x256xf32> to vector<128x256xf32>
    %13 = arith.addf %11, %12 : vector<128x256xf32>
    %cst_8 = arith.constant 0.000000e+00 : f32
    %14 = vector.broadcast %cst_8 : f32 to vector<128x256xf32>
    %15 = arith.maximumf %9, %14 : vector<128x256xf32>
    %cst_9 = arith.constant 0.000000e+00 : f32
    %16 = vector.broadcast %cst_9 : f32 to vector<128x256xf32>
    %17 = arith.maximumf %13, %16 : vector<128x256xf32>
    %c1 = arith.constant 1 : index
    %c0_10 = arith.constant 0 : index
    %c0_11 = arith.constant 0 : index
    %18 = vector.load %arg2[%c1, %c0_10, %c0_11] : memref<8x256x256xbf16, #tpu.memory_space<vmem>>, vector<1x256x256xbf16>
    %19 = vector.shape_cast %18 : vector<1x256x256xbf16> to vector<256x256xbf16>
    %20 = vector.extract_strided_slice %0 {offsets = [1, 0], sizes = [1, 256], strides = [1, 1]} : vector<8x256xf32> to vector<1x256xf32>
    %21 = arith.truncf %15 : vector<128x256xf32> to vector<128x256xbf16>
    %cst_12 = arith.constant dense<0.000000e+00> : vector<128x256xf32>
    %22 = tpu.matmul %21, %19, %cst_12 {dimension_numbers = #tpu.dot_dimension_numbers<[1], [0], [0], [1], [0, 0, 1, 1], [], []>} : vector<128x256xbf16>, vector<256x256xbf16>, vector<128x256xf32> -> vector<128x256xf32>
    %23 = vector.broadcast %20 : vector<1x256xf32> to vector<128x256xf32>
    %24 = arith.addf %22, %23 : vector<128x256xf32>
    %25 = arith.truncf %17 : vector<128x256xf32> to vector<128x256xbf16>
    %cst_13 = arith.constant dense<0.000000e+00> : vector<128x256xf32>
    %26 = tpu.matmul %25, %19, %cst_13 {dimension_numbers = #tpu.dot_dimension_numbers<[1], [0], [0], [1], [0, 0, 1, 1], [], []>} : vector<128x256xbf16>, vector<256x256xbf16>, vector<128x256xf32> -> vector<128x256xf32>
    %27 = vector.broadcast %20 : vector<1x256xf32> to vector<128x256xf32>
    %28 = arith.addf %26, %27 : vector<128x256xf32>
    %cst_14 = arith.constant 0.000000e+00 : f32
    %29 = vector.broadcast %cst_14 : f32 to vector<128x256xf32>
    %30 = arith.maximumf %24, %29 : vector<128x256xf32>
    %cst_15 = arith.constant 0.000000e+00 : f32
    %31 = vector.broadcast %cst_15 : f32 to vector<128x256xf32>
    %32 = arith.maximumf %28, %31 : vector<128x256xf32>
    %c2 = arith.constant 2 : index
    %c0_16 = arith.constant 0 : index
    %c0_17 = arith.constant 0 : index
    %33 = vector.load %arg2[%c2, %c0_16, %c0_17] : memref<8x256x256xbf16, #tpu.memory_space<vmem>>, vector<1x256x256xbf16>
    %34 = vector.shape_cast %33 : vector<1x256x256xbf16> to vector<256x256xbf16>
    %35 = vector.extract_strided_slice %0 {offsets = [2, 0], sizes = [1, 256], strides = [1, 1]} : vector<8x256xf32> to vector<1x256xf32>
    %36 = arith.truncf %30 : vector<128x256xf32> to vector<128x256xbf16>
    %cst_18 = arith.constant dense<0.000000e+00> : vector<128x256xf32>
    %37 = tpu.matmul %36, %34, %cst_18 {dimension_numbers = #tpu.dot_dimension_numbers<[1], [0], [0], [1], [0, 0, 1, 1], [], []>} : vector<128x256xbf16>, vector<256x256xbf16>, vector<128x256xf32> -> vector<128x256xf32>
    %38 = vector.broadcast %35 : vector<1x256xf32> to vector<128x256xf32>
    %39 = arith.addf %37, %38 : vector<128x256xf32>
    %40 = arith.truncf %32 : vector<128x256xf32> to vector<128x256xbf16>
    %cst_19 = arith.constant dense<0.000000e+00> : vector<128x256xf32>
    %41 = tpu.matmul %40, %34, %cst_19 {dimension_numbers = #tpu.dot_dimension_numbers<[1], [0], [0], [1], [0, 0, 1, 1], [], []>} : vector<128x256xbf16>, vector<256x256xbf16>, vector<128x256xf32> -> vector<128x256xf32>
    %42 = vector.broadcast %35 : vector<1x256xf32> to vector<128x256xf32>
    %43 = arith.addf %41, %42 : vector<128x256xf32>
    %cst_20 = arith.constant 0.000000e+00 : f32
    %44 = vector.broadcast %cst_20 : f32 to vector<128x256xf32>
    %45 = arith.maximumf %39, %44 : vector<128x256xf32>
    %cst_21 = arith.constant 0.000000e+00 : f32
    %46 = vector.broadcast %cst_21 : f32 to vector<128x256xf32>
    %47 = arith.maximumf %43, %46 : vector<128x256xf32>
    %c3 = arith.constant 3 : index
    %c0_22 = arith.constant 0 : index
    %c0_23 = arith.constant 0 : index
    %48 = vector.load %arg2[%c3, %c0_22, %c0_23] : memref<8x256x256xbf16, #tpu.memory_space<vmem>>, vector<1x256x256xbf16>
    %49 = vector.shape_cast %48 : vector<1x256x256xbf16> to vector<256x256xbf16>
    %50 = vector.extract_strided_slice %0 {offsets = [3, 0], sizes = [1, 256], strides = [1, 1]} : vector<8x256xf32> to vector<1x256xf32>
    %51 = arith.truncf %45 : vector<128x256xf32> to vector<128x256xbf16>
    %cst_24 = arith.constant dense<0.000000e+00> : vector<128x256xf32>
    %52 = tpu.matmul %51, %49, %cst_24 {dimension_numbers = #tpu.dot_dimension_numbers<[1], [0], [0], [1], [0, 0, 1, 1], [], []>} : vector<128x256xbf16>, vector<256x256xbf16>, vector<128x256xf32> -> vector<128x256xf32>
    %53 = vector.broadcast %50 : vector<1x256xf32> to vector<128x256xf32>
    %54 = arith.addf %52, %53 : vector<128x256xf32>
    %55 = arith.truncf %47 : vector<128x256xf32> to vector<128x256xbf16>
    %cst_25 = arith.constant dense<0.000000e+00> : vector<128x256xf32>
    %56 = tpu.matmul %55, %49, %cst_25 {dimension_numbers = #tpu.dot_dimension_numbers<[1], [0], [0], [1], [0, 0, 1, 1], [], []>} : vector<128x256xbf16>, vector<256x256xbf16>, vector<128x256xf32> -> vector<128x256xf32>
    %57 = vector.broadcast %50 : vector<1x256xf32> to vector<128x256xf32>
    %58 = arith.addf %56, %57 : vector<128x256xf32>
    %c4 = arith.constant 4 : index
    %c0_26 = arith.constant 0 : index
    %c0_27 = arith.constant 0 : index
    %59 = vector.load %arg2[%c4, %c0_26, %c0_27] : memref<8x256x256xbf16, #tpu.memory_space<vmem>>, vector<1x256x256xbf16>
    %60 = vector.shape_cast %59 : vector<1x256x256xbf16> to vector<256x256xbf16>
    %61 = vector.extract_strided_slice %0 {offsets = [4, 0], sizes = [1, 256], strides = [1, 1]} : vector<8x256xf32> to vector<1x256xf32>
    %62 = arith.truncf %54 : vector<128x256xf32> to vector<128x256xbf16>
    %cst_28 = arith.constant dense<0.000000e+00> : vector<128x256xf32>
    %63 = tpu.matmul %62, %60, %cst_28 {dimension_numbers = #tpu.dot_dimension_numbers<[1], [0], [0], [1], [0, 0, 1, 1], [], []>} : vector<128x256xbf16>, vector<256x256xbf16>, vector<128x256xf32> -> vector<128x256xf32>
    %64 = vector.broadcast %61 : vector<1x256xf32> to vector<128x256xf32>
    %65 = arith.addf %63, %64 : vector<128x256xf32>
    %66 = arith.truncf %58 : vector<128x256xf32> to vector<128x256xbf16>
    %cst_29 = arith.constant dense<0.000000e+00> : vector<128x256xf32>
    %67 = tpu.matmul %66, %60, %cst_29 {dimension_numbers = #tpu.dot_dimension_numbers<[1], [0], [0], [1], [0, 0, 1, 1], [], []>} : vector<128x256xbf16>, vector<256x256xbf16>, vector<128x256xf32> -> vector<128x256xf32>
    %68 = vector.broadcast %61 : vector<1x256xf32> to vector<128x256xf32>
    %69 = arith.addf %67, %68 : vector<128x256xf32>
    %cst_30 = arith.constant 0.000000e+00 : f32
    %70 = vector.broadcast %cst_30 : f32 to vector<128x256xf32>
    %71 = arith.maximumf %65, %70 : vector<128x256xf32>
    %cst_31 = arith.constant 0.000000e+00 : f32
    %72 = vector.broadcast %cst_31 : f32 to vector<128x256xf32>
    %73 = arith.maximumf %69, %72 : vector<128x256xf32>
    %c5 = arith.constant 5 : index
    %c0_32 = arith.constant 0 : index
    %c0_33 = arith.constant 0 : index
    %74 = vector.load %arg2[%c5, %c0_32, %c0_33] : memref<8x256x256xbf16, #tpu.memory_space<vmem>>, vector<1x256x256xbf16>
    %75 = vector.shape_cast %74 : vector<1x256x256xbf16> to vector<256x256xbf16>
    %76 = vector.extract_strided_slice %0 {offsets = [5, 0], sizes = [1, 256], strides = [1, 1]} : vector<8x256xf32> to vector<1x256xf32>
    %77 = arith.truncf %71 : vector<128x256xf32> to vector<128x256xbf16>
    %cst_34 = arith.constant dense<0.000000e+00> : vector<128x256xf32>
    %78 = tpu.matmul %77, %75, %cst_34 {dimension_numbers = #tpu.dot_dimension_numbers<[1], [0], [0], [1], [0, 0, 1, 1], [], []>} : vector<128x256xbf16>, vector<256x256xbf16>, vector<128x256xf32> -> vector<128x256xf32>
    %79 = vector.broadcast %76 : vector<1x256xf32> to vector<128x256xf32>
    %80 = arith.addf %78, %79 : vector<128x256xf32>
    %81 = arith.truncf %73 : vector<128x256xf32> to vector<128x256xbf16>
    %cst_35 = arith.constant dense<0.000000e+00> : vector<128x256xf32>
    %82 = tpu.matmul %81, %75, %cst_35 {dimension_numbers = #tpu.dot_dimension_numbers<[1], [0], [0], [1], [0, 0, 1, 1], [], []>} : vector<128x256xbf16>, vector<256x256xbf16>, vector<128x256xf32> -> vector<128x256xf32>
    %83 = vector.broadcast %76 : vector<1x256xf32> to vector<128x256xf32>
    %84 = arith.addf %82, %83 : vector<128x256xf32>
    %cst_36 = arith.constant 0.000000e+00 : f32
    %85 = vector.broadcast %cst_36 : f32 to vector<128x256xf32>
    %86 = arith.maximumf %80, %85 : vector<128x256xf32>
    %cst_37 = arith.constant 0.000000e+00 : f32
    %87 = vector.broadcast %cst_37 : f32 to vector<128x256xf32>
    %88 = arith.maximumf %84, %87 : vector<128x256xf32>
    %c6 = arith.constant 6 : index
    %c0_38 = arith.constant 0 : index
    %c0_39 = arith.constant 0 : index
    %89 = vector.load %arg2[%c6, %c0_38, %c0_39] : memref<8x256x256xbf16, #tpu.memory_space<vmem>>, vector<1x256x256xbf16>
    %90 = vector.shape_cast %89 : vector<1x256x256xbf16> to vector<256x256xbf16>
    %91 = vector.extract_strided_slice %0 {offsets = [6, 0], sizes = [1, 256], strides = [1, 1]} : vector<8x256xf32> to vector<1x256xf32>
    %92 = arith.truncf %86 : vector<128x256xf32> to vector<128x256xbf16>
    %cst_40 = arith.constant dense<0.000000e+00> : vector<128x256xf32>
    %93 = tpu.matmul %92, %90, %cst_40 {dimension_numbers = #tpu.dot_dimension_numbers<[1], [0], [0], [1], [0, 0, 1, 1], [], []>} : vector<128x256xbf16>, vector<256x256xbf16>, vector<128x256xf32> -> vector<128x256xf32>
    %94 = vector.broadcast %91 : vector<1x256xf32> to vector<128x256xf32>
    %95 = arith.addf %93, %94 : vector<128x256xf32>
    %96 = arith.truncf %88 : vector<128x256xf32> to vector<128x256xbf16>
    %cst_41 = arith.constant dense<0.000000e+00> : vector<128x256xf32>
    %97 = tpu.matmul %96, %90, %cst_41 {dimension_numbers = #tpu.dot_dimension_numbers<[1], [0], [0], [1], [0, 0, 1, 1], [], []>} : vector<128x256xbf16>, vector<256x256xbf16>, vector<128x256xf32> -> vector<128x256xf32>
    %98 = vector.broadcast %91 : vector<1x256xf32> to vector<128x256xf32>
    %99 = arith.addf %97, %98 : vector<128x256xf32>
    %cst_42 = arith.constant 0.000000e+00 : f32
    %100 = vector.broadcast %cst_42 : f32 to vector<128x256xf32>
    %101 = arith.maximumf %95, %100 : vector<128x256xf32>
    %cst_43 = arith.constant 0.000000e+00 : f32
    %102 = vector.broadcast %cst_43 : f32 to vector<128x256xf32>
    %103 = arith.maximumf %99, %102 : vector<128x256xf32>
    %c7 = arith.constant 7 : index
    %c0_44 = arith.constant 0 : index
    %c0_45 = arith.constant 0 : index
    %104 = vector.load %arg2[%c7, %c0_44, %c0_45] : memref<8x256x256xbf16, #tpu.memory_space<vmem>>, vector<1x256x256xbf16>
    %105 = vector.shape_cast %104 : vector<1x256x256xbf16> to vector<256x256xbf16>
    %106 = vector.extract_strided_slice %0 {offsets = [7, 0], sizes = [1, 256], strides = [1, 1]} : vector<8x256xf32> to vector<1x256xf32>
    %107 = arith.truncf %101 : vector<128x256xf32> to vector<128x256xbf16>
    %cst_46 = arith.constant dense<0.000000e+00> : vector<128x256xf32>
    %108 = tpu.matmul %107, %105, %cst_46 {dimension_numbers = #tpu.dot_dimension_numbers<[1], [0], [0], [1], [0, 0, 1, 1], [], []>} : vector<128x256xbf16>, vector<256x256xbf16>, vector<128x256xf32> -> vector<128x256xf32>
    %109 = vector.broadcast %106 : vector<1x256xf32> to vector<128x256xf32>
    %110 = arith.addf %108, %109 : vector<128x256xf32>
    %111 = arith.truncf %103 : vector<128x256xf32> to vector<128x256xbf16>
    %cst_47 = arith.constant dense<0.000000e+00> : vector<128x256xf32>
    %112 = tpu.matmul %111, %105, %cst_47 {dimension_numbers = #tpu.dot_dimension_numbers<[1], [0], [0], [1], [0, 0, 1, 1], [], []>} : vector<128x256xbf16>, vector<256x256xbf16>, vector<128x256xf32> -> vector<128x256xf32>
    %113 = vector.broadcast %106 : vector<1x256xf32> to vector<128x256xf32>
    %114 = arith.addf %112, %113 : vector<128x256xf32>
    %115 = arith.negf %110 : vector<128x256xf32>
    %116 = math.exp %115 : vector<128x256xf32>
    %cst_48 = arith.constant 1.000000e+00 : f32
    %117 = vector.broadcast %cst_48 : f32 to vector<128x256xf32>
    %118 = arith.addf %117, %116 : vector<128x256xf32>
    %119 = arith.divf %117, %118 : vector<128x256xf32>
    %120 = arith.negf %114 : vector<128x256xf32>
    %121 = math.exp %120 : vector<128x256xf32>
    %cst_49 = arith.constant 1.000000e+00 : f32
    %122 = vector.broadcast %cst_49 : f32 to vector<128x256xf32>
    %123 = arith.addf %122, %121 : vector<128x256xf32>
    %124 = arith.divf %122, %123 : vector<128x256xf32>
    %c0_50 = arith.constant 0 : index
    %c0_51 = arith.constant 0 : index
    %125 = vector.load %arg4[%c0_50, %c0_51] : memref<256x256xf32, #tpu.memory_space<vmem>>, vector<128x256xf32>
    tpu.vector_store %arg4[%c0_50, %c0_51], %119 {strides = array<i32>} : memref<256x256xf32, #tpu.memory_space<vmem>>, vector<128x256xf32>,
    %c128_52 = arith.constant 128 : index
    %c0_53 = arith.constant 0 : index
    %126 = vector.load %arg4[%c128_52, %c0_53] : memref<256x256xf32, #tpu.memory_space<vmem>>, vector<128x256xf32>
    tpu.vector_store %arg4[%c128_52, %c0_53], %124 {strides = array<i32>} : memref<256x256xf32, #tpu.memory_space<vmem>>, vector<128x256xf32>,
    return
  }
  func.func @transform_0(%arg0: i32) -> (i32, i32) {
    %c0_i32 = arith.constant 0 : i32
    %c0_i32_0 = arith.constant 0 : i32
    return %arg0, %c0_i32 : i32, i32
  }
  func.func @transform_1(%arg0: i32) -> (i32, i32, i32) {
    %c0_i32 = arith.constant 0 : i32
    %c0_i32_0 = arith.constant 0 : i32
    %c0_i32_1 = arith.constant 0 : i32
    %c0_i32_2 = arith.constant 0 : i32
    return %c0_i32, %c0_i32_0, %c0_i32_1 : i32, i32, i32
  }
  func.func @transform_2(%arg0: i32) -> (i32, i32) {
    %c0_i32 = arith.constant 0 : i32
    %c0_i32_0 = arith.constant 0 : i32
    %c0_i32_1 = arith.constant 0 : i32
    return %c0_i32, %c0_i32_0 : i32, i32
  }
  func.func @transform_3(%arg0: i32) -> (i32, i32) {
    %c0_i32 = arith.constant 0 : i32
    %c0_i32_0 = arith.constant 0 : i32
    return %arg0, %c0_i32 : i32, i32
  }
}

</mosaic_0001>

<bundles_post_ra>
// kernel: autoencoder_forward.1
= control target key start
LH: loop header
LB: loop body
LE: loop exit
PB: predicated region body
PF: predicated region fallthrough
CT: control target
= control target key end

     0   :  { %8 = vsyncpa [#allocation3], 0  ;;  %s7061_s0 = inlined_call_operand.hbm [shape: f32[512,256], index: 0, kind: input, shape index: {}]   ;;  %s7062_s1 = inlined_call_operand.hbm [shape: bf16[8,256,256], index: 1, kind: input, shape index: {}]   ;;  %s7063_s2 = inlined_call_operand.hbm [shape: f32[8,256], index: 2, kind: input, shape index: {}]   ;;  %s7064_s3 = inlined_call_operand.hbm [shape: f32[512,256], index: 3, kind: output, shape index: {}]  }
   0x1   :  { %10 = vsyncpa [#allocation3 + $0x1], 0 }
   0x2   :  { %11 = vsyncpa [#allocation6], 0 }
   0x3   :  { %12 = vsyncpa [#allocation4], 0 }
   0x4   :  { %14 = vsyncpa [#allocation4 + $0x1], 0  ;;  %s6138_s12 = smov 0   ;;  %s6140_s13 = smov 0  }
   0x5   :  { %s6142_s14 = smov 0   ;;  %s6144_s15 = smov 0  }
   0x6 LB: > { %s6159_s16 = sadd.s32 4294967295, %s6106_s15   ;;  %s4895_s17 = sadd.s32 4294967294, %s6106_s15   ;;  %s6106_s15 = sphi %s6144_s15, %s7086_s15   ;;  %s6102_s14 = sphi %s6142_s14, %s7085_s14   ;;  %s6098_s13 = sphi %s6140_s13, %s7084_s13   ;;  %s6094_s12 = sphi %s6138_s12, %s7083_s12  }
   0x7   : > { %p40_p0 = scmp.ne.s32.totalorder %s6098_s13, %s6094_s12  ;;  %p7065_p1 = scmp.eq.s32.totalorder %s6159_s16, 0 }
   0x8   : > { %p112_p3 = scmp.eq.s32.totalorder %s4895_s17, 1  ;;  %p4896_p5 = scmp.ge.s32.totalorder %s6106_s15, 1 }
   0x9   : > { %p6168_p4 = por %p7065_p1, %p40_p0  ;;  %p119_p7 = scmp.lt.s32.totalorder %s6106_s15, 3 }
   0xa   : > { %p6173_p6 = por %p112_p3, %p40_p0  ;;  %s6108_s21 = smov [#allocation5]  }
   0xb   : > { %s7069_s18 = scalar_select %p6168_p4, 1, 0 }
   0xc   : > { %s7070_s19 = scalar_select %p6173_p6, 1, 0 }
   0xd   : > { %p6178_p8 = pnand %p4896_p5, %p119_p7  ;;  %s131_s22 = sshll.u32 %s6108_s21, 4  ;;  %s132_s22 = int_to_ptr.vmem [resolvable:$true] %s131_s22 }
   0xe   : > { %s6109_s24 = smov [#allocation7]   ;;  %s5969_s26 = scalar_lea.vmem %s132_s22, 32768 }
   0xf   : > { %s7071_s20 = scalar_select %p6178_p8, 1, 0 }
  0x10   : > { %p5251_p9 = pneg %p6178_p8  ;;  %s145_s25 = sshll.u32 %s6109_s24, 4  ;;  %s146_s25 = int_to_ptr.vmem [resolvable:$true] %s145_s25 }
  0x11   : > { %p5970_p13 = scmp.ne.s32.totalorder %s132_s22, %s5969_s26  ;;  %p5977_p5 = scmp.lt.s32.totalorder %s132_s22, %s132_s22 }
  0x12   : > { %p6187_p11 = pnand %p5251_p9, %p7065_p1  ;;  %p5978_p7 = scmp.lt.s32.totalorder %s5969_s26, %s5969_s26 }
  0x14   : > { %p5960_p12 = pneg %p6187_p11  ;;  %p5979_p10 = por %p5978_p7, %p5977_p5 }
  0x16   : > { %p5972_p0 = pnand %p5970_p13, %p5960_p12 }
  0x18   : > { %p5973_p3 = pneg %p5972_p0 }
  0x1a   : > { %p5980_p9 = pnand %p5979_p10, %p5973_p3 }
  0x1c   : > { %5983 = shalt.err (!%p5980_p9)
}
  0x1d   : > { %s6110_s27 = smov 128   ;;  %s6111_s28 = smov 8  }
  0x1e   : > { %5254 = dma.hbm_to_vmem [thread:$0]  (!%p6187_p11), %s7062_s1, 32768, %s132_s22, [#allocation6], %s6110_s27, %s6110_s27, %s6111_s28  }
  0x1f   : > { %s5995_s4 = scalar_lea.vmem %s146_s25, 256  ;;  %p6003_p2 = scmp.lt.s32.totalorder %s146_s25, %s146_s25 }
  0x20   : > { %p5996_p1 = scmp.ne.s32.totalorder %s146_s25, %s5995_s4  ;;  %p6004_p6 = scmp.lt.s32.totalorder %s5995_s4, %s5995_s4 }
  0x22   : > { %p5998_p13 = pnand %p5996_p1, %p5960_p12  ;;  %p6005_p5 = por %p6004_p6, %p6003_p2 }
  0x24   : > { %p5999_p0 = pneg %p5998_p13 }
  0x26   : > { %p6006_p10 = pnand %p6005_p5, %p5999_p0 }
  0x28   : > { %6009 = shalt.err (!%p6006_p10)
}
  0x29   : > { %5257 = dma.hbm_to_vmem [thread:$0]  (!%p6187_p11), %s7063_s2, 256, %s146_s25, [#allocation6]  }
  0x2a   : > { %s6210_s7 = sadd.s32 1, %s6106_s15   ;;  %s27_s8 = sadd.s32 1, %s6102_s14 }
  0x2b   : > { %s24_s9 = ssub.s32 %s6106_s15, %s6210_s7  ;;  %p34_p1 = scmp.ne.s32.totalorder %s6102_s14, %s6098_s13 }
  0x2c   : > { %p25_p2 = scmp.eq.s32.totalorder %s24_s9, 0  ;;  %p35_p6 = scmp.eq.s32.totalorder %s6106_s15, 0 }
  0x2d   : > { %p7073_p12 = scmp.eq.s32.totalorder %s6159_s16, 1  ;;  %p5268_p7 = scmp.lt.s32.totalorder %s6106_s15, 2 }
  0x2e   : > { %s6226_s11 = scalar_select %p25_p2, %s6102_s14, %s27_s8  }
  0x2f   : > { %p6220_p3 = por %p7073_p12, %p34_p1  ;;  %p36_p9 = por %p35_p6, %p34_p1 }
  0x30   : > { %s156_s17 = sand.u32 1, %s6102_s14   ;;  %s5236_s22 = sshll.u32 %s6106_s15, 13 }
  0x31   : > { %s7074_s10 = scalar_select %p6220_p3, 1, 0 }
  0x32   : > { %s4900_s21 = sshll.u32 %s156_s17, 9  ;;  %s6233_s25 = scalar_lea.hbm %s7061_s0, %s5236_s22 }
  0x33   : > { %s160_s26 = scalar_lea.vmem [#allocation2], %s4900_s21  ;;  %p6237_p11 = pnand %p5268_p7, %p36_p9 }
  0x34   : > { %s168_s27 = sshll.u32 %s160_s26, 4  ;;  %s6241_s29 = scalar_lea.sflag [#allocation3], %s156_s17  ;;  %s6235_s27 = int_to_ptr.vmem [resolvable:$true] %s168_s27 }
  0x35   : > { %s6010_s30 = scalar_lea.hbm %s6233_s25, 8192  ;;  %p6012_p0 = pneg %p6237_p11 }
  0x36   : > { %p6011_p13 = scmp.ne.s32.totalorder %s6233_s25, %s6010_s30  ;;  %s6015_s6 = scalar_lea.hbm %s7061_s0, 16384 }
  0x37   : > { %p6016_p1 = scmp.lt.s32.totalorder %s6233_s25, %s7061_s0  ;;  %p6017_p2 = scmp.lt.s32.totalorder %s6015_s6, %s6010_s30 }
  0x38   : > { %p6013_p5 = pnand %p6012_p0, %p6011_p13 }
  0x39   : > { %p6018_p6 = por %p6017_p2, %p6016_p1 }
  0x3a   : > { %p6014_p10 = pneg %p6013_p5 }
  0x3c   : > { %p6019_p12 = pnand %p6018_p6, %p6014_p10 }
  0x3e   : > { %6022 = shalt.err (!%p6019_p12)
}
  0x3f   : > { %s6023_s17 = scalar_lea.vmem %s6235_s27, 8192  ;;  %s6112_s21 = smov [#allocation2]  }
  0x40   : > { %p6024_p7 = scmp.ne.s32.totalorder %s6235_s27, %s6023_s17  ;;  %s6028_s22 = sshll.u32 %s6112_s21, 4  ;;  %s6029_s22 = int_to_ptr.vmem [resolvable:$false] %s6028_s22 }
  0x41   : > { %s6030_s23 = scalar_lea.vmem %s6029_s22, 16384  ;;  %p6031_p5 = scmp.lt.s32.totalorder %s6235_s27, %s6029_s22 }
  0x42   : > { %p6026_p9 = pnand %p6024_p7, %p6012_p0  ;;  %p6032_p3 = scmp.lt.s32.totalorder %s6030_s23, %s6023_s17 }
  0x44   : > { %p6027_p13 = pneg %p6026_p9  ;;  %p6033_p4 = por %p6032_p3, %p6031_p5 }
  0x46   : > { %p6034_p8 = pnand %p6033_p4, %p6027_p13 }
  0x48   : > { %6037 = shalt.err (!%p6034_p8)
}
  0x49   : > { %s6113_s24 = smov 256   ;;  %s6114_s26 = smov 16  }
  0x4a   : > { %5261 = dma.hbm_to_vmem [thread:$0]  (!%p6237_p11), %s6233_s25, 8192, %s6235_s27, %s6241_s29, %s6113_s24, %s6113_s24, %s6114_s26  }
  0x4b   : > { %p7076_p0 = scmp.ne.s32.totalorder %s7071_s20, 0 }
  0x4c   : > { %s6265_s30 = sand.u32 (!%p7076_p0), 1, %s6098_s13   ;;  %p7077_p4 = scmp.ne.s32.totalorder (!%p7076_p0), %s7069_s18, 0 }
  0x4d   : > { %180 = sbr.rel (%p7076_p0) target bundleno = 1943 (0x797), region = 32  ;;  %s4905_s4 = sshll.u32 (!%p7076_p0), %s6265_s30, 9 }
  0x4e   : > { %s183_s5 = scalar_lea.sflag (!%p7076_p0), [#allocation3], %s6265_s30  ;;  %s6271_s6 = scalar_lea.vmem (!%p7076_p0), [#allocation2], %s4905_s4 }
  0x52   : > { %6081 = dma.done.wait (%p7077_p4), %s183_s5, 8192  }
  0x53   : > { %6083 = vsyncadd (%p7077_p4), %s183_s5, 4294959104  ;;  %p7078_p8 = scmp.eq.s32.totalorder %s6159_s16, 0 }
  0x55   : > { %6085 = dma.done.wait (%p7078_p8), [#allocation6], 33024   ;;  %p7079_p3 = pmov %p7078_p8 }
  0x56   : > { %v5312_v0 = vld [vmem:[#allocation5 + $0x74] ss:$8 sps:$4 sm:$0xff]   ;;  %v5314_v1 = vld [vmem:[#allocation5 + $0x70] ss:$8 sps:$4 sm:$0xff]   ;;  %v5315_v2 = vld [vmem:[#allocation5 + $0x64] ss:$8 sps:$4 sm:$0xff]  }
  0x57   : > { %6087 = vsyncadd (%p7079_p3), [#allocation6], 4294934272  ;;  %501 = vmatprep.subr.bf16.mxu0 %v5312_v0  ;;  %630 = vmatprep.subr.bf16.mxu1 %v5312_v0  ;;  %v5317_v3 = vld [vmem:[#allocation5 + $0x60] ss:$8 sps:$4 sm:$0xff]   ;;  %v5318_v4 = vld [vmem:[#allocation5 + $0x54] ss:$8 sps:$4 sm:$0xff]  }
  0x58   : > { %502 = vmatpush1.bf16.msra.mxu0 %v5314_v1  ;;  %631 = vmatpush1.bf16.msra.mxu1 %v5314_v1  ;;  %v5320_v5 = vld [vmem:[#allocation5 + $0x50] ss:$8 sps:$4 sm:$0xff]   ;;  %v5321_v6 = vld [vmem:[#allocation5 + $0x44] ss:$8 sps:$4 sm:$0xff]   ;;  %v5323_v7 = vld [vmem:[#allocation5 + $0x40] ss:$8 sps:$4 sm:$0xff]  }
  0x59   : > { %503 = vmatprep.subr.bf16.mxu0 %v5315_v2  ;;  %632 = vmatprep.subr.bf16.mxu1 %v5315_v2  ;;  %v5324_v8 = vld [vmem:[#allocation5 + $0x34] ss:$8 sps:$4 sm:$0xff]   ;;  %v5326_v9 = vld [vmem:[#allocation5 + $0x30] ss:$8 sps:$4 sm:$0xff]   ;;  %v5327_v10 = vld [vmem:[#allocation5 + $0x24] ss:$8 sps:$4 sm:$0xff]  }
  0x5a   : > { %v5329_v11 = vld [vmem:[#allocation5 + $0x20] ss:$8 sps:$4 sm:$0xff]   ;;  %v5330_v12 = vld [vmem:[#allocation5 + $0x14] ss:$8 sps:$4 sm:$0xff]   ;;  %v5332_v18 = vld [vmem:[#allocation5 + $0x10] ss:$8 sps:$4 sm:$0xff]  }
  0x5b   : > { %v222_v13 = vld [vmem:[%s6271_s6 + $0x8] sm:$0xff]  ;;  %v224_v14 = vld [vmem:[%s6271_s6 + $0x18] sm:$0xff]  ;;  %v221_v38 = vld [vmem:[%s6271_s6] sm:$0xff]  ;;  %s6891_s18 = scalar_lea.vmem [#allocation8], %s4905_s4  ;;  %s5238_s20 = sshll.u32 %s6159_s16, 13 }
  0x5c   : > { %504 = vmatpush1.bf16.msra.mxu0 %v5317_v3  ;;  %633 = vmatpush1.bf16.msra.mxu1 %v5317_v3  ;;  %v318_v15 = vpack.c.bf16 %v224_v14, %v222_v13  ;;  %v254_v16 = vld [vmem:[%s6271_s6 + $0x108] sm:$0xff]  ;;  %v256_v17 = vld [vmem:[%s6271_s6 + $0x118] sm:$0xff]  ;;  %v223_v39 = vld [vmem:[%s6271_s6 + $0x10] sm:$0xff]  ;;  %s4803_s25 = sshll.u32 %s6891_s18, 4  ;;  %s7013_s29 = scalar_lea.hbm %s7064_s3, %s5238_s20  ;;  %s7015_s25 = int_to_ptr.vmem [resolvable:$true] %s4803_s25 }
  0x5d   : > { %505 = vmatprep.subr.bf16.mxu0 %v5318_v4  ;;  %634 = vmatprep.subr.bf16.mxu1 %v5318_v4  ;;  %v615_v19 = vpack.c.bf16 %v256_v17, %v254_v16  ;;  %v5333_v20 = vld [vmem:[#allocation5 + $0x4] ss:$8 sps:$4 sm:$0xff]   ;;  %v5335_v21 = vld [vmem:[#allocation5] ss:$8 sps:$4 sm:$0xff]   ;;  %v5336_v22 = vld [vmem:[#allocation5 + $0xf4] ss:$8 sps:$4 sm:$0xff]   ;;  %v317_v47 = vpack.c.bf16 %v223_v39, %v221_v38 }
  0x5e   : > { %533 = vmatprep.mubr.bf16.mxu0 %v318_v15  ;;  %v5338_v23 = vld [vmem:[#allocation5 + $0xf0] ss:$8 sps:$4 sm:$0xff]   ;;  %v5339_v24 = vld [vmem:[#allocation5 + $0xe4] ss:$8 sps:$4 sm:$0xff]   ;;  %v5341_v25 = vld [vmem:[#allocation5 + $0xe0] ss:$8 sps:$4 sm:$0xff]  }
  0x5f   : > { %662 = vmatprep.mubr.bf16.mxu1 %v615_v19  ;;  %v5342_v26 = vld [vmem:[#allocation5 + $0xd4] ss:$8 sps:$4 sm:$0xff]   ;;  %v5344_v27 = vld [vmem:[#allocation5 + $0xd0] ss:$8 sps:$4 sm:$0xff]   ;;  %v5345_v28 = vld [vmem:[#allocation5 + $0xc4] ss:$8 sps:$4 sm:$0xff]  }
  0x60   : > { %506 = vmatpush1.bf16.msra.mxu0 %v5320_v5  ;;  %635 = vmatpush1.bf16.msra.mxu1 %v5320_v5  ;;  %v5347_v29 = vld [vmem:[#allocation5 + $0xc0] ss:$8 sps:$4 sm:$0xff]   ;;  %v5348_v30 = vld [vmem:[#allocation5 + $0xb4] ss:$8 sps:$4 sm:$0xff]   ;;  %v5350_v31 = vld [vmem:[#allocation5 + $0xb0] ss:$8 sps:$4 sm:$0xff]  }
  0x61   : > { %507 = vmatprep.subr.bf16.mxu0 %v5321_v6  ;;  %636 = vmatprep.subr.bf16.mxu1 %v5321_v6  ;;  %v5351_v32 = vld [vmem:[#allocation5 + $0xa4] ss:$8 sps:$4 sm:$0xff]   ;;  %v5353_v33 = vld [vmem:[#allocation5 + $0xa0] ss:$8 sps:$4 sm:$0xff]   ;;  %v5354_v34 = vld [vmem:[#allocation5 + $0x94] ss:$8 sps:$4 sm:$0xff]  }
  0x62   : > { %v5356_v35 = vld [vmem:[#allocation5 + $0x90] ss:$8 sps:$4 sm:$0xff]   ;;  %v5357_v36 = vld [vmem:[#allocation5 + $0x84] ss:$8 sps:$4 sm:$0xff]   ;;  %v5359_v37 = vld [vmem:[#allocation5 + $0x80] ss:$8 sps:$4 sm:$0xff]  }
  0x63   : > { %v253_v40 = vld [vmem:[%s6271_s6 + $0x100] sm:$0xff]  ;;  %v255_v41 = vld [vmem:[%s6271_s6 + $0x110] sm:$0xff]  ;;  %v226_v42 = vld [vmem:[%s6271_s6 + $0x28] sm:$0xff]  ;;  %s4789_s16 = scalar_lea.sflag [#allocation4], %s6265_s30  ;;  %s6038_s8 = scalar_lea.vmem %s7015_s25, 8192 }
  0x64   : > { %508 = vmatpush1.bf16.msra.mxu0 %v5323_v7  ;;  %637 = vmatpush1.bf16.msra.mxu1 %v5323_v7  ;;  %v228_v43 = vld [vmem:[%s6271_s6 + $0x38] sm:$0xff]  ;;  %v258_v44 = vld [vmem:[%s6271_s6 + $0x128] sm:$0xff]  ;;  %v614_v48 = vpack.c.bf16 %v255_v41, %v253_v40  ;;  %v225_v53 = vld [vmem:[%s6271_s6 + $0x20] sm:$0xff]  ;;  %p6039_p11 = scmp.ne.s32.totalorder %s7015_s25, %s6038_s8  ;;  %p7080_p10 = scmp.ne.s32.totalorder %s7074_s10, 0 }
  0x65   : > { %509 = vmatprep.subr.bf16.mxu0 %v5324_v8  ;;  %638 = vmatprep.subr.bf16.mxu1 %v5324_v8  ;;  %v260_v45 = vld [vmem:[%s6271_s6 + $0x138] sm:$0xff]  ;;  %v320_v50 = vpack.c.bf16 %v228_v43, %v226_v42  ;;  %v5365_v52 = vld [vmem:[#allocation5 + $0x164] ss:$8 sps:$4 sm:$0xff]   ;;  %v227_v54 = vld [vmem:[%s6271_s6 + $0x30] sm:$0xff]  ;;  %s6115_s9 = smov [#allocation8]  }
  0x66   : > { %v5362_v46 = vld [vmem:[#allocation5 + $0x174] ss:$8 sps:$4 sm:$0xff]   ;;  %v5360_v49 = vld [vmem:[#allocation5 + $0x170] ss:$8 sps:$4 sm:$0xff]   ;;  %v617_v51 = vpack.c.bf16 %v260_v45, %v258_v44  ;;  %v257_v55 = vld [vmem:[%s6271_s6 + $0x120] sm:$0xff]  ;;  %v319_v63 = vpack.c.bf16 %v227_v54, %v225_v53  ;;  %p6040_p1 = pnand %p6039_p11, %p7080_p10  ;;  %s6042_s17 = sshll.u32 %s6115_s9, 4  ;;  %s6043_s17 = int_to_ptr.vmem [resolvable:$false] %s6042_s17 }
  0x67   : > { %v259_v56 = vld [vmem:[%s6271_s6 + $0x130] sm:$0xff]  ;;  %v230_v57 = vld [vmem:[%s6271_s6 + $0x48] sm:$0xff]  ;;  %v232_v58 = vld [vmem:[%s6271_s6 + $0x58] sm:$0xff]  ;;  %s6044_s21 = scalar_lea.vmem %s6043_s17, 16384  ;;  %p6045_p6 = scmp.lt.s32.totalorder %s7015_s25, %s6043_s17 }
  0x68   : > { %510 = vmatpush1.bf16.msra.mxu0 %v5326_v9  ;;  %639 = vmatpush1.bf16.msra.mxu1 %v5326_v9  ;;  %v262_v59 = vld [vmem:[%s6271_s6 + $0x148] sm:$0xff]  ;;  %v264_v60 = vld [vmem:[%s6271_s6 + $0x158] sm:$0xff]  ;;  %v616_v0 = vpack.c.bf16 %v259_v56, %v257_v55  ;;  %v322_v2 = vpack.c.bf16 %v232_v58, %v230_v57  ;;  %v229_v5 = vld [vmem:[%s6271_s6 + $0x40] sm:$0xff]  ;;  %p6041_p2 = pneg %p6040_p1  ;;  %p6046_p12 = scmp.lt.s32.totalorder %s6044_s21, %s6038_s8 }
  0x69   : > { %511 = vmatprep.subr.bf16.mxu0 %v5327_v10  ;;  %640 = vmatprep.subr.bf16.mxu1 %v5327_v10  ;;  %v5363_v61 = vld [vmem:[#allocation5 + $0x160] ss:$8 sps:$4 sm:$0xff]   ;;  %v5368_v62 = vld [vmem:[#allocation5 + $0x154] ss:$8 sps:$4 sm:$0xff]   ;;  %v5366_v1 = vld [vmem:[#allocation5 + $0x150] ss:$8 sps:$4 sm:$0xff]   ;;  %v619_v3 = vpack.c.bf16 %v264_v60, %v262_v59 }
  0x6a   : > { %v5371_v4 = vld [vmem:[#allocation5 + $0x144] ss:$8 sps:$4 sm:$0xff]   ;;  %v231_v6 = vld [vmem:[%s6271_s6 + $0x50] sm:$0xff]  ;;  %v236_v10 = vld [vmem:[%s6271_s6 + $0x78] sm:$0xff]  ;;  %p6047_p7 = por %p6046_p12, %p6045_p6 }
  0x6b   : > { %v261_v7 = vld [vmem:[%s6271_s6 + $0x140] sm:$0xff]  ;;  %v263_v8 = vld [vmem:[%s6271_s6 + $0x150] sm:$0xff]  ;;  %v234_v9 = vld [vmem:[%s6271_s6 + $0x68] sm:$0xff]  ;;  %v321_v15 = vpack.c.bf16 %v231_v6, %v229_v5 }
  0x6c   : > { %512 = vmatpush1.bf16.msra.mxu0 %v5329_v11  ;;  %641 = vmatpush1.bf16.msra.mxu1 %v5329_v11  ;;  %v266_v11 = vld [vmem:[%s6271_s6 + $0x168] sm:$0xff]  ;;  %v5374_v14 = vld [vmem:[#allocation5 + $0x134] ss:$8 sps:$4 sm:$0xff]   ;;  %v618_v16 = vpack.c.bf16 %v263_v8, %v261_v7  ;;  %v5372_v17 = vld [vmem:[#allocation5 + $0x130] ss:$8 sps:$4 sm:$0xff]   ;;  %p6048_p9 = pnand %p6047_p7, %p6041_p2 }
  0x6d   : > { %513 = vmatprep.subr.bf16.mxu0 %v5330_v12  ;;  %642 = vmatprep.subr.bf16.mxu1 %v5330_v12  ;;  %v268_v12 = vld [vmem:[%s6271_s6 + $0x178] sm:$0xff]  ;;  %v5369_v13 = vld [vmem:[#allocation5 + $0x140] ss:$8 sps:$4 sm:$0xff]   ;;  %v239_v38 = vld [vmem:[%s6271_s6 + $0x90] sm:$0xff] }
  0x6e   : > { %v621_v19 = vpack.c.bf16 %v268_v12, %v266_v11  ;;  %v269_v39 = vld [vmem:[%s6271_s6 + $0x180] sm:$0xff]  ;;  %v271_v40 = vld [vmem:[%s6271_s6 + $0x190] sm:$0xff]  ;;  %v242_v41 = vld [vmem:[%s6271_s6 + $0xa8] sm:$0xff] }
  0x6f   : > { %v244_v42 = vld [vmem:[%s6271_s6 + $0xb8] sm:$0xff]  ;;  %v274_v43 = vld [vmem:[%s6271_s6 + $0x1a8] sm:$0xff]  ;;  %v241_v53 = vld [vmem:[%s6271_s6 + $0xa0] sm:$0xff] }
  0x70   : > { %514 = vmatpush1.bf16.msra.mxu0 %v5332_v18  ;;  %643 = vmatpush1.bf16.msra.mxu1 %v5332_v18  ;;  %v324_v18 = vpack.c.bf16 %v236_v10, %v234_v9  ;;  %v276_v44 = vld [vmem:[%s6271_s6 + $0x1b8] sm:$0xff]  ;;  %v5381_v45 = vld [vmem:[#allocation5 + $0x100] ss:$8 sps:$4 sm:$0xff]   ;;  %v243_v54 = vld [vmem:[%s6271_s6 + $0xb0] sm:$0xff] }
  0x71   : > { %515 = vmatprep.subr.bf16.mxu0 %v5333_v20  ;;  %644 = vmatprep.subr.bf16.mxu1 %v5333_v20  ;;  %v5377_v20 = vld [vmem:[#allocation5 + $0x124] ss:$8 sps:$4 sm:$0xff]   ;;  %v275_v56 = vld [vmem:[%s6271_s6 + $0x1b0] sm:$0xff]  ;;  %v248_v58 = vld [vmem:[%s6271_s6 + $0xd8] sm:$0xff] }
  0x72   : > { %v273_v55 = vld [vmem:[%s6271_s6 + $0x1a0] sm:$0xff]  ;;  %v246_v57 = vld [vmem:[%s6271_s6 + $0xc8] sm:$0xff]  ;;  %v280_v60 = vld [vmem:[%s6271_s6 + $0x1d8] sm:$0xff] }
  0x73   : > { %v278_v59 = vld [vmem:[%s6271_s6 + $0x1c8] sm:$0xff]  ;;  %v245_v5 = vld [vmem:[%s6271_s6 + $0xc0] sm:$0xff]  ;;  %v247_v6 = vld [vmem:[%s6271_s6 + $0xd0] sm:$0xff] }
  0x74   : > { %516 = vmatpush1.bf16.msra.mxu0 %v5335_v21  ;;  %645 = vmatpush1.bf16.msra.mxu1 %v5335_v21  ;;  %v233_v21 = vld [vmem:[%s6271_s6 + $0x60] sm:$0xff]  ;;  %v279_v8 = vld [vmem:[%s6271_s6 + $0x1d0] sm:$0xff]  ;;  %v250_v9 = vld [vmem:[%s6271_s6 + $0xe8] sm:$0xff] }
  0x75   : > { %517 = vmatprep.subr.bf16.mxu0 %v5336_v22  ;;  %646 = vmatprep.subr.bf16.mxu1 %v5336_v22  ;;  %v235_v22 = vld [vmem:[%s6271_s6 + $0x70] sm:$0xff]  ;;  %v277_v7 = vld [vmem:[%s6271_s6 + $0x1c0] sm:$0xff]  ;;  %v252_v10 = vld [vmem:[%s6271_s6 + $0xf8] sm:$0xff] }
  0x76   : > { %v282_v11 = vld [vmem:[%s6271_s6 + $0x1e8] sm:$0xff]  ;;  %v284_v12 = vld [vmem:[%s6271_s6 + $0x1f8] sm:$0xff] }
  0x78   : > { %518 = vmatpush2.bf16.msra.mxu0 %v5338_v23  ;;  %647 = vmatpush2.bf16.msra.mxu1 %v5338_v23  ;;  %v265_v23 = vld [vmem:[%s6271_s6 + $0x160] sm:$0xff] }
  0x79   : > { %519 = vmatprep.subr.bf16.mxu0 %v5339_v24  ;;  %648 = vmatprep.subr.bf16.mxu1 %v5339_v24  ;;  %v267_v24 = vld [vmem:[%s6271_s6 + $0x170] sm:$0xff] }
  0x7c   : > { %520 = vmatpush2.bf16.msra.mxu0 %v5341_v25  ;;  %649 = vmatpush2.bf16.msra.mxu1 %v5341_v25  ;;  %v238_v25 = vld [vmem:[%s6271_s6 + $0x88] sm:$0xff] }
  0x7d   : > { %521 = vmatprep.subr.bf16.mxu0 %v5342_v26  ;;  %650 = vmatprep.subr.bf16.mxu1 %v5342_v26  ;;  %v240_v26 = vld [vmem:[%s6271_s6 + $0x98] sm:$0xff] }
  0x80   : > { %522 = vmatpush2.bf16.msra.mxu0 %v5344_v27  ;;  %651 = vmatpush2.bf16.msra.mxu1 %v5344_v27  ;;  %v270_v27 = vld [vmem:[%s6271_s6 + $0x188] sm:$0xff] }
  0x81   : > { %523 = vmatprep.subr.bf16.mxu0 %v5345_v28  ;;  %652 = vmatprep.subr.bf16.mxu1 %v5345_v28  ;;  %v272_v28 = vld [vmem:[%s6271_s6 + $0x198] sm:$0xff] }
  0x84   : > { %524 = vmatpush2.bf16.msra.mxu0 %v5347_v29  ;;  %653 = vmatpush2.bf16.msra.mxu1 %v5347_v29  ;;  %v5375_v29 = vld [vmem:[#allocation5 + $0x120] ss:$8 sps:$4 sm:$0xff]  }
  0x85   : > { %525 = vmatprep.subr.bf16.mxu0 %v5348_v30  ;;  %654 = vmatprep.subr.bf16.mxu1 %v5348_v30  ;;  %v5380_v30 = vld [vmem:[#allocation5 + $0x114] ss:$8 sps:$4 sm:$0xff]  }
  0x88   : > { %526 = vmatpush2.bf16.msra.mxu0 %v5350_v31  ;;  %655 = vmatpush2.bf16.msra.mxu1 %v5350_v31  ;;  %v323_v31 = vpack.c.bf16 %v235_v22, %v233_v21  ;;  %v251_v21 = vld [vmem:[%s6271_s6 + $0xf0] sm:$0xff]  ;;  %v281_v22 = vld [vmem:[%s6271_s6 + $0x1e0] sm:$0xff] }
  0x89   : > { %527 = vmatprep.subr.bf16.mxu0 %v5351_v32  ;;  %656 = vmatprep.subr.bf16.mxu1 %v5351_v32  ;;  %v620_v32 = vpack.c.bf16 %v267_v24, %v265_v23  ;;  %v283_v23 = vld [vmem:[%s6271_s6 + $0x1f0] sm:$0xff] }
  0x8c   : > { %528 = vmatpush2.bf16.msra.mxu0 %v5353_v33  ;;  %657 = vmatpush2.bf16.msra.mxu1 %v5353_v33  ;;  %v5378_v33 = vld [vmem:[#allocation5 + $0x110] ss:$8 sps:$4 sm:$0xff]  }
  0x8d   : > { %529 = vmatprep.subr.bf16.mxu0 %v5354_v34  ;;  %658 = vmatprep.subr.bf16.mxu1 %v5354_v34  ;;  %v326_v34 = vpack.c.bf16 %v240_v26, %v238_v25  ;;  %v628_v25 = vpack.c.bf16 %v283_v23, %v281_v22  ;;  %v5401_v26 = vld [vmem:[#allocation5 + $0x1a4] ss:$8 sps:$4 sm:$0xff]   ;;  %v5411_v22 = vld [vmem:[#allocation5 + $0x260] ss:$8 sps:$4 sm:$0xff]  }
  0x90   : > { %530 = vmatpush2.bf16.msra.mxu0 %v5356_v35  ;;  %659 = vmatpush2.bf16.msra.mxu1 %v5356_v35  ;;  %v623_v35 = vpack.c.bf16 %v272_v28, %v270_v27  ;;  %v5399_v27 = vld [vmem:[#allocation5 + $0x1a0] ss:$8 sps:$4 sm:$0xff]   ;;  %v5404_v28 = vld [vmem:[#allocation5 + $0x194] ss:$8 sps:$4 sm:$0xff]  }
  0x91   : > { %531 = vmatprep.subr.bf16.mxu0 %v5357_v36  ;;  %660 = vmatprep.subr.bf16.mxu1 %v5357_v36  ;;  %v5383_v36 = vld [vmem:[#allocation5 + $0x104] ss:$8 sps:$4 sm:$0xff]  }
  0x94   : > { %532 = vmatpush2.bf16.msra.mxu0 %v5359_v37  ;;  %661 = vmatpush2.bf16.msra.mxu1 %v5359_v37  ;;  %v237_v37 = vld [vmem:[%s6271_s6 + $0x80] sm:$0xff] }
  0x95   : > { %1024 = vmatprep.subr.bf16.mxu0 %v5362_v46  ;;  %1153 = vmatprep.subr.bf16.mxu1 %v5362_v46  ;;  %v5386_v46 = vld [vmem:[#allocation5 + $0x1f4] ss:$8 sps:$4 sm:$0xff]  }
  0x97   : > { %534 = vmatmul.mubr.bf16.vlgmr.msra.gmra.mxu0 %v317_v47  ;;  %663 = vmatmul.mubr.bf16.vlgmr.msra.gmra.mxu1 %v614_v48  ;;  %v325_v47 = vpack.c.bf16 %v239_v38, %v237_v37  ;;  %v622_v48 = vpack.c.bf16 %v271_v40, %v269_v39  ;;  %v6350_v37 = vld [vmem:[#allocation7] sm:$0xff] }
  0x98   : > { %543 = vmatprep.mubr.bf16.mxu0 %v320_v50  ;;  %672 = vmatprep.mubr.bf16.mxu1 %v617_v51  ;;  %v328_v50 = vpack.c.bf16 %v244_v42, %v242_v41  ;;  %v625_v51 = vpack.c.bf16 %v276_v44, %v274_v43 }
  0x99   : > { %1025 = vmatpush1.bf16.msra.mxu0 %v5360_v49  ;;  %1154 = vmatpush1.bf16.msra.mxu1 %v5360_v49  ;;  %v5384_v49 = vld [vmem:[#allocation5 + $0x1f0] ss:$8 sps:$4 sm:$0xff]  }
  0x9a   : > { %1026 = vmatprep.subr.bf16.mxu0 %v5365_v52  ;;  %1155 = vmatprep.subr.bf16.mxu1 %v5365_v52  ;;  %v5389_v52 = vld [vmem:[#allocation5 + $0x1e4] ss:$8 sps:$4 sm:$0xff]  }
  0x9d   : > { %1027 = vmatpush1.bf16.msra.mxu0 %v5363_v61  ;;  %1156 = vmatpush1.bf16.msra.mxu1 %v5363_v61  ;;  %v5387_v61 = vld [vmem:[#allocation5 + $0x1e0] ss:$8 sps:$4 sm:$0xff]  }
  0x9e   : > { %1028 = vmatprep.subr.bf16.mxu0 %v5368_v62  ;;  %1157 = vmatprep.subr.bf16.mxu1 %v5368_v62  ;;  %v5392_v62 = vld [vmem:[#allocation5 + $0x1d4] ss:$8 sps:$4 sm:$0xff]  }
  0x9f   : > { %544 = vmatmul.mubr.bf16.gmra.mxu0 %v319_v63  ;;  %673 = vmatmul.mubr.bf16.gmra.mxu1 %v616_v0  ;;  %v327_v63 = vpack.c.bf16 %v243_v54, %v241_v53  ;;  %v624_v0 = vpack.c.bf16 %v275_v56, %v273_v55 }
  0xa0   : > { %553 = vmatprep.mubr.bf16.mxu0 %v322_v2  ;;  %682 = vmatprep.mubr.bf16.mxu1 %v619_v3  ;;  %v330_v2 = vpack.c.bf16 %v248_v58, %v246_v57  ;;  %v627_v3 = vpack.c.bf16 %v280_v60, %v278_v59 }
  0xa1   : > { %1029 = vmatpush1.bf16.msra.mxu0 %v5366_v1  ;;  %1158 = vmatpush1.bf16.msra.mxu1 %v5366_v1  ;;  %v5390_v1 = vld [vmem:[#allocation5 + $0x1d0] ss:$8 sps:$4 sm:$0xff]  }
  0xa2   : > { %1030 = vmatprep.subr.bf16.mxu0 %v5371_v4  ;;  %1159 = vmatprep.subr.bf16.mxu1 %v5371_v4  ;;  %v5395_v4 = vld [vmem:[#allocation5 + $0x1c4] ss:$8 sps:$4 sm:$0xff]  }
  0xa5   : > { %1031 = vmatpush1.bf16.msra.mxu0 %v5369_v13  ;;  %1160 = vmatpush1.bf16.msra.mxu1 %v5369_v13  ;;  %v5393_v13 = vld [vmem:[#allocation5 + $0x1c0] ss:$8 sps:$4 sm:$0xff]  }
  0xa6   : > { %1032 = vmatprep.subr.bf16.mxu0 %v5374_v14  ;;  %1161 = vmatprep.subr.bf16.mxu1 %v5374_v14  ;;  %v5398_v14 = vld [vmem:[#allocation5 + $0x1b4] ss:$8 sps:$4 sm:$0xff]  }
  0xa7   : > { %554 = vmatmul.mubr.bf16.gmra.mxu0 %v321_v15  ;;  %683 = vmatmul.mubr.bf16.gmra.mxu1 %v618_v16  ;;  %v329_v15 = vpack.c.bf16 %v247_v6, %v245_v5  ;;  %v626_v16 = vpack.c.bf16 %v279_v8, %v277_v7  ;;  %v5408_v6 = vld [vmem:[#allocation5 + $0x270] ss:$8 sps:$4 sm:$0xff]  }
  0xa8   : > { %563 = vmatprep.mubr.bf16.mxu0 %v324_v18  ;;  %692 = vmatprep.mubr.bf16.mxu1 %v621_v19  ;;  %v332_v18 = vpack.c.bf16 %v252_v10, %v250_v9  ;;  %v629_v19 = vpack.c.bf16 %v284_v12, %v282_v11  ;;  %v5413_v12 = vld [vmem:[#allocation5 + $0x264] ss:$8 sps:$4 sm:$0xff]  }
  0xa9   : > { %1033 = vmatpush1.bf16.msra.mxu0 %v5372_v17  ;;  %1162 = vmatpush1.bf16.msra.mxu1 %v5372_v17  ;;  %v5396_v17 = vld [vmem:[#allocation5 + $0x1b0] ss:$8 sps:$4 sm:$0xff]  }
  0xaa   : > { %1034 = vmatprep.subr.bf16.mxu0 %v5377_v20  ;;  %1163 = vmatprep.subr.bf16.mxu1 %v5377_v20  ;;  %v249_v20 = vld [vmem:[%s6271_s6 + $0xe0] sm:$0xff] }
  0xab   : > { %v331_v24 = vpack.c.bf16 %v251_v21, %v249_v20 }
  0xad   : > { %1035 = vmatpush1.bf16.msra.mxu0 %v5375_v29  ;;  %1164 = vmatpush1.bf16.msra.mxu1 %v5375_v29  ;;  %v5402_v29 = vld [vmem:[#allocation5 + $0x190] ss:$8 sps:$4 sm:$0xff]  }
  0xae   : > { %1036 = vmatprep.subr.bf16.mxu0 %v5380_v30  ;;  %1165 = vmatprep.subr.bf16.mxu1 %v5380_v30  ;;  %v5407_v30 = vld [vmem:[#allocation5 + $0x184] ss:$8 sps:$4 sm:$0xff]  }
  0xaf   : > { %564 = vmatmul.mubr.bf16.gmra.mxu0 %v323_v31  ;;  %693 = vmatmul.mubr.bf16.gmra.mxu1 %v620_v32  ;;  %v5405_v31 = vld [vmem:[#allocation5 + $0x180] ss:$8 sps:$4 sm:$0xff]   ;;  %v5410_v32 = vld [vmem:[#allocation5 + $0x274] ss:$8 sps:$4 sm:$0xff]  }
  0xb0   : > { %573 = vmatprep.mubr.bf16.mxu0 %v326_v34  ;;  %702 = vmatprep.mubr.bf16.mxu1 %v623_v35 }
  0xb1   : > { %1037 = vmatpush1.bf16.msra.mxu0 %v5378_v33  ;;  %1166 = vmatpush1.bf16.msra.mxu1 %v5378_v33  ;;  %v333_v33 = vlaneseq }
  0xb2   : > { %1038 = vmatprep.subr.bf16.mxu0 %v5383_v36  ;;  %1167 = vmatprep.subr.bf16.mxu1 %v5383_v36  ;;  %v6348_v36 = vld [vmem:[#allocation7 + $0x8] sm:$0xff] }
  0xb3   : > { %v6345_v34 = vshrl.u32 %v333_v33, 7 }
  0xb5   : > { %1039 = vmatpush1.bf16.msra.mxu0 %v5381_v45  ;;  %1168 = vmatpush1.bf16.msra.mxu1 %v5381_v45  ;;  %v335_v35 = vsub.s32 0, %v6345_v34 }
  0xb6   : > { %1040 = vmatprep.subr.bf16.mxu0 %v5386_v46  ;;  %1169 = vmatprep.subr.bf16.mxu1 %v5386_v46 }
  0xb7   : > { %574 = vmatmul.mubr.bf16.gmra.mxu0 %v325_v47  ;;  %703 = vmatmul.mubr.bf16.gmra.mxu1 %v622_v48  ;;  %v6353_v40 = vrot.slane %v6348_v36, %v335_v35  ;;  %v6356_v41 = vrot.slane %v6350_v37, %v335_v35 }
  0xb8   : > { %583 = vmatprep.mubr.bf16.mxu0 %v328_v50  ;;  %712 = vmatprep.mubr.bf16.mxu1 %v625_v51 }
  0xb9   : > { %1041 = vmatpush2.bf16.msra.mxu0 %v5384_v49  ;;  %1170 = vmatpush2.bf16.msra.mxu1 %v5384_v49 }
  0xba   : > { %1042 = vmatprep.subr.bf16.mxu0 %v5389_v52  ;;  %1171 = vmatprep.subr.bf16.mxu1 %v5389_v52 }
  0xbd   : > { %1043 = vmatpush2.bf16.msra.mxu0 %v5387_v61  ;;  %1172 = vmatpush2.bf16.msra.mxu1 %v5387_v61 }
  0xbe   : > { %1044 = vmatprep.subr.bf16.mxu0 %v5392_v62  ;;  %1173 = vmatprep.subr.bf16.mxu1 %v5392_v62 }
  0xbf   : > { %584 = vmatmul.mubr.bf16.gmra.mxu0 %v327_v63  ;;  %713 = vmatmul.mubr.bf16.gmra.mxu1 %v624_v0 }
  0xc0   : > { %593 = vmatprep.mubr.bf16.mxu0 %v330_v2  ;;  %722 = vmatprep.mubr.bf16.mxu1 %v627_v3 }
  0xc1   : > { %1045 = vmatpush2.bf16.msra.mxu0 %v5390_v1  ;;  %1174 = vmatpush2.bf16.msra.mxu1 %v5390_v1 }
  0xc2   : > { %1046 = vmatprep.subr.bf16.mxu0 %v5395_v4  ;;  %1175 = vmatprep.subr.bf16.mxu1 %v5395_v4 }
  0xc5   : > { %1047 = vmatpush2.bf16.msra.mxu0 %v5393_v13  ;;  %1176 = vmatpush2.bf16.msra.mxu1 %v5393_v13 }
  0xc6   : > { %1048 = vmatprep.subr.bf16.mxu0 %v5398_v14  ;;  %1177 = vmatprep.subr.bf16.mxu1 %v5398_v14 }
  0xc7   : > { %594 = vmatmul.mubr.bf16.gmra.mxu0 %v329_v15  ;;  %723 = vmatmul.mubr.bf16.gmra.mxu1 %v626_v16 }
  0xc8   : > { %603 = vmatprep.mubr.bf16.mxu0 %v332_v18  ;;  %732 = vmatprep.mubr.bf16.mxu1 %v629_v19 }
  0xc9   : > { %1049 = vmatpush2.bf16.msra.mxu0 %v5396_v17  ;;  %1178 = vmatpush2.bf16.msra.mxu1 %v5396_v17 }
  0xca   : > { %1050 = vmatprep.subr.bf16.mxu0 %v5401_v26  ;;  %1179 = vmatprep.subr.bf16.mxu1 %v5401_v26 }
  0xcd   : > { %1051 = vmatpush2.bf16.msra.mxu0 %v5399_v27  ;;  %1180 = vmatpush2.bf16.msra.mxu1 %v5399_v27  ;;  %v5416_v27 = vld [vmem:[#allocation5 + $0x254] ss:$8 sps:$4 sm:$0xff]  }
  0xce   : > { %1052 = vmatprep.subr.bf16.mxu0 %v5404_v28  ;;  %1181 = vmatprep.subr.bf16.mxu1 %v5404_v28 }
  0xcf   : > { %604 = vmatmul.mubr.bf16.gmra.mxu0 %v331_v24  ;;  %733 = vmatmul.mubr.bf16.gmra.mxu1 %v628_v25 }
  0xd1   : > { %1053 = vmatpush2.bf16.msra.mxu0 %v5402_v29  ;;  %1182 = vmatpush2.bf16.msra.mxu1 %v5402_v29 }
  0xd2   : > { %1054 = vmatprep.subr.bf16.mxu0 %v5407_v30  ;;  %1183 = vmatprep.subr.bf16.mxu1 %v5407_v30 }
  0xd5   : > { %1055 = vmatpush2.bf16.msra.mxu0 %v5405_v31  ;;  %1184 = vmatpush2.bf16.msra.mxu1 %v5405_v31 }
  0xd6   : > { %1547 = vmatprep.subr.bf16.mxu0 %v5410_v32  ;;  %1676 = vmatprep.subr.bf16.mxu1 %v5410_v32 }
 0x157   : > { %v535_v38 = vpop.f32.mrf.mxu0  ;;  %v664_v39 = vpop.f32.mrf.mxu1 }
 0x158   : > { %v536_v50 = vadd.f32 %v535_v38, %v6356_v41  ;;  %v665_v51 = vadd.f32 %v664_v39, %v6356_v41 }
 0x159   : > { %v537_v42 = vpop.f32.mrf.mxu0  ;;  %v666_v43 = vpop.f32.mrf.mxu1 }
 0x15a   : > { %v538_v46 = vadd.f32 %v537_v42, %v6353_v40  ;;  %v667_v47 = vadd.f32 %v666_v43, %v6353_v40  ;;  %v743_v0 = vmax.f32 %v536_v50, 0.0  ;;  %v775_v1 = vmax.f32 %v665_v51, 0.0  ;;  %v5414_v43 = vld [vmem:[#allocation5 + $0x250] ss:$8 sps:$4 sm:$0xff]  }
 0x15b   : > { %v539_v44 = vpop.f32.mrf.mxu0  ;;  %v668_v45 = vpop.f32.mrf.mxu1 }
 0x15c   : > { %v540_v48 = vadd.f32 %v539_v44, %v6356_v41  ;;  %v669_v49 = vadd.f32 %v668_v45, %v6356_v41  ;;  %v744_v60 = vmax.f32 %v538_v46, 0.0  ;;  %v776_v61 = vmax.f32 %v667_v47, 0.0 }
 0x15d   : > { %v541_v52 = vpop.f32.mrf.mxu0  ;;  %v670_v53 = vpop.f32.mrf.mxu1 }
 0x15e   : > { %v542_v54 = vadd.f32 %v541_v52, %v6353_v40  ;;  %v671_v55 = vadd.f32 %v670_v53, %v6353_v40  ;;  %v745_v56 = vmax.f32 %v540_v48, 0.0  ;;  %v777_v57 = vmax.f32 %v669_v49, 0.0  ;;  %v5419_v49 = vld [vmem:[#allocation5 + $0x244] ss:$8 sps:$4 sm:$0xff]  }
 0x15f   : > { %v545_v58 = vpop.f32.mrf.mxu0  ;;  %v674_v59 = vpop.f32.mrf.mxu1 }
 0x160   : > { %v746_v62 = vmax.f32 %v542_v54, 0.0  ;;  %v778_v63 = vmax.f32 %v671_v55, 0.0  ;;  %v840_v7 = vpack.c.bf16 %v745_v56, %v743_v0  ;;  %v1137_v8 = vpack.c.bf16 %v777_v57, %v775_v1  ;;  %v5422_v0 = vld [vmem:[#allocation5 + $0x234] ss:$8 sps:$4 sm:$0xff]  }
 0x161   : > { %v547_v2 = vpop.f32.mrf.mxu0  ;;  %v676_v3 = vpop.f32.mrf.mxu1  ;;  %v546_v16 = vadd.f32 %v545_v58, %v6356_v41  ;;  %v675_v17 = vadd.f32 %v674_v59, %v6356_v41  ;;  %v5417_v59 = vld [vmem:[#allocation5 + $0x240] ss:$8 sps:$4 sm:$0xff]  }
 0x162   : > { %v841_v4 = vpack.c.bf16 %v746_v62, %v744_v60  ;;  %v1138_v5 = vpack.c.bf16 %v778_v63, %v776_v61  ;;  %v548_v9 = vadd.f32 %v547_v2, %v6353_v40  ;;  %v677_v13 = vadd.f32 %v676_v3, %v6353_v40 }
 0x163   : > { %v549_v10 = vpop.f32.mrf.mxu0  ;;  %v678_v11 = vpop.f32.mrf.mxu1  ;;  %v747_v32 = vmax.f32 %v546_v16, 0.0  ;;  %v779_v33 = vmax.f32 %v675_v17, 0.0  ;;  %v5425_v17 = vld [vmem:[#allocation5 + $0x224] ss:$8 sps:$4 sm:$0xff]  }
 0x164   : > { %v550_v14 = vadd.f32 %v549_v10, %v6356_v41  ;;  %v679_v15 = vadd.f32 %v678_v11, %v6356_v41  ;;  %1056 = vmatprep.mubr.bf16.mxu0 %v841_v4  ;;  %1185 = vmatprep.mubr.bf16.mxu1 %v1138_v5  ;;  %v748_v28 = vmax.f32 %v548_v9, 0.0  ;;  %v780_v29 = vmax.f32 %v677_v13, 0.0  ;;  %v5420_v11 = vld [vmem:[#allocation5 + $0x230] ss:$8 sps:$4 sm:$0xff]  }
 0x165   : > { %v551_v18 = vpop.f32.mrf.mxu0  ;;  %v680_v19 = vpop.f32.mrf.mxu1  ;;  %1057 = vmatmul.mubr.bf16.vlgmr.msra.gmra.mxu0 %v840_v7  ;;  %1186 = vmatmul.mubr.bf16.vlgmr.msra.gmra.mxu1 %v1137_v8 }
 0x166   : > { %v552_v20 = vadd.f32 %v551_v18, %v6353_v40  ;;  %v681_v21 = vadd.f32 %v680_v19, %v6353_v40  ;;  %1548 = vmatpush1.bf16.msra.mxu0 %v5408_v6  ;;  %1677 = vmatpush1.bf16.msra.mxu1 %v5408_v6  ;;  %v749_v23 = vmax.f32 %v550_v14, 0.0  ;;  %v781_v24 = vmax.f32 %v679_v15, 0.0 }
 0x167   : > { %v555_v25 = vpop.f32.mrf.mxu0  ;;  %v684_v26 = vpop.f32.mrf.mxu1  ;;  %1549 = vmatprep.subr.bf16.mxu0 %v5413_v12  ;;  %1678 = vmatprep.subr.bf16.mxu1 %v5413_v12 }
 0x168   : > { %v750_v30 = vmax.f32 %v552_v20, 0.0  ;;  %v782_v31 = vmax.f32 %v681_v21, 0.0  ;;  %v842_v44 = vpack.c.bf16 %v749_v23, %v747_v32  ;;  %v1139_v45 = vpack.c.bf16 %v781_v24, %v779_v33  ;;  %v5428_v32 = vld [vmem:[#allocation5 + $0x214] ss:$8 sps:$4 sm:$0xff]  }
 0x169   : > { %v557_v35 = vpop.f32.mrf.mxu0  ;;  %v686_v38 = vpop.f32.mrf.mxu1  ;;  %v556_v53 = vadd.f32 %v555_v25, %v6356_v41  ;;  %v685_v54 = vadd.f32 %v684_v26, %v6356_v41 }
 0x16a   : > { %v843_v39 = vpack.c.bf16 %v750_v30, %v748_v28  ;;  %v1140_v42 = vpack.c.bf16 %v782_v31, %v780_v29  ;;  %1550 = vmatpush1.bf16.msra.mxu0 %v5411_v22  ;;  %v558_v46 = vadd.f32 %v557_v35, %v6353_v40  ;;  %1679 = vmatpush1.bf16.msra.mxu1 %v5411_v22 }
 0x16b   : > { %v559_v47 = vpop.f32.mrf.mxu0  ;;  %v688_v48 = vpop.f32.mrf.mxu1  ;;  %1551 = vmatprep.subr.bf16.mxu0 %v5416_v27  ;;  %v687_v50 = vadd.f32 %v686_v38, %v6353_v40  ;;  %1680 = vmatprep.subr.bf16.mxu1 %v5416_v27  ;;  %v751_v5 = vmax.f32 %v556_v53, 0.0  ;;  %v783_v6 = vmax.f32 %v685_v54, 0.0  ;;  %v5423_v27 = vld [vmem:[#allocation5 + $0x220] ss:$8 sps:$4 sm:$0xff]   ;;  %v5431_v54 = vld [vmem:[#allocation5 + $0x204] ss:$8 sps:$4 sm:$0xff]  }
 0x16c   : > { %v560_v51 = vadd.f32 %v559_v47, %v6356_v41  ;;  %v689_v52 = vadd.f32 %v688_v48, %v6356_v41  ;;  %1066 = vmatprep.mubr.bf16.mxu0 %v843_v39  ;;  %1195 = vmatprep.mubr.bf16.mxu1 %v1140_v42  ;;  %v752_v1 = vmax.f32 %v558_v46, 0.0  ;;  %v5426_v48 = vld [vmem:[#allocation5 + $0x210] ss:$8 sps:$4 sm:$0xff]  }
 0x16d   : > { %v561_v55 = vpop.f32.mrf.mxu0  ;;  %v690_v56 = vpop.f32.mrf.mxu1  ;;  %1067 = vmatmul.mubr.bf16.gmra.mxu0 %v842_v44  ;;  %1196 = vmatmul.mubr.bf16.gmra.mxu1 %v1139_v45  ;;  %v784_v2 = vmax.f32 %v687_v50, 0.0 }
 0x16e   : > { %v562_v57 = vadd.f32 %v561_v55, %v6353_v40  ;;  %v691_v58 = vadd.f32 %v690_v56, %v6353_v40  ;;  %1552 = vmatpush1.bf16.msra.mxu0 %v5414_v43  ;;  %v753_v60 = vmax.f32 %v560_v51, 0.0  ;;  %v785_v61 = vmax.f32 %v689_v52, 0.0  ;;  %1681 = vmatpush1.bf16.msra.mxu1 %v5414_v43 }
 0x16f   : > { %v565_v62 = vpop.f32.mrf.mxu0  ;;  %v694_v63 = vpop.f32.mrf.mxu1  ;;  %1553 = vmatprep.subr.bf16.mxu0 %v5419_v49  ;;  %1682 = vmatprep.subr.bf16.mxu1 %v5419_v49 }
 0x170   : > { %v754_v3 = vmax.f32 %v562_v57, 0.0  ;;  %v786_v4 = vmax.f32 %v691_v58, 0.0  ;;  %v844_v12 = vpack.c.bf16 %v753_v60, %v751_v5  ;;  %v1141_v13 = vpack.c.bf16 %v785_v61, %v783_v6  ;;  %v5434_v5 = vld [vmem:[#allocation5 + $0x2f4] ss:$8 sps:$4 sm:$0xff]  }
 0x171   : > { %v567_v7 = vpop.f32.mrf.mxu0  ;;  %v696_v8 = vpop.f32.mrf.mxu1  ;;  %v566_v21 = vadd.f32 %v565_v62, %v6356_v41  ;;  %v695_v22 = vadd.f32 %v694_v63, %v6356_v41 }
 0x172   : > { %v845_v9 = vpack.c.bf16 %v754_v3, %v752_v1  ;;  %v1142_v10 = vpack.c.bf16 %v786_v4, %v784_v2  ;;  %1554 = vmatpush1.bf16.msra.mxu0 %v5417_v59  ;;  %v568_v14 = vadd.f32 %v567_v7, %v6353_v40  ;;  %1683 = vmatpush1.bf16.msra.mxu1 %v5417_v59 }
 0x173   : > { %v569_v15 = vpop.f32.mrf.mxu0  ;;  %v698_v16 = vpop.f32.mrf.mxu1  ;;  %1555 = vmatprep.subr.bf16.mxu0 %v5422_v0  ;;  %v697_v18 = vadd.f32 %v696_v8, %v6353_v40  ;;  %1684 = vmatprep.subr.bf16.mxu1 %v5422_v0  ;;  %v755_v42 = vmax.f32 %v566_v21, 0.0  ;;  %v787_v43 = vmax.f32 %v695_v22, 0.0  ;;  %v5429_v0 = vld [vmem:[#allocation5 + $0x200] ss:$8 sps:$4 sm:$0xff]   ;;  %v5437_v22 = vld [vmem:[#allocation5 + $0x2e4] ss:$8 sps:$4 sm:$0xff]  }
 0x174   : > { %v570_v19 = vadd.f32 %v569_v15, %v6356_v41  ;;  %v699_v20 = vadd.f32 %v698_v16, %v6356_v41  ;;  %1076 = vmatprep.mubr.bf16.mxu0 %v845_v9  ;;  %1205 = vmatprep.mubr.bf16.mxu1 %v1142_v10  ;;  %v756_v33 = vmax.f32 %v568_v14, 0.0  ;;  %v5432_v16 = vld [vmem:[#allocation5 + $0x2f0] ss:$8 sps:$4 sm:$0xff]  }
 0x175   : > { %v571_v23 = vpop.f32.mrf.mxu0  ;;  %v700_v24 = vpop.f32.mrf.mxu1  ;;  %1077 = vmatmul.mubr.bf16.gmra.mxu0 %v844_v12  ;;  %1206 = vmatmul.mubr.bf16.gmra.mxu1 %v1141_v13  ;;  %v788_v35 = vmax.f32 %v697_v18, 0.0 }
 0x176   : > { %v572_v25 = vadd.f32 %v571_v23, %v6353_v40  ;;  %v701_v26 = vadd.f32 %v700_v24, %v6353_v40  ;;  %1556 = vmatpush1.bf16.msra.mxu0 %v5420_v11  ;;  %v757_v28 = vmax.f32 %v570_v19, 0.0  ;;  %v789_v29 = vmax.f32 %v699_v20, 0.0  ;;  %1685 = vmatpush1.bf16.msra.mxu1 %v5420_v11 }
 0x177   : > { %v575_v30 = vpop.f32.mrf.mxu0  ;;  %v704_v31 = vpop.f32.mrf.mxu1  ;;  %1557 = vmatprep.subr.bf16.mxu0 %v5425_v17  ;;  %1686 = vmatprep.subr.bf16.mxu1 %v5425_v17 }
 0x178   : > { %v758_v38 = vmax.f32 %v572_v25, 0.0  ;;  %v790_v39 = vmax.f32 %v701_v26, 0.0  ;;  %v846_v49 = vpack.c.bf16 %v757_v28, %v755_v42  ;;  %v1143_v50 = vpack.c.bf16 %v789_v29, %v787_v43  ;;  %v5440_v42 = vld [vmem:[#allocation5 + $0x2d4] ss:$8 sps:$4 sm:$0xff]  }
 0x179   : > { %v577_v44 = vpop.f32.mrf.mxu0  ;;  %v706_v45 = vpop.f32.mrf.mxu1  ;;  %v576_v58 = vadd.f32 %v575_v30, %v6356_v41  ;;  %v705_v59 = vadd.f32 %v704_v31, %v6356_v41 }
 0x17a   : > { %v847_v46 = vpack.c.bf16 %v758_v38, %v756_v33  ;;  %v1144_v47 = vpack.c.bf16 %v790_v39, %v788_v35  ;;  %1558 = vmatpush1.bf16.msra.mxu0 %v5423_v27  ;;  %v578_v51 = vadd.f32 %v577_v44, %v6353_v40  ;;  %1687 = vmatpush1.bf16.msra.mxu1 %v5423_v27 }
 0x17b   : > { %v579_v52 = vpop.f32.mrf.mxu0  ;;  %v708_v53 = vpop.f32.mrf.mxu1  ;;  %1559 = vmatprep.subr.bf16.mxu0 %v5428_v32  ;;  %v707_v55 = vadd.f32 %v706_v45, %v6353_v40  ;;  %1688 = vmatprep.subr.bf16.mxu1 %v5428_v32  ;;  %v759_v10 = vmax.f32 %v576_v58, 0.0  ;;  %v791_v11 = vmax.f32 %v705_v59, 0.0  ;;  %v5435_v32 = vld [vmem:[#allocation5 + $0x2e0] ss:$8 sps:$4 sm:$0xff]   ;;  %v5443_v59 = vld [vmem:[#allocation5 + $0x2c4] ss:$8 sps:$4 sm:$0xff]  }
 0x17c   : > { %v580_v56 = vadd.f32 %v579_v52, %v6356_v41  ;;  %v709_v57 = vadd.f32 %v708_v53, %v6356_v41  ;;  %1086 = vmatprep.mubr.bf16.mxu0 %v847_v46  ;;  %1215 = vmatprep.mubr.bf16.mxu1 %v1144_v47  ;;  %v760_v6 = vmax.f32 %v578_v51, 0.0  ;;  %v5438_v53 = vld [vmem:[#allocation5 + $0x2d0] ss:$8 sps:$4 sm:$0xff]  }
 0x17d   : > { %v581_v60 = vpop.f32.mrf.mxu0  ;;  %v710_v61 = vpop.f32.mrf.mxu1  ;;  %1087 = vmatmul.mubr.bf16.gmra.mxu0 %v846_v49  ;;  %1216 = vmatmul.mubr.bf16.gmra.mxu1 %v1143_v50  ;;  %v792_v7 = vmax.f32 %v707_v55, 0.0 }
 0x17e   : > { %v582_v62 = vadd.f32 %v581_v60, %v6353_v40  ;;  %v711_v63 = vadd.f32 %v710_v61, %v6353_v40  ;;  %1560 = vmatpush1.bf16.msra.mxu0 %v5426_v48  ;;  %v761_v1 = vmax.f32 %v580_v56, 0.0  ;;  %v793_v2 = vmax.f32 %v709_v57, 0.0  ;;  %1689 = vmatpush1.bf16.msra.mxu1 %v5426_v48 }
 0x17f   : > { %v585_v3 = vpop.f32.mrf.mxu0  ;;  %v714_v4 = vpop.f32.mrf.mxu1  ;;  %1561 = vmatprep.subr.bf16.mxu0 %v5431_v54  ;;  %1690 = vmatprep.subr.bf16.mxu1 %v5431_v54 }
 0x180   : > { %v762_v8 = vmax.f32 %v582_v62, 0.0  ;;  %v794_v9 = vmax.f32 %v711_v63, 0.0  ;;  %v848_v17 = vpack.c.bf16 %v761_v1, %v759_v10  ;;  %v1145_v18 = vpack.c.bf16 %v793_v2, %v791_v11  ;;  %v5446_v10 = vld [vmem:[#allocation5 + $0x2b4] ss:$8 sps:$4 sm:$0xff]  }
 0x181   : > { %v587_v12 = vpop.f32.mrf.mxu0  ;;  %v716_v13 = vpop.f32.mrf.mxu1  ;;  %v586_v26 = vadd.f32 %v585_v3, %v6356_v41  ;;  %v715_v27 = vadd.f32 %v714_v4, %v6356_v41 }
 0x182   : > { %v849_v14 = vpack.c.bf16 %v762_v8, %v760_v6  ;;  %v1146_v15 = vpack.c.bf16 %v794_v9, %v792_v7  ;;  %1562 = vmatpush1.bf16.msra.mxu0 %v5429_v0  ;;  %v588_v19 = vadd.f32 %v587_v12, %v6353_v40  ;;  %1691 = vmatpush1.bf16.msra.mxu1 %v5429_v0 }
 0x183   : > { %v589_v20 = vpop.f32.mrf.mxu0  ;;  %v718_v21 = vpop.f32.mrf.mxu1  ;;  %1563 = vmatprep.subr.bf16.mxu0 %v5434_v5  ;;  %v717_v23 = vadd.f32 %v716_v13, %v6353_v40  ;;  %1692 = vmatprep.subr.bf16.mxu1 %v5434_v5  ;;  %v763_v47 = vmax.f32 %v586_v26, 0.0  ;;  %v795_v48 = vmax.f32 %v715_v27, 0.0  ;;  %v5441_v5 = vld [vmem:[#allocation5 + $0x2c0] ss:$8 sps:$4 sm:$0xff]  }
 0x184   : > { %v590_v24 = vadd.f32 %v589_v20, %v6356_v41  ;;  %v719_v25 = vadd.f32 %v718_v21, %v6356_v41  ;;  %1096 = vmatprep.mubr.bf16.mxu0 %v849_v14  ;;  %1225 = vmatprep.mubr.bf16.mxu1 %v1146_v15  ;;  %v764_v43 = vmax.f32 %v588_v19, 0.0  ;;  %v5444_v21 = vld [vmem:[#allocation5 + $0x2b0] ss:$8 sps:$4 sm:$0xff]  }
 0x185   : > { %v591_v28 = vpop.f32.mrf.mxu0  ;;  %v720_v29 = vpop.f32.mrf.mxu1  ;;  %1097 = vmatmul.mubr.bf16.gmra.mxu0 %v848_v17  ;;  %1226 = vmatmul.mubr.bf16.gmra.mxu1 %v1145_v18  ;;  %v796_v44 = vmax.f32 %v717_v23, 0.0 }
 0x186   : > { %v592_v30 = vadd.f32 %v591_v28, %v6353_v40  ;;  %v721_v31 = vadd.f32 %v720_v29, %v6353_v40  ;;  %1564 = vmatpush2.bf16.msra.mxu0 %v5432_v16  ;;  %v765_v33 = vmax.f32 %v590_v24, 0.0  ;;  %v797_v35 = vmax.f32 %v719_v25, 0.0  ;;  %1693 = vmatpush2.bf16.msra.mxu1 %v5432_v16 }
 0x187   : > { %v595_v38 = vpop.f32.mrf.mxu0  ;;  %v724_v39 = vpop.f32.mrf.mxu1  ;;  %1565 = vmatprep.subr.bf16.mxu0 %v5437_v22  ;;  %1694 = vmatprep.subr.bf16.mxu1 %v5437_v22 }
 0x188   : > { %v766_v45 = vmax.f32 %v592_v30, 0.0  ;;  %v798_v46 = vmax.f32 %v721_v31, 0.0  ;;  %v850_v54 = vpack.c.bf16 %v765_v33, %v763_v47  ;;  %v1147_v55 = vpack.c.bf16 %v797_v35, %v795_v48 }
 0x189   : > { %v597_v49 = vpop.f32.mrf.mxu0  ;;  %v726_v50 = vpop.f32.mrf.mxu1  ;;  %v596_v63 = vadd.f32 %v595_v38, %v6356_v41  ;;  %v725_v0 = vadd.f32 %v724_v39, %v6356_v41 }
 0x18a   : > { %v851_v51 = vpack.c.bf16 %v766_v45, %v764_v43  ;;  %v1148_v52 = vpack.c.bf16 %v798_v46, %v796_v44  ;;  %1566 = vmatpush2.bf16.msra.mxu0 %v5435_v32  ;;  %v598_v56 = vadd.f32 %v597_v49, %v6353_v40  ;;  %1695 = vmatpush2.bf16.msra.mxu1 %v5435_v32 }
 0x18b   : > { %v599_v57 = vpop.f32.mrf.mxu0  ;;  %v728_v58 = vpop.f32.mrf.mxu1  ;;  %1567 = vmatprep.subr.bf16.mxu0 %v5440_v42  ;;  %v727_v60 = vadd.f32 %v726_v50, %v6353_v40  ;;  %1696 = vmatprep.subr.bf16.mxu1 %v5440_v42  ;;  %v767_v15 = vmax.f32 %v596_v63, 0.0  ;;  %v799_v16 = vmax.f32 %v725_v0, 0.0 }
 0x18c   : > { %v600_v61 = vadd.f32 %v599_v57, %v6356_v41  ;;  %v729_v62 = vadd.f32 %v728_v58, %v6356_v41  ;;  %1106 = vmatprep.mubr.bf16.mxu0 %v851_v51  ;;  %1235 = vmatprep.mubr.bf16.mxu1 %v1148_v52  ;;  %v768_v11 = vmax.f32 %v598_v56, 0.0  ;;  %v5447_v52 = vld [vmem:[#allocation5 + $0x2a0] ss:$8 sps:$4 sm:$0xff]   ;;  %v5458_v57 = vld [vmem:[#allocation5 + $0x374] ss:$8 sps:$4 sm:$0xff]   ;;  %v858_v58 = vsub.s32 1, %v6345_v34 }
 0x18d   : > { %v601_v1 = vpop.f32.mrf.mxu0  ;;  %v730_v2 = vpop.f32.mrf.mxu1  ;;  %1107 = vmatmul.mubr.bf16.gmra.mxu0 %v850_v54  ;;  %1236 = vmatmul.mubr.bf16.gmra.mxu1 %v1147_v55  ;;  %v800_v12 = vmax.f32 %v727_v60, 0.0  ;;  %v5450_v54 = vld [vmem:[#allocation5 + $0x290] ss:$8 sps:$4 sm:$0xff]   ;;  %v5455_v55 = vld [vmem:[#allocation5 + $0x284] ss:$8 sps:$4 sm:$0xff]  }
 0x18e   : > { %v602_v3 = vadd.f32 %v601_v1, %v6353_v40  ;;  %v731_v4 = vadd.f32 %v730_v2, %v6353_v40  ;;  %1568 = vmatpush2.bf16.msra.mxu0 %v5438_v53  ;;  %v769_v6 = vmax.f32 %v600_v61, 0.0  ;;  %v801_v7 = vmax.f32 %v729_v62, 0.0  ;;  %1697 = vmatpush2.bf16.msra.mxu1 %v5438_v53  ;;  %v5452_v53 = vld [vmem:[#allocation5 + $0x294] ss:$8 sps:$4 sm:$0xff]   ;;  %v5453_v56 = vld [vmem:[#allocation5 + $0x280] ss:$8 sps:$4 sm:$0xff]  }
 0x18f   : > { %v605_v8 = vpop.f32.mrf.mxu0  ;;  %v734_v9 = vpop.f32.mrf.mxu1  ;;  %1569 = vmatprep.subr.bf16.mxu0 %v5443_v59  ;;  %1698 = vmatprep.subr.bf16.mxu1 %v5443_v59  ;;  %v6424_v61 = vrot.slane %v6348_v36, %v858_v58  ;;  %v6427_v62 = vrot.slane %v6350_v37, %v858_v58 }
 0x190   : > { %v770_v13 = vmax.f32 %v602_v3, 0.0  ;;  %v802_v14 = vmax.f32 %v731_v4, 0.0  ;;  %v852_v22 = vpack.c.bf16 %v769_v6, %v767_v15  ;;  %v1149_v23 = vpack.c.bf16 %v801_v7, %v799_v16 }
 0x191   : > { %v607_v17 = vpop.f32.mrf.mxu0  ;;  %v736_v18 = vpop.f32.mrf.mxu1  ;;  %v606_v30 = vadd.f32 %v605_v8, %v6356_v41  ;;  %v735_v31 = vadd.f32 %v734_v9, %v6356_v41 }
 0x192   : > { %v853_v19 = vpack.c.bf16 %v770_v13, %v768_v11  ;;  %v1150_v20 = vpack.c.bf16 %v802_v14, %v800_v12  ;;  %1570 = vmatpush2.bf16.msra.mxu0 %v5441_v5  ;;  %v608_v24 = vadd.f32 %v607_v17, %v6353_v40  ;;  %1699 = vmatpush2.bf16.msra.mxu1 %v5441_v5 }
 0x193   : > { %v609_v25 = vpop.f32.mrf.mxu0  ;;  %v738_v26 = vpop.f32.mrf.mxu1  ;;  %1571 = vmatprep.subr.bf16.mxu0 %v5446_v10  ;;  %v737_v27 = vadd.f32 %v736_v18, %v6353_v40  ;;  %1700 = vmatprep.subr.bf16.mxu1 %v5446_v10  ;;  %v771_v47 = vmax.f32 %v606_v30, 0.0  ;;  %v803_v48 = vmax.f32 %v735_v31, 0.0  ;;  %v5461_v31 = vld [vmem:[#allocation5 + $0x364] ss:$8 sps:$4 sm:$0xff]  }
 0x194   : > { %v610_v28 = vadd.f32 %v609_v25, %v6356_v41  ;;  %v739_v29 = vadd.f32 %v738_v26, %v6356_v41  ;;  %1116 = vmatprep.mubr.bf16.mxu0 %v853_v19  ;;  %1245 = vmatprep.mubr.bf16.mxu1 %v1150_v20  ;;  %v772_v43 = vmax.f32 %v608_v24, 0.0  ;;  %v5456_v25 = vld [vmem:[#allocation5 + $0x370] ss:$8 sps:$4 sm:$0xff]  }
 0x195   : > { %v611_v32 = vpop.f32.mrf.mxu0  ;;  %v740_v33 = vpop.f32.mrf.mxu1  ;;  %1117 = vmatmul.mubr.bf16.gmra.mxu0 %v852_v22  ;;  %1246 = vmatmul.mubr.bf16.gmra.mxu1 %v1149_v23  ;;  %v804_v44 = vmax.f32 %v737_v27, 0.0 }
 0x196   : > { %v612_v35 = vadd.f32 %v611_v32, %v6353_v40  ;;  %v741_v38 = vadd.f32 %v740_v33, %v6353_v40  ;;  %1572 = vmatpush2.bf16.msra.mxu0 %v5444_v21  ;;  %v773_v39 = vmax.f32 %v610_v28, 0.0  ;;  %v805_v42 = vmax.f32 %v739_v29, 0.0  ;;  %1701 = vmatpush2.bf16.msra.mxu1 %v5444_v21  ;;  %v5449_v40 = vld [vmem:[#allocation5 + $0x2a4] ss:$8 sps:$4 sm:$0xff]  }
 0x197   : > { %1573 = vmatprep.subr.bf16.mxu0 %v5449_v40  ;;  %1702 = vmatprep.subr.bf16.mxu1 %v5449_v40 }
 0x198   : > { %v774_v45 = vmax.f32 %v612_v35, 0.0  ;;  %v806_v46 = vmax.f32 %v741_v38, 0.0  ;;  %v854_v50 = vpack.c.bf16 %v773_v39, %v771_v47  ;;  %v1151_v51 = vpack.c.bf16 %v805_v42, %v803_v48 }
 0x19a   : > { %v855_v41 = vpack.c.bf16 %v774_v45, %v772_v43  ;;  %v1152_v49 = vpack.c.bf16 %v806_v46, %v804_v44  ;;  %1574 = vmatpush2.bf16.msra.mxu0 %v5447_v52  ;;  %1703 = vmatpush2.bf16.msra.mxu1 %v5447_v52  ;;  %v5459_v46 = vld [vmem:[#allocation5 + $0x360] ss:$8 sps:$4 sm:$0xff]  }
 0x19b   : > { %1575 = vmatprep.subr.bf16.mxu0 %v5452_v53  ;;  %1704 = vmatprep.subr.bf16.mxu1 %v5452_v53 }
 0x19c   : > { %1126 = vmatprep.mubr.bf16.mxu0 %v855_v41  ;;  %1255 = vmatprep.mubr.bf16.mxu1 %v1152_v49 }
 0x19d   : > { %1127 = vmatmul.mubr.bf16.gmra.mxu0 %v854_v50  ;;  %1256 = vmatmul.mubr.bf16.gmra.mxu1 %v1151_v51  ;;  %v5464_v50 = vld [vmem:[#allocation5 + $0x354] ss:$8 sps:$4 sm:$0xff]  }
 0x19e   : > { %1576 = vmatpush2.bf16.msra.mxu0 %v5450_v54  ;;  %1705 = vmatpush2.bf16.msra.mxu1 %v5450_v54 }
 0x19f   : > { %1577 = vmatprep.subr.bf16.mxu0 %v5455_v55  ;;  %1706 = vmatprep.subr.bf16.mxu1 %v5455_v55 }
 0x1a2   : > { %1578 = vmatpush2.bf16.msra.mxu0 %v5453_v56  ;;  %1707 = vmatpush2.bf16.msra.mxu1 %v5453_v56 }
 0x1a3   : > { %2070 = vmatprep.subr.bf16.mxu0 %v5458_v57  ;;  %2199 = vmatprep.subr.bf16.mxu1 %v5458_v57 }
 0x225   : > { %v1058_v59 = vpop.f32.mrf.mxu0  ;;  %v1187_v60 = vpop.f32.mrf.mxu1 }
 0x226   : > { %v1059_v7 = vadd.f32 %v1058_v59, %v6427_v62  ;;  %v1188_v36 = vadd.f32 %v1187_v60, %v6427_v62  ;;  %v5462_v60 = vld [vmem:[#allocation5 + $0x350] ss:$8 sps:$4 sm:$0xff]  }
 0x227   : > { %v1060_v63 = vpop.f32.mrf.mxu0  ;;  %v1189_v0 = vpop.f32.mrf.mxu1 }
 0x228   : > { %v1061_v3 = vadd.f32 %v1060_v63, %v6424_v61  ;;  %v1190_v4 = vadd.f32 %v1189_v0, %v6424_v61  ;;  %v1266_v19 = vmax.f32 %v1059_v7, 0.0  ;;  %v1298_v20 = vmax.f32 %v1188_v36, 0.0 }
 0x229   : > { %v1062_v1 = vpop.f32.mrf.mxu0  ;;  %v1191_v2 = vpop.f32.mrf.mxu1 }
 0x22a   : > { %v1063_v5 = vadd.f32 %v1062_v1, %v6427_v62  ;;  %v1192_v6 = vadd.f32 %v1191_v2, %v6427_v62  ;;  %v1267_v15 = vmax.f32 %v1061_v3, 0.0  ;;  %v1299_v16 = vmax.f32 %v1190_v4, 0.0  ;;  %v5467_v4 = vld [vmem:[#allocation5 + $0x344] ss:$8 sps:$4 sm:$0xff]  }
 0x22b   : > { %v1064_v8 = vpop.f32.mrf.mxu0  ;;  %v1193_v9 = vpop.f32.mrf.mxu1 }
 0x22c   : > { %v1065_v37 = vadd.f32 %v1064_v8, %v6424_v61  ;;  %v1194_v10 = vadd.f32 %v1193_v9, %v6424_v61  ;;  %v1268_v11 = vmax.f32 %v1063_v5, 0.0  ;;  %v1300_v12 = vmax.f32 %v1192_v6, 0.0 }
 0x22d   : > { %v1068_v13 = vpop.f32.mrf.mxu0  ;;  %v1197_v14 = vpop.f32.mrf.mxu1 }
 0x22e   : > { %v1269_v17 = vmax.f32 %v1065_v37, 0.0  ;;  %v1301_v18 = vmax.f32 %v1194_v10, 0.0  ;;  %v1363_v26 = vpack.c.bf16 %v1268_v11, %v1266_v19  ;;  %v1660_v27 = vpack.c.bf16 %v1300_v12, %v1298_v20  ;;  %v5465_v12 = vld [vmem:[#allocation5 + $0x340] ss:$8 sps:$4 sm:$0xff]  }
 0x22f   : > { %v1070_v21 = vpop.f32.mrf.mxu0  ;;  %v1199_v22 = vpop.f32.mrf.mxu1  ;;  %v1069_v38 = vadd.f32 %v1068_v13, %v6427_v62  ;;  %v1198_v39 = vadd.f32 %v1197_v14, %v6427_v62 }
 0x230   : > { %v1364_v23 = vpack.c.bf16 %v1269_v17, %v1267_v15  ;;  %v1661_v24 = vpack.c.bf16 %v1301_v18, %v1299_v16  ;;  %v1071_v28 = vadd.f32 %v1070_v21, %v6424_v61  ;;  %v1200_v32 = vadd.f32 %v1199_v22, %v6424_v61  ;;  %v5470_v17 = vld [vmem:[#allocation5 + $0x334] ss:$8 sps:$4 sm:$0xff]  }
 0x231   : > { %v1072_v29 = vpop.f32.mrf.mxu0  ;;  %v1201_v30 = vpop.f32.mrf.mxu1  ;;  %v1270_v54 = vmax.f32 %v1069_v38, 0.0  ;;  %v1302_v55 = vmax.f32 %v1198_v39, 0.0 }
 0x232   : > { %v1073_v33 = vadd.f32 %v1072_v29, %v6427_v62  ;;  %v1202_v35 = vadd.f32 %v1201_v30, %v6427_v62  ;;  %1579 = vmatprep.mubr.bf16.mxu0 %v1364_v23  ;;  %1708 = vmatprep.mubr.bf16.mxu1 %v1661_v24  ;;  %v1271_v51 = vmax.f32 %v1071_v28, 0.0  ;;  %v1303_v40 = vmax.f32 %v1200_v32, 0.0  ;;  %v5468_v28 = vld [vmem:[#allocation5 + $0x330] ss:$8 sps:$4 sm:$0xff]  }
 0x233   : > { %v1074_v42 = vpop.f32.mrf.mxu0  ;;  %v1203_v43 = vpop.f32.mrf.mxu1  ;;  %1580 = vmatmul.mubr.bf16.vlgmr.msra.gmra.mxu0 %v1363_v26  ;;  %1709 = vmatmul.mubr.bf16.vlgmr.msra.gmra.mxu1 %v1660_v27 }
 0x234   : > { %v1075_v44 = vadd.f32 %v1074_v42, %v6424_v61  ;;  %v1204_v45 = vadd.f32 %v1203_v43, %v6424_v61  ;;  %2071 = vmatpush1.bf16.msra.mxu0 %v5456_v25  ;;  %2200 = vmatpush1.bf16.msra.mxu1 %v5456_v25  ;;  %v1272_v47 = vmax.f32 %v1073_v33, 0.0  ;;  %v1304_v48 = vmax.f32 %v1202_v35, 0.0  ;;  %v5473_v35 = vld [vmem:[#allocation5 + $0x324] ss:$8 sps:$4 sm:$0xff]  }
 0x235   : > { %v1078_v41 = vpop.f32.mrf.mxu0  ;;  %v1207_v49 = vpop.f32.mrf.mxu1  ;;  %2072 = vmatprep.subr.bf16.mxu0 %v5461_v31  ;;  %2201 = vmatprep.subr.bf16.mxu1 %v5461_v31 }
 0x236   : > { %v1273_v52 = vmax.f32 %v1075_v44, 0.0  ;;  %v1305_v53 = vmax.f32 %v1204_v45, 0.0  ;;  %v1365_v63 = vpack.c.bf16 %v1272_v47, %v1270_v54  ;;  %v1662_v0 = vpack.c.bf16 %v1304_v48, %v1302_v55 }
 0x237   : > { %v1080_v56 = vpop.f32.mrf.mxu0  ;;  %v1209_v57 = vpop.f32.mrf.mxu1  ;;  %v1079_v36 = vadd.f32 %v1078_v41, %v6427_v62  ;;  %v1208_v8 = vadd.f32 %v1207_v49, %v6427_v62  ;;  %v5471_v41 = vld [vmem:[#allocation5 + $0x320] ss:$8 sps:$4 sm:$0xff]  }
 0x238   : > { %v1366_v58 = vpack.c.bf16 %v1273_v52, %v1271_v51  ;;  %v1663_v59 = vpack.c.bf16 %v1305_v53, %v1303_v40  ;;  %2073 = vmatpush1.bf16.msra.mxu0 %v5459_v46  ;;  %v1081_v1 = vadd.f32 %v1080_v56, %v6424_v61  ;;  %2202 = vmatpush1.bf16.msra.mxu1 %v5459_v46  ;;  %v5476_v52 = vld [vmem:[#allocation5 + $0x314] ss:$8 sps:$4 sm:$0xff]  }
 0x239   : > { %v1082_v2 = vpop.f32.mrf.mxu0  ;;  %v1211_v3 = vpop.f32.mrf.mxu1  ;;  %2074 = vmatprep.subr.bf16.mxu0 %v5464_v50  ;;  %v1210_v5 = vadd.f32 %v1209_v57, %v6424_v61  ;;  %2203 = vmatprep.subr.bf16.mxu1 %v5464_v50  ;;  %v1274_v22 = vmax.f32 %v1079_v36, 0.0  ;;  %v1306_v23 = vmax.f32 %v1208_v8, 0.0 }
 0x23a   : > { %v1083_v6 = vadd.f32 %v1082_v2, %v6427_v62  ;;  %v1212_v7 = vadd.f32 %v1211_v3, %v6427_v62  ;;  %1589 = vmatprep.mubr.bf16.mxu0 %v1366_v58  ;;  %1718 = vmatprep.mubr.bf16.mxu1 %v1663_v59  ;;  %v1275_v18 = vmax.f32 %v1081_v1, 0.0  ;;  %v5474_v1 = vld [vmem:[#allocation5 + $0x310] ss:$8 sps:$4 sm:$0xff]  }
 0x23b   : > { %v1084_v9 = vpop.f32.mrf.mxu0  ;;  %v1213_v37 = vpop.f32.mrf.mxu1  ;;  %1590 = vmatmul.mubr.bf16.gmra.mxu0 %v1365_v63  ;;  %1719 = vmatmul.mubr.bf16.gmra.mxu1 %v1662_v0  ;;  %v1307_v19 = vmax.f32 %v1210_v5, 0.0 }
 0x23c   : > { %v1085_v10 = vadd.f32 %v1084_v9, %v6424_v61  ;;  %v1214_v11 = vadd.f32 %v1213_v37, %v6424_v61  ;;  %2075 = vmatpush1.bf16.msra.mxu0 %v5462_v60  ;;  %v1276_v13 = vmax.f32 %v1083_v6, 0.0  ;;  %v1308_v14 = vmax.f32 %v1212_v7, 0.0  ;;  %2204 = vmatpush1.bf16.msra.mxu1 %v5462_v60  ;;  %v5479_v7 = vld [vmem:[#allocation5 + $0x304] ss:$8 sps:$4 sm:$0xff]  }
 0x23d   : > { %v1088_v15 = vpop.f32.mrf.mxu0  ;;  %v1217_v16 = vpop.f32.mrf.mxu1  ;;  %2076 = vmatprep.subr.bf16.mxu0 %v5467_v4  ;;  %2205 = vmatprep.subr.bf16.mxu1 %v5467_v4 }
 0x23e   : > { %v1277_v20 = vmax.f32 %v1085_v10, 0.0  ;;  %v1309_v21 = vmax.f32 %v1214_v11, 0.0  ;;  %v1367_v29 = vpack.c.bf16 %v1276_v13, %v1274_v22  ;;  %v1664_v30 = vpack.c.bf16 %v1308_v14, %v1306_v23 }
 0x23f   : > { %v1090_v24 = vpop.f32.mrf.mxu0  ;;  %v1219_v25 = vpop.f32.mrf.mxu1  ;;  %v1089_v43 = vadd.f32 %v1088_v15, %v6427_v62  ;;  %v1218_v44 = vadd.f32 %v1217_v16, %v6427_v62  ;;  %v5477_v15 = vld [vmem:[#allocation5 + $0x300] ss:$8 sps:$4 sm:$0xff]  }
 0x240   : > { %v1368_v26 = vpack.c.bf16 %v1277_v20, %v1275_v18  ;;  %v1665_v27 = vpack.c.bf16 %v1309_v21, %v1307_v19  ;;  %2077 = vmatpush1.bf16.msra.mxu0 %v5465_v12  ;;  %v1091_v31 = vadd.f32 %v1090_v24, %v6424_v61  ;;  %2206 = vmatpush1.bf16.msra.mxu1 %v5465_v12  ;;  %v5482_v20 = vld [vmem:[#allocation5 + $0x3f4] ss:$8 sps:$4 sm:$0xff]  }
 0x241   : > { %v1092_v32 = vpop.f32.mrf.mxu0  ;;  %v1221_v33 = vpop.f32.mrf.mxu1  ;;  %2078 = vmatprep.subr.bf16.mxu0 %v5470_v17  ;;  %v1220_v38 = vadd.f32 %v1219_v25, %v6424_v61  ;;  %2207 = vmatprep.subr.bf16.mxu1 %v5470_v17  ;;  %v1278_v57 = vmax.f32 %v1089_v43, 0.0  ;;  %v1310_v58 = vmax.f32 %v1218_v44, 0.0 }
 0x242   : > { %v1093_v39 = vadd.f32 %v1092_v32, %v6427_v62  ;;  %v1222_v42 = vadd.f32 %v1221_v33, %v6427_v62  ;;  %1599 = vmatprep.mubr.bf16.mxu0 %v1368_v26  ;;  %1728 = vmatprep.mubr.bf16.mxu1 %v1665_v27  ;;  %v1279_v53 = vmax.f32 %v1091_v31, 0.0  ;;  %v5480_v31 = vld [vmem:[#allocation5 + $0x3f0] ss:$8 sps:$4 sm:$0xff]  }
 0x243   : > { %v1094_v45 = vpop.f32.mrf.mxu0  ;;  %v1223_v46 = vpop.f32.mrf.mxu1  ;;  %1600 = vmatmul.mubr.bf16.gmra.mxu0 %v1367_v29  ;;  %1729 = vmatmul.mubr.bf16.gmra.mxu1 %v1664_v30  ;;  %v1311_v54 = vmax.f32 %v1220_v38, 0.0 }
 0x244   : > { %v1095_v47 = vadd.f32 %v1094_v45, %v6424_v61  ;;  %v1224_v48 = vadd.f32 %v1223_v46, %v6424_v61  ;;  %2079 = vmatpush1.bf16.msra.mxu0 %v5468_v28  ;;  %v1280_v49 = vmax.f32 %v1093_v39, 0.0  ;;  %v1312_v50 = vmax.f32 %v1222_v42, 0.0  ;;  %2208 = vmatpush1.bf16.msra.mxu1 %v5468_v28  ;;  %v5485_v42 = vld [vmem:[#allocation5 + $0x3e4] ss:$8 sps:$4 sm:$0xff]  }
 0x245   : > { %v1098_v51 = vpop.f32.mrf.mxu0  ;;  %v1227_v40 = vpop.f32.mrf.mxu1  ;;  %2080 = vmatprep.subr.bf16.mxu0 %v5473_v35  ;;  %2209 = vmatprep.subr.bf16.mxu1 %v5473_v35 }
 0x246   : > { %v1281_v55 = vmax.f32 %v1095_v47, 0.0  ;;  %v1313_v56 = vmax.f32 %v1224_v48, 0.0  ;;  %v1369_v2 = vpack.c.bf16 %v1280_v49, %v1278_v57  ;;  %v1666_v3 = vpack.c.bf16 %v1312_v50, %v1310_v58 }
 0x247   : > { %v1100_v59 = vpop.f32.mrf.mxu0  ;;  %v1229_v60 = vpop.f32.mrf.mxu1  ;;  %v1099_v37 = vadd.f32 %v1098_v51, %v6427_v62  ;;  %v1228_v10 = vadd.f32 %v1227_v40, %v6427_v62  ;;  %v5483_v51 = vld [vmem:[#allocation5 + $0x3e0] ss:$8 sps:$4 sm:$0xff]  }
 0x248   : > { %v1370_v63 = vpack.c.bf16 %v1281_v55, %v1279_v53  ;;  %v1667_v0 = vpack.c.bf16 %v1313_v56, %v1311_v54  ;;  %2081 = vmatpush1.bf16.msra.mxu0 %v5471_v41  ;;  %v1101_v4 = vadd.f32 %v1100_v59, %v6424_v61  ;;  %2210 = vmatpush1.bf16.msra.mxu1 %v5471_v41  ;;  %v5488_v55 = vld [vmem:[#allocation5 + $0x3d4] ss:$8 sps:$4 sm:$0xff]  }
 0x249   : > { %v1102_v5 = vpop.f32.mrf.mxu0  ;;  %v1231_v6 = vpop.f32.mrf.mxu1  ;;  %2082 = vmatprep.subr.bf16.mxu0 %v5476_v52  ;;  %v1230_v36 = vadd.f32 %v1229_v60, %v6424_v61  ;;  %2211 = vmatprep.subr.bf16.mxu1 %v5476_v52  ;;  %v1282_v25 = vmax.f32 %v1099_v37, 0.0  ;;  %v1314_v26 = vmax.f32 %v1228_v10, 0.0 }
 0x24a   : > { %v1103_v8 = vadd.f32 %v1102_v5, %v6427_v62  ;;  %v1232_v9 = vadd.f32 %v1231_v6, %v6427_v62  ;;  %1609 = vmatprep.mubr.bf16.mxu0 %v1370_v63  ;;  %1738 = vmatprep.mubr.bf16.mxu1 %v1667_v0  ;;  %v1283_v21 = vmax.f32 %v1101_v4, 0.0  ;;  %v5486_v4 = vld [vmem:[#allocation5 + $0x3d0] ss:$8 sps:$4 sm:$0xff]  }
 0x24b   : > { %v1104_v11 = vpop.f32.mrf.mxu0  ;;  %v1233_v12 = vpop.f32.mrf.mxu1  ;;  %1610 = vmatmul.mubr.bf16.gmra.mxu0 %v1369_v2  ;;  %1739 = vmatmul.mubr.bf16.gmra.mxu1 %v1666_v3  ;;  %v1315_v22 = vmax.f32 %v1230_v36, 0.0 }
 0x24c   : > { %v1105_v13 = vadd.f32 %v1104_v11, %v6424_v61  ;;  %v1234_v14 = vadd.f32 %v1233_v12, %v6424_v61  ;;  %2083 = vmatpush1.bf16.msra.mxu0 %v5474_v1  ;;  %v1284_v16 = vmax.f32 %v1103_v8, 0.0  ;;  %v1316_v17 = vmax.f32 %v1232_v9, 0.0  ;;  %2212 = vmatpush1.bf16.msra.mxu1 %v5474_v1  ;;  %v5491_v9 = vld [vmem:[#allocation5 + $0x3c4] ss:$8 sps:$4 sm:$0xff]  }
 0x24d   : > { %v1108_v18 = vpop.f32.mrf.mxu0  ;;  %v1237_v19 = vpop.f32.mrf.mxu1  ;;  %2084 = vmatprep.subr.bf16.mxu0 %v5479_v7  ;;  %2213 = vmatprep.subr.bf16.mxu1 %v5479_v7 }
 0x24e   : > { %v1285_v23 = vmax.f32 %v1105_v13, 0.0  ;;  %v1317_v24 = vmax.f32 %v1234_v14, 0.0  ;;  %v1371_v32 = vpack.c.bf16 %v1284_v16, %v1282_v25  ;;  %v1668_v33 = vpack.c.bf16 %v1316_v17, %v1314_v26 }
 0x24f   : > { %v1110_v27 = vpop.f32.mrf.mxu0  ;;  %v1239_v28 = vpop.f32.mrf.mxu1  ;;  %v1109_v46 = vadd.f32 %v1108_v18, %v6427_v62  ;;  %v1238_v47 = vadd.f32 %v1237_v19, %v6427_v62  ;;  %v5489_v18 = vld [vmem:[#allocation5 + $0x3c0] ss:$8 sps:$4 sm:$0xff]  }
 0x250   : > { %v1372_v29 = vpack.c.bf16 %v1285_v23, %v1283_v21  ;;  %v1669_v30 = vpack.c.bf16 %v1317_v24, %v1315_v22  ;;  %2085 = vmatpush1.bf16.msra.mxu0 %v5477_v15  ;;  %v1111_v35 = vadd.f32 %v1110_v27, %v6424_v61  ;;  %2214 = vmatpush1.bf16.msra.mxu1 %v5477_v15  ;;  %v5494_v23 = vld [vmem:[#allocation5 + $0x3b4] ss:$8 sps:$4 sm:$0xff]  }
 0x251   : > { %v1112_v38 = vpop.f32.mrf.mxu0  ;;  %v1241_v39 = vpop.f32.mrf.mxu1  ;;  %2086 = vmatprep.subr.bf16.mxu0 %v5482_v20  ;;  %v1240_v43 = vadd.f32 %v1239_v28, %v6424_v61  ;;  %2215 = vmatprep.subr.bf16.mxu1 %v5482_v20  ;;  %v1286_v60 = vmax.f32 %v1109_v46, 0.0  ;;  %v1318_v63 = vmax.f32 %v1238_v47, 0.0 }
 0x252   : > { %v1113_v44 = vadd.f32 %v1112_v38, %v6427_v62  ;;  %v1242_v45 = vadd.f32 %v1241_v39, %v6427_v62  ;;  %1619 = vmatprep.mubr.bf16.mxu0 %v1372_v29  ;;  %1748 = vmatprep.mubr.bf16.mxu1 %v1669_v30  ;;  %v1287_v56 = vmax.f32 %v1111_v35, 0.0  ;;  %v5492_v35 = vld [vmem:[#allocation5 + $0x3b0] ss:$8 sps:$4 sm:$0xff]  }
 0x253   : > { %v1114_v48 = vpop.f32.mrf.mxu0  ;;  %v1243_v41 = vpop.f32.mrf.mxu1  ;;  %1620 = vmatmul.mubr.bf16.gmra.mxu0 %v1371_v32  ;;  %1749 = vmatmul.mubr.bf16.gmra.mxu1 %v1668_v33  ;;  %v1319_v57 = vmax.f32 %v1240_v43, 0.0 }
 0x254   : > { %v1115_v49 = vadd.f32 %v1114_v48, %v6424_v61  ;;  %v1244_v50 = vadd.f32 %v1243_v41, %v6424_v61  ;;  %2087 = vmatpush2.bf16.msra.mxu0 %v5480_v31  ;;  %v1288_v40 = vmax.f32 %v1113_v44, 0.0  ;;  %v1320_v52 = vmax.f32 %v1242_v45, 0.0  ;;  %2216 = vmatpush2.bf16.msra.mxu1 %v5480_v31 }
 0x255   : > { %v1118_v53 = vpop.f32.mrf.mxu0  ;;  %v1247_v54 = vpop.f32.mrf.mxu1  ;;  %2088 = vmatprep.subr.bf16.mxu0 %v5485_v42  ;;  %2217 = vmatprep.subr.bf16.mxu1 %v5485_v42 }
 0x256   : > { %v1289_v58 = vmax.f32 %v1115_v49, 0.0  ;;  %v1321_v59 = vmax.f32 %v1244_v50, 0.0  ;;  %v1373_v5 = vpack.c.bf16 %v1288_v40, %v1286_v60  ;;  %v1670_v6 = vpack.c.bf16 %v1320_v52, %v1318_v63 }
 0x257   : > { %v1120_v0 = vpop.f32.mrf.mxu0  ;;  %v1249_v1 = vpop.f32.mrf.mxu1  ;;  %v1119_v12 = vadd.f32 %v1118_v53, %v6427_v62  ;;  %v1248_v13 = vadd.f32 %v1247_v54, %v6427_v62 }
 0x258   : > { %v1374_v2 = vpack.c.bf16 %v1289_v58, %v1287_v56  ;;  %v1671_v3 = vpack.c.bf16 %v1321_v59, %v1319_v57  ;;  %2089 = vmatpush2.bf16.msra.mxu0 %v5483_v51  ;;  %v1121_v7 = vadd.f32 %v1120_v0, %v6424_v61  ;;  %2218 = vmatpush2.bf16.msra.mxu1 %v5483_v51 }
 0x259   : > { %v1122_v36 = vpop.f32.mrf.mxu0  ;;  %v1251_v8 = vpop.f32.mrf.mxu1  ;;  %2090 = vmatprep.subr.bf16.mxu0 %v5488_v55  ;;  %v1250_v37 = vadd.f32 %v1249_v1, %v6424_v61  ;;  %2219 = vmatprep.subr.bf16.mxu1 %v5488_v55  ;;  %v1290_v28 = vmax.f32 %v1119_v12, 0.0  ;;  %v1322_v29 = vmax.f32 %v1248_v13, 0.0  ;;  %v5495_v1 = vld [vmem:[#allocation5 + $0x3a0] ss:$8 sps:$4 sm:$0xff]  }
 0x25a   : > { %v1123_v10 = vadd.f32 %v1122_v36, %v6427_v62  ;;  %v1252_v11 = vadd.f32 %v1251_v8, %v6427_v62  ;;  %1629 = vmatprep.mubr.bf16.mxu0 %v1374_v2  ;;  %1758 = vmatprep.mubr.bf16.mxu1 %v1671_v3  ;;  %v1291_v24 = vmax.f32 %v1121_v7, 0.0  ;;  %v5500_v2 = vld [vmem:[#allocation5 + $0x394] ss:$8 sps:$4 sm:$0xff]   ;;  %v5498_v3 = vld [vmem:[#allocation5 + $0x390] ss:$8 sps:$4 sm:$0xff]   ;;  %v1381_v7 = vsub.s32 2, %v6345_v34 }
 0x25b   : > { %v1124_v14 = vpop.f32.mrf.mxu0  ;;  %v1253_v15 = vpop.f32.mrf.mxu1  ;;  %1630 = vmatmul.mubr.bf16.gmra.mxu0 %v1373_v5  ;;  %1759 = vmatmul.mubr.bf16.gmra.mxu1 %v1670_v6  ;;  %v1323_v25 = vmax.f32 %v1250_v37, 0.0  ;;  %v5501_v5 = vld [vmem:[#allocation5 + $0x380] ss:$8 sps:$4 sm:$0xff]   ;;  %v5506_v6 = vld [vmem:[#allocation5 + $0x474] ss:$8 sps:$4 sm:$0xff]  }
 0x25c   : > { %v1125_v16 = vadd.f32 %v1124_v14, %v6424_v61  ;;  %v1254_v17 = vadd.f32 %v1253_v15, %v6424_v61  ;;  %2091 = vmatpush2.bf16.msra.mxu0 %v5486_v4  ;;  %v1292_v19 = vmax.f32 %v1123_v10, 0.0  ;;  %v1324_v20 = vmax.f32 %v1252_v11, 0.0  ;;  %2220 = vmatpush2.bf16.msra.mxu1 %v5486_v4  ;;  %v5503_v4 = vld [vmem:[#allocation5 + $0x384] ss:$8 sps:$4 sm:$0xff]  }
 0x25d   : > { %v1128_v21 = vpop.f32.mrf.mxu0  ;;  %v1257_v22 = vpop.f32.mrf.mxu1  ;;  %2092 = vmatprep.subr.bf16.mxu0 %v5491_v9  ;;  %2221 = vmatprep.subr.bf16.mxu1 %v5491_v9  ;;  %v6494_v9 = vld [vmem:[#allocation7 + $0x8] sm:$0xff]  ;;  %v6499_v10 = vld [vmem:[#allocation7] sm:$0xff] }
 0x25e   : > { %v1293_v26 = vmax.f32 %v1125_v16, 0.0  ;;  %v1325_v27 = vmax.f32 %v1254_v17, 0.0  ;;  %v1375_v38 = vpack.c.bf16 %v1292_v19, %v1290_v28  ;;  %v1672_v39 = vpack.c.bf16 %v1324_v20, %v1322_v29 }
 0x25f   : > { %v1130_v30 = vpop.f32.mrf.mxu0  ;;  %v1259_v31 = vpop.f32.mrf.mxu1  ;;  %v1129_v48 = vadd.f32 %v1128_v21, %v6427_v62  ;;  %v1258_v41 = vadd.f32 %v1257_v22, %v6427_v62  ;;  %v6497_v37 = vrot.slane %v6494_v9, %v1381_v7  ;;  %v6502_v11 = vrot.slane %v6499_v10, %v1381_v7 }
 0x260   : > { %v1376_v32 = vpack.c.bf16 %v1293_v26, %v1291_v24  ;;  %v1673_v33 = vpack.c.bf16 %v1325_v27, %v1323_v25  ;;  %2093 = vmatpush2.bf16.msra.mxu0 %v5489_v18  ;;  %v1131_v42 = vadd.f32 %v1130_v30, %v6424_v61  ;;  %2222 = vmatpush2.bf16.msra.mxu1 %v5489_v18 }
 0x261   : > { %v1132_v43 = vpop.f32.mrf.mxu0  ;;  %v1261_v44 = vpop.f32.mrf.mxu1  ;;  %2094 = vmatprep.subr.bf16.mxu0 %v5494_v23  ;;  %v1260_v45 = vadd.f32 %v1259_v31, %v6424_v61  ;;  %2223 = vmatprep.subr.bf16.mxu1 %v5494_v23  ;;  %v1294_v58 = vmax.f32 %v1129_v48, 0.0  ;;  %v1326_v59 = vmax.f32 %v1258_v41, 0.0 }
 0x262   : > { %v1133_v46 = vadd.f32 %v1132_v43, %v6427_v62  ;;  %v1262_v47 = vadd.f32 %v1261_v44, %v6427_v62  ;;  %1639 = vmatprep.mubr.bf16.mxu0 %v1376_v32  ;;  %1768 = vmatprep.mubr.bf16.mxu1 %v1673_v33  ;;  %v1295_v54 = vmax.f32 %v1131_v42, 0.0 }
 0x263   : > { %v1134_v49 = vpop.f32.mrf.mxu0  ;;  %v1263_v50 = vpop.f32.mrf.mxu1  ;;  %1640 = vmatmul.mubr.bf16.gmra.mxu0 %v1375_v38  ;;  %1769 = vmatmul.mubr.bf16.gmra.mxu1 %v1672_v39  ;;  %v1327_v55 = vmax.f32 %v1260_v45, 0.0  ;;  %v5504_v45 = vld [vmem:[#allocation5 + $0x470] ss:$8 sps:$4 sm:$0xff]  }
 0x264   : > { %v1135_v51 = vadd.f32 %v1134_v49, %v6424_v61  ;;  %v1264_v40 = vadd.f32 %v1263_v50, %v6424_v61  ;;  %2095 = vmatpush2.bf16.msra.mxu0 %v5492_v35  ;;  %v1296_v52 = vmax.f32 %v1133_v46, 0.0  ;;  %v1328_v53 = vmax.f32 %v1262_v47, 0.0  ;;  %2224 = vmatpush2.bf16.msra.mxu1 %v5492_v35  ;;  %v5497_v61 = vld [vmem:[#allocation5 + $0x3a4] ss:$8 sps:$4 sm:$0xff]  }
 0x265   : > { %2096 = vmatprep.subr.bf16.mxu0 %v5497_v61  ;;  %2225 = vmatprep.subr.bf16.mxu1 %v5497_v61  ;;  %v5509_v50 = vld [vmem:[#allocation5 + $0x464] ss:$8 sps:$4 sm:$0xff]   ;;  %v5512_v61 = vld [vmem:[#allocation5 + $0x454] ss:$8 sps:$4 sm:$0xff]  }
 0x266   : > { %v1297_v56 = vmax.f32 %v1135_v51, 0.0  ;;  %v1329_v57 = vmax.f32 %v1264_v40, 0.0  ;;  %v1377_v63 = vpack.c.bf16 %v1296_v52, %v1294_v58  ;;  %v1674_v0 = vpack.c.bf16 %v1328_v53, %v1326_v59  ;;  %v5507_v59 = vld [vmem:[#allocation5 + $0x460] ss:$8 sps:$4 sm:$0xff]  }
 0x268   : > { %v1378_v62 = vpack.c.bf16 %v1297_v56, %v1295_v54  ;;  %v1675_v60 = vpack.c.bf16 %v1329_v57, %v1327_v55  ;;  %2097 = vmatpush2.bf16.msra.mxu0 %v5495_v1  ;;  %2226 = vmatpush2.bf16.msra.mxu1 %v5495_v1 }
 0x269   : > { %2098 = vmatprep.subr.bf16.mxu0 %v5500_v2  ;;  %2227 = vmatprep.subr.bf16.mxu1 %v5500_v2 }
 0x26a   : > { %1649 = vmatprep.mubr.bf16.mxu0 %v1378_v62  ;;  %1778 = vmatprep.mubr.bf16.mxu1 %v1675_v60 }
 0x26b   : > { %1650 = vmatmul.mubr.bf16.gmra.mxu0 %v1377_v63  ;;  %1779 = vmatmul.mubr.bf16.gmra.mxu1 %v1674_v0 }
 0x26c   : > { %2099 = vmatpush2.bf16.msra.mxu0 %v5498_v3  ;;  %2228 = vmatpush2.bf16.msra.mxu1 %v5498_v3 }
 0x26d   : > { %2100 = vmatprep.subr.bf16.mxu0 %v5503_v4  ;;  %2229 = vmatprep.subr.bf16.mxu1 %v5503_v4 }
 0x270   : > { %2101 = vmatpush2.bf16.msra.mxu0 %v5501_v5  ;;  %2230 = vmatpush2.bf16.msra.mxu1 %v5501_v5 }
 0x271   : > { %2529 = vmatprep.subr.bf16.mxu0 %v5506_v6  ;;  %2658 = vmatprep.subr.bf16.mxu1 %v5506_v6 }
 0x2f3   : > { %v1581_v36 = vpop.f32.mrf.mxu0  ;;  %v1710_v8 = vpop.f32.mrf.mxu1 }
 0x2f4   : > { %v1582_v20 = vadd.f32 %v1581_v36, %v6502_v11  ;;  %v1711_v21 = vadd.f32 %v1710_v8, %v6502_v11 }
 0x2f5   : > { %v1583_v12 = vpop.f32.mrf.mxu0  ;;  %v1712_v13 = vpop.f32.mrf.mxu1 }
 0x2f6   : > { %v1584_v16 = vadd.f32 %v1583_v12, %v6497_v37  ;;  %v1713_v17 = vadd.f32 %v1712_v13, %v6497_v37  ;;  %v1789_v35 = vmax.f32 %v1582_v20, 0.0  ;;  %v1821_v38 = vmax.f32 %v1711_v21, 0.0  ;;  %v5510_v13 = vld [vmem:[#allocation5 + $0x450] ss:$8 sps:$4 sm:$0xff]  }
 0x2f7   : > { %v1585_v14 = vpop.f32.mrf.mxu0  ;;  %v1714_v15 = vpop.f32.mrf.mxu1 }
 0x2f8   : > { %v1586_v18 = vadd.f32 %v1585_v14, %v6502_v11  ;;  %v1715_v19 = vadd.f32 %v1714_v15, %v6502_v11  ;;  %v1790_v30 = vmax.f32 %v1584_v16, 0.0  ;;  %v1822_v31 = vmax.f32 %v1713_v17, 0.0 }
 0x2f9   : > { %v1587_v22 = vpop.f32.mrf.mxu0  ;;  %v1716_v23 = vpop.f32.mrf.mxu1 }
 0x2fa   : > { %v1588_v24 = vadd.f32 %v1587_v22, %v6497_v37  ;;  %v1717_v25 = vadd.f32 %v1716_v23, %v6497_v37  ;;  %v1791_v26 = vmax.f32 %v1586_v18, 0.0  ;;  %v1823_v27 = vmax.f32 %v1715_v19, 0.0  ;;  %v5515_v19 = vld [vmem:[#allocation5 + $0x444] ss:$8 sps:$4 sm:$0xff]  }
 0x2fb   : > { %v1591_v28 = vpop.f32.mrf.mxu0  ;;  %v1720_v29 = vpop.f32.mrf.mxu1 }
 0x2fc   : > { %v1792_v32 = vmax.f32 %v1588_v24, 0.0  ;;  %v1824_v33 = vmax.f32 %v1717_v25, 0.0  ;;  %v1886_v46 = vpack.c.bf16 %v1791_v26, %v1789_v35  ;;  %v2183_v47 = vpack.c.bf16 %v1823_v27, %v1821_v38  ;;  %v5518_v35 = vld [vmem:[#allocation5 + $0x434] ss:$8 sps:$4 sm:$0xff]  }
 0x2fd   : > { %v1593_v39 = vpop.f32.mrf.mxu0  ;;  %v1722_v42 = vpop.f32.mrf.mxu1  ;;  %v1592_v53 = vadd.f32 %v1591_v28, %v6502_v11  ;;  %v1721_v54 = vadd.f32 %v1720_v29, %v6502_v11  ;;  %v5513_v29 = vld [vmem:[#allocation5 + $0x440] ss:$8 sps:$4 sm:$0xff]  }
 0x2fe   : > { %v1887_v43 = vpack.c.bf16 %v1792_v32, %v1790_v30  ;;  %v2184_v44 = vpack.c.bf16 %v1824_v33, %v1822_v31  ;;  %v1594_v48 = vadd.f32 %v1593_v39, %v6497_v37  ;;  %v1723_v51 = vadd.f32 %v1722_v42, %v6497_v37 }
 0x2ff   : > { %v1595_v41 = vpop.f32.mrf.mxu0  ;;  %v1724_v49 = vpop.f32.mrf.mxu1  ;;  %v1793_v5 = vmax.f32 %v1592_v53, 0.0  ;;  %v1825_v6 = vmax.f32 %v1721_v54, 0.0  ;;  %v5521_v54 = vld [vmem:[#allocation5 + $0x424] ss:$8 sps:$4 sm:$0xff]  }
 0x300   : > { %v1596_v40 = vadd.f32 %v1595_v41, %v6502_v11  ;;  %v1725_v52 = vadd.f32 %v1724_v49, %v6502_v11  ;;  %2102 = vmatprep.mubr.bf16.mxu0 %v1887_v43  ;;  %2231 = vmatprep.mubr.bf16.mxu1 %v2184_v44  ;;  %v1794_v1 = vmax.f32 %v1594_v48, 0.0  ;;  %v1826_v2 = vmax.f32 %v1723_v51, 0.0  ;;  %v5516_v49 = vld [vmem:[#allocation5 + $0x430] ss:$8 sps:$4 sm:$0xff]  }
 0x301   : > { %v1597_v55 = vpop.f32.mrf.mxu0  ;;  %v1726_v56 = vpop.f32.mrf.mxu1  ;;  %2103 = vmatmul.mubr.bf16.vlgmr.msra.gmra.mxu0 %v1886_v46  ;;  %2232 = vmatmul.mubr.bf16.vlgmr.msra.gmra.mxu1 %v2183_v47 }
 0x302   : > { %v1598_v57 = vadd.f32 %v1597_v55, %v6497_v37  ;;  %v1727_v58 = vadd.f32 %v1726_v56, %v6497_v37  ;;  %2530 = vmatpush1.bf16.msra.mxu0 %v5504_v45  ;;  %2659 = vmatpush1.bf16.msra.mxu1 %v5504_v45  ;;  %v1795_v62 = vmax.f32 %v1596_v40, 0.0  ;;  %v1827_v60 = vmax.f32 %v1725_v52, 0.0 }
 0x303   : > { %v1601_v63 = vpop.f32.mrf.mxu0  ;;  %v1730_v0 = vpop.f32.mrf.mxu1  ;;  %2531 = vmatprep.subr.bf16.mxu0 %v5509_v50  ;;  %2660 = vmatprep.subr.bf16.mxu1 %v5509_v50 }
 0x304   : > { %v1796_v3 = vmax.f32 %v1598_v57, 0.0  ;;  %v1828_v4 = vmax.f32 %v1727_v58, 0.0  ;;  %v1888_v14 = vpack.c.bf16 %v1795_v62, %v1793_v5  ;;  %v2185_v15 = vpack.c.bf16 %v1827_v60, %v1825_v6  ;;  %v5524_v5 = vld [vmem:[#allocation5 + $0x414] ss:$8 sps:$4 sm:$0xff]  }
 0x305   : > { %v1603_v7 = vpop.f32.mrf.mxu0  ;;  %v1732_v36 = vpop.f32.mrf.mxu1  ;;  %v1602_v23 = vadd.f32 %v1601_v63, %v6502_v11  ;;  %v1731_v24 = vadd.f32 %v1730_v0, %v6502_v11 }
 0x306   : > { %v1889_v8 = vpack.c.bf16 %v1796_v3, %v1794_v1  ;;  %v2186_v12 = vpack.c.bf16 %v1828_v4, %v1826_v2  ;;  %2532 = vmatpush1.bf16.msra.mxu0 %v5507_v59  ;;  %v1604_v16 = vadd.f32 %v1603_v7, %v6497_v37  ;;  %2661 = vmatpush1.bf16.msra.mxu1 %v5507_v59 }
 0x307   : > { %v1605_v17 = vpop.f32.mrf.mxu0  ;;  %v1734_v18 = vpop.f32.mrf.mxu1  ;;  %2533 = vmatprep.subr.bf16.mxu0 %v5512_v61  ;;  %v1733_v20 = vadd.f32 %v1732_v36, %v6497_v37  ;;  %2662 = vmatprep.subr.bf16.mxu1 %v5512_v61  ;;  %v1797_v44 = vmax.f32 %v1602_v23, 0.0  ;;  %v1829_v45 = vmax.f32 %v1731_v24, 0.0  ;;  %v5519_v61 = vld [vmem:[#allocation5 + $0x420] ss:$8 sps:$4 sm:$0xff]   ;;  %v5527_v24 = vld [vmem:[#allocation5 + $0x404] ss:$8 sps:$4 sm:$0xff]  }
 0x308   : > { %v1606_v21 = vadd.f32 %v1605_v17, %v6502_v11  ;;  %v1735_v22 = vadd.f32 %v1734_v18, %v6502_v11  ;;  %2112 = vmatprep.mubr.bf16.mxu0 %v1889_v8  ;;  %2241 = vmatprep.mubr.bf16.mxu1 %v2186_v12  ;;  %v1798_v38 = vmax.f32 %v1604_v16, 0.0  ;;  %v5522_v18 = vld [vmem:[#allocation5 + $0x410] ss:$8 sps:$4 sm:$0xff]  }
 0x309   : > { %v1607_v25 = vpop.f32.mrf.mxu0  ;;  %v1736_v26 = vpop.f32.mrf.mxu1  ;;  %2113 = vmatmul.mubr.bf16.gmra.mxu0 %v1888_v14  ;;  %2242 = vmatmul.mubr.bf16.gmra.mxu1 %v2185_v15  ;;  %v1830_v39 = vmax.f32 %v1733_v20, 0.0 }
 0x30a   : > { %v1608_v27 = vadd.f32 %v1607_v25, %v6497_v37  ;;  %v1737_v28 = vadd.f32 %v1736_v26, %v6497_v37  ;;  %2534 = vmatpush1.bf16.msra.mxu0 %v5510_v13  ;;  %v1799_v30 = vmax.f32 %v1606_v21, 0.0  ;;  %v1831_v31 = vmax.f32 %v1735_v22, 0.0  ;;  %2663 = vmatpush1.bf16.msra.mxu1 %v5510_v13 }
 0x30b   : > { %v1611_v32 = vpop.f32.mrf.mxu0  ;;  %v1740_v33 = vpop.f32.mrf.mxu1  ;;  %2535 = vmatprep.subr.bf16.mxu0 %v5515_v19  ;;  %2664 = vmatprep.subr.bf16.mxu1 %v5515_v19 }
 0x30c   : > { %v1800_v42 = vmax.f32 %v1608_v27, 0.0  ;;  %v1832_v43 = vmax.f32 %v1737_v28, 0.0  ;;  %v1890_v50 = vpack.c.bf16 %v1799_v30, %v1797_v44  ;;  %v2187_v51 = vpack.c.bf16 %v1831_v31, %v1829_v45  ;;  %v5530_v44 = vld [vmem:[#allocation5 + $0x4f4] ss:$8 sps:$4 sm:$0xff]  }
 0x30d   : > { %v1613_v46 = vpop.f32.mrf.mxu0  ;;  %v1742_v47 = vpop.f32.mrf.mxu1  ;;  %v1612_v58 = vadd.f32 %v1611_v32, %v6502_v11  ;;  %v1741_v59 = vadd.f32 %v1740_v33, %v6502_v11 }
 0x30e   : > { %v1891_v48 = vpack.c.bf16 %v1800_v42, %v1798_v38  ;;  %v2188_v41 = vpack.c.bf16 %v1832_v43, %v1830_v39  ;;  %2536 = vmatpush1.bf16.msra.mxu0 %v5513_v29  ;;  %v1614_v40 = vadd.f32 %v1613_v46, %v6497_v37  ;;  %2665 = vmatpush1.bf16.msra.mxu1 %v5513_v29 }
 0x30f   : > { %v1615_v52 = vpop.f32.mrf.mxu0  ;;  %v1744_v53 = vpop.f32.mrf.mxu1  ;;  %2537 = vmatprep.subr.bf16.mxu0 %v5518_v35  ;;  %v1743_v55 = vadd.f32 %v1742_v47, %v6497_v37  ;;  %2666 = vmatprep.subr.bf16.mxu1 %v5518_v35  ;;  %v1801_v12 = vmax.f32 %v1612_v58, 0.0  ;;  %v1833_v13 = vmax.f32 %v1741_v59, 0.0  ;;  %v5525_v35 = vld [vmem:[#allocation5 + $0x400] ss:$8 sps:$4 sm:$0xff]   ;;  %v5533_v59 = vld [vmem:[#allocation5 + $0x4e4] ss:$8 sps:$4 sm:$0xff]  }
 0x310   : > { %v1616_v56 = vadd.f32 %v1615_v52, %v6502_v11  ;;  %v1745_v57 = vadd.f32 %v1744_v53, %v6502_v11  ;;  %2122 = vmatprep.mubr.bf16.mxu0 %v1891_v48  ;;  %2251 = vmatprep.mubr.bf16.mxu1 %v2188_v41  ;;  %v1802_v6 = vmax.f32 %v1614_v40, 0.0  ;;  %v5528_v53 = vld [vmem:[#allocation5 + $0x4f0] ss:$8 sps:$4 sm:$0xff]  }
 0x311   : > { %v1617_v62 = vpop.f32.mrf.mxu0  ;;  %v1746_v60 = vpop.f32.mrf.mxu1  ;;  %2123 = vmatmul.mubr.bf16.gmra.mxu0 %v1890_v50  ;;  %2252 = vmatmul.mubr.bf16.gmra.mxu1 %v2187_v51  ;;  %v1834_v7 = vmax.f32 %v1743_v55, 0.0 }
 0x312   : > { %v1618_v63 = vadd.f32 %v1617_v62, %v6497_v37  ;;  %v1747_v0 = vadd.f32 %v1746_v60, %v6497_v37  ;;  %2538 = vmatpush1.bf16.msra.mxu0 %v5516_v49  ;;  %v1803_v1 = vmax.f32 %v1616_v56, 0.0  ;;  %v1835_v2 = vmax.f32 %v1745_v57, 0.0  ;;  %2667 = vmatpush1.bf16.msra.mxu1 %v5516_v49 }
 0x313   : > { %v1621_v3 = vpop.f32.mrf.mxu0  ;;  %v1750_v4 = vpop.f32.mrf.mxu1  ;;  %2539 = vmatprep.subr.bf16.mxu0 %v5521_v54  ;;  %2668 = vmatprep.subr.bf16.mxu1 %v5521_v54 }
 0x314   : > { %v1804_v36 = vmax.f32 %v1618_v63, 0.0  ;;  %v1836_v8 = vmax.f32 %v1747_v0, 0.0  ;;  %v1892_v19 = vpack.c.bf16 %v1803_v1, %v1801_v12  ;;  %v2189_v20 = vpack.c.bf16 %v1835_v2, %v1833_v13  ;;  %v5536_v12 = vld [vmem:[#allocation5 + $0x4d4] ss:$8 sps:$4 sm:$0xff]  }
 0x315   : > { %v1623_v14 = vpop.f32.mrf.mxu0  ;;  %v1752_v15 = vpop.f32.mrf.mxu1  ;;  %v1622_v28 = vadd.f32 %v1621_v3, %v6502_v11  ;;  %v1751_v29 = vadd.f32 %v1750_v4, %v6502_v11 }
 0x316   : > { %v1893_v16 = vpack.c.bf16 %v1804_v36, %v1802_v6  ;;  %v2190_v17 = vpack.c.bf16 %v1836_v8, %v1834_v7  ;;  %2540 = vmatpush1.bf16.msra.mxu0 %v5519_v61  ;;  %v1624_v21 = vadd.f32 %v1623_v14, %v6497_v37  ;;  %2669 = vmatpush1.bf16.msra.mxu1 %v5519_v61 }
 0x317   : > { %v1625_v22 = vpop.f32.mrf.mxu0  ;;  %v1754_v23 = vpop.f32.mrf.mxu1  ;;  %2541 = vmatprep.subr.bf16.mxu0 %v5524_v5  ;;  %v1753_v25 = vadd.f32 %v1752_v15, %v6497_v37  ;;  %2670 = vmatprep.subr.bf16.mxu1 %v5524_v5  ;;  %v1805_v41 = vmax.f32 %v1622_v28, 0.0  ;;  %v1837_v49 = vmax.f32 %v1751_v29, 0.0  ;;  %v5531_v5 = vld [vmem:[#allocation5 + $0x4e0] ss:$8 sps:$4 sm:$0xff]   ;;  %v5539_v29 = vld [vmem:[#allocation5 + $0x4c4] ss:$8 sps:$4 sm:$0xff]  }
 0x318   : > { %v1626_v26 = vadd.f32 %v1625_v22, %v6502_v11  ;;  %v1755_v27 = vadd.f32 %v1754_v23, %v6502_v11  ;;  %2132 = vmatprep.mubr.bf16.mxu0 %v1893_v16  ;;  %2261 = vmatprep.mubr.bf16.mxu1 %v2190_v17  ;;  %v1806_v45 = vmax.f32 %v1624_v21, 0.0  ;;  %v5534_v23 = vld [vmem:[#allocation5 + $0x4d0] ss:$8 sps:$4 sm:$0xff]  }
 0x319   : > { %v1627_v30 = vpop.f32.mrf.mxu0  ;;  %v1756_v31 = vpop.f32.mrf.mxu1  ;;  %2133 = vmatmul.mubr.bf16.gmra.mxu0 %v1892_v19  ;;  %2262 = vmatmul.mubr.bf16.gmra.mxu1 %v2189_v20  ;;  %v1838_v46 = vmax.f32 %v1753_v25, 0.0 }
 0x31a   : > { %v1628_v32 = vadd.f32 %v1627_v30, %v6497_v37  ;;  %v1757_v33 = vadd.f32 %v1756_v31, %v6497_v37  ;;  %2542 = vmatpush1.bf16.msra.mxu0 %v5522_v18  ;;  %v1807_v38 = vmax.f32 %v1626_v26, 0.0  ;;  %v1839_v39 = vmax.f32 %v1755_v27, 0.0  ;;  %2671 = vmatpush1.bf16.msra.mxu1 %v5522_v18 }
 0x31b   : > { %v1631_v42 = vpop.f32.mrf.mxu0  ;;  %v1760_v43 = vpop.f32.mrf.mxu1  ;;  %2543 = vmatprep.subr.bf16.mxu0 %v5527_v24  ;;  %2672 = vmatprep.subr.bf16.mxu1 %v5527_v24 }
 0x31c   : > { %v1808_v47 = vmax.f32 %v1628_v32, 0.0  ;;  %v1840_v48 = vmax.f32 %v1757_v33, 0.0  ;;  %v1894_v54 = vpack.c.bf16 %v1807_v38, %v1805_v41  ;;  %v2191_v55 = vpack.c.bf16 %v1839_v39, %v1837_v49  ;;  %v5542_v41 = vld [vmem:[#allocation5 + $0x4b4] ss:$8 sps:$4 sm:$0xff]  }
 0x31d   : > { %v1633_v50 = vpop.f32.mrf.mxu0  ;;  %v1762_v51 = vpop.f32.mrf.mxu1  ;;  %v1632_v0 = vadd.f32 %v1631_v42, %v6502_v11  ;;  %v1761_v61 = vadd.f32 %v1760_v43, %v6502_v11 }
 0x31e   : > { %v1895_v40 = vpack.c.bf16 %v1808_v47, %v1806_v45  ;;  %v2192_v52 = vpack.c.bf16 %v1840_v48, %v1838_v46  ;;  %2544 = vmatpush1.bf16.msra.mxu0 %v5525_v35  ;;  %v1634_v56 = vadd.f32 %v1633_v50, %v6497_v37  ;;  %2673 = vmatpush1.bf16.msra.mxu1 %v5525_v35 }
 0x31f   : > { %v1635_v57 = vpop.f32.mrf.mxu0  ;;  %v1764_v58 = vpop.f32.mrf.mxu1  ;;  %2545 = vmatprep.subr.bf16.mxu0 %v5530_v44  ;;  %v1763_v62 = vadd.f32 %v1762_v51, %v6497_v37  ;;  %2674 = vmatprep.subr.bf16.mxu1 %v5530_v44  ;;  %v1809_v17 = vmax.f32 %v1632_v0, 0.0  ;;  %v1841_v18 = vmax.f32 %v1761_v61, 0.0  ;;  %v5537_v44 = vld [vmem:[#allocation5 + $0x4c0] ss:$8 sps:$4 sm:$0xff]   ;;  %v5545_v61 = vld [vmem:[#allocation5 + $0x4a4] ss:$8 sps:$4 sm:$0xff]  }
 0x320   : > { %v1636_v60 = vadd.f32 %v1635_v57, %v6502_v11  ;;  %v1765_v63 = vadd.f32 %v1764_v58, %v6502_v11  ;;  %2142 = vmatprep.mubr.bf16.mxu0 %v1895_v40  ;;  %2271 = vmatprep.mubr.bf16.mxu1 %v2192_v52  ;;  %v1810_v13 = vmax.f32 %v1634_v56, 0.0  ;;  %v5540_v58 = vld [vmem:[#allocation5 + $0x4b0] ss:$8 sps:$4 sm:$0xff]  }
 0x321   : > { %v1637_v1 = vpop.f32.mrf.mxu0  ;;  %v1766_v2 = vpop.f32.mrf.mxu1  ;;  %2143 = vmatmul.mubr.bf16.gmra.mxu0 %v1894_v54  ;;  %2272 = vmatmul.mubr.bf16.gmra.mxu1 %v2191_v55  ;;  %v1842_v14 = vmax.f32 %v1763_v62, 0.0 }
 0x322   : > { %v1638_v3 = vadd.f32 %v1637_v1, %v6497_v37  ;;  %v1767_v4 = vadd.f32 %v1766_v2, %v6497_v37  ;;  %2546 = vmatpush2.bf16.msra.mxu0 %v5528_v53  ;;  %v1811_v6 = vmax.f32 %v1636_v60, 0.0  ;;  %v1843_v7 = vmax.f32 %v1765_v63, 0.0  ;;  %2675 = vmatpush2.bf16.msra.mxu1 %v5528_v53 }
 0x323   : > { %v1641_v36 = vpop.f32.mrf.mxu0  ;;  %v1770_v8 = vpop.f32.mrf.mxu1  ;;  %2547 = vmatprep.subr.bf16.mxu0 %v5533_v59  ;;  %2676 = vmatprep.subr.bf16.mxu1 %v5533_v59 }
 0x324   : > { %v1812_v15 = vmax.f32 %v1638_v3, 0.0  ;;  %v1844_v16 = vmax.f32 %v1767_v4, 0.0  ;;  %v1896_v24 = vpack.c.bf16 %v1811_v6, %v1809_v17  ;;  %v2193_v25 = vpack.c.bf16 %v1843_v7, %v1841_v18 }
 0x325   : > { %v1643_v19 = vpop.f32.mrf.mxu0  ;;  %v1772_v20 = vpop.f32.mrf.mxu1  ;;  %v1642_v33 = vadd.f32 %v1641_v36, %v6502_v11  ;;  %v1771_v35 = vadd.f32 %v1770_v8, %v6502_v11 }
 0x326   : > { %v1897_v21 = vpack.c.bf16 %v1812_v15, %v1810_v13  ;;  %v2194_v22 = vpack.c.bf16 %v1844_v16, %v1842_v14  ;;  %2548 = vmatpush2.bf16.msra.mxu0 %v5531_v5  ;;  %v1644_v26 = vadd.f32 %v1643_v19, %v6497_v37  ;;  %2677 = vmatpush2.bf16.msra.mxu1 %v5531_v5 }
 0x327   : > { %v1645_v27 = vpop.f32.mrf.mxu0  ;;  %v1774_v28 = vpop.f32.mrf.mxu1  ;;  %2549 = vmatprep.subr.bf16.mxu0 %v5536_v12  ;;  %v1773_v30 = vadd.f32 %v1772_v20, %v6497_v37  ;;  %2678 = vmatprep.subr.bf16.mxu1 %v5536_v12  ;;  %v1813_v52 = vmax.f32 %v1642_v33, 0.0  ;;  %v1845_v53 = vmax.f32 %v1771_v35, 0.0  ;;  %v5543_v12 = vld [vmem:[#allocation5 + $0x4a0] ss:$8 sps:$4 sm:$0xff]  }
 0x328   : > { %v1646_v31 = vadd.f32 %v1645_v27, %v6502_v11  ;;  %v1775_v32 = vadd.f32 %v1774_v28, %v6502_v11  ;;  %2152 = vmatprep.mubr.bf16.mxu0 %v1897_v21  ;;  %2281 = vmatprep.mubr.bf16.mxu1 %v2194_v22  ;;  %v1814_v49 = vmax.f32 %v1644_v26, 0.0  ;;  %v5549_v26 = vld [vmem:[#allocation5 + $0x480] ss:$8 sps:$4 sm:$0xff]   ;;  %v5554_v27 = vld [vmem:[#allocation5 + $0x574] ss:$8 sps:$4 sm:$0xff]   ;;  %v1904_v28 = vsub.s32 3, %v6345_v34 }
 0x329   : > { %v1647_v38 = vpop.f32.mrf.mxu0  ;;  %v1776_v39 = vpop.f32.mrf.mxu1  ;;  %2153 = vmatmul.mubr.bf16.gmra.mxu0 %v1896_v24  ;;  %2282 = vmatmul.mubr.bf16.gmra.mxu1 %v2193_v25  ;;  %v1846_v50 = vmax.f32 %v1773_v30, 0.0  ;;  %v5548_v24 = vld [vmem:[#allocation5 + $0x494] ss:$8 sps:$4 sm:$0xff]   ;;  %v5551_v25 = vld [vmem:[#allocation5 + $0x484] ss:$8 sps:$4 sm:$0xff]  }
 0x32a   : > { %v1648_v42 = vadd.f32 %v1647_v38, %v6497_v37  ;;  %v1777_v43 = vadd.f32 %v1776_v39, %v6497_v37  ;;  %2550 = vmatpush2.bf16.msra.mxu0 %v5534_v23  ;;  %v1815_v45 = vmax.f32 %v1646_v31, 0.0  ;;  %v1847_v46 = vmax.f32 %v1775_v32, 0.0  ;;  %2679 = vmatpush2.bf16.msra.mxu1 %v5534_v23 }
 0x32b   : > { %v1651_v47 = vpop.f32.mrf.mxu0  ;;  %v1780_v48 = vpop.f32.mrf.mxu1  ;;  %2551 = vmatprep.subr.bf16.mxu0 %v5539_v29  ;;  %2680 = vmatprep.subr.bf16.mxu1 %v5539_v29  ;;  %v6570_v33 = vrot.slane %v6494_v9, %v1904_v28  ;;  %v6573_v35 = vrot.slane %v6499_v10, %v1904_v28 }
 0x32c   : > { %v1816_v51 = vmax.f32 %v1648_v42, 0.0  ;;  %v1848_v40 = vmax.f32 %v1777_v43, 0.0  ;;  %v1898_v59 = vpack.c.bf16 %v1815_v45, %v1813_v52  ;;  %v2195_v62 = vpack.c.bf16 %v1847_v46, %v1845_v53  ;;  %v5552_v52 = vld [vmem:[#allocation5 + $0x570] ss:$8 sps:$4 sm:$0xff]  }
 0x32d   : > { %v1653_v54 = vpop.f32.mrf.mxu0  ;;  %v1782_v55 = vpop.f32.mrf.mxu1  ;;  %v1652_v4 = vadd.f32 %v1651_v47, %v6502_v11  ;;  %v1781_v5 = vadd.f32 %v1780_v48, %v6502_v11 }
 0x32e   : > { %v1899_v56 = vpack.c.bf16 %v1816_v51, %v1814_v49  ;;  %v2196_v57 = vpack.c.bf16 %v1848_v40, %v1846_v50  ;;  %2552 = vmatpush2.bf16.msra.mxu0 %v5537_v44  ;;  %v1654_v60 = vadd.f32 %v1653_v54, %v6497_v37  ;;  %2681 = vmatpush2.bf16.msra.mxu1 %v5537_v44 }
 0x32f   : > { %v1655_v63 = vpop.f32.mrf.mxu0  ;;  %v1784_v0 = vpop.f32.mrf.mxu1  ;;  %2553 = vmatprep.subr.bf16.mxu0 %v5542_v41  ;;  %v1783_v1 = vadd.f32 %v1782_v55, %v6497_v37  ;;  %2682 = vmatprep.subr.bf16.mxu1 %v5542_v41  ;;  %v1849_v19 = vmax.f32 %v1781_v5, 0.0 }
 0x330   : > { %v1656_v2 = vadd.f32 %v1655_v63, %v6502_v11  ;;  %v1785_v3 = vadd.f32 %v1784_v0, %v6502_v11  ;;  %2162 = vmatprep.mubr.bf16.mxu0 %v1899_v56  ;;  %2291 = vmatprep.mubr.bf16.mxu1 %v2196_v57  ;;  %v1818_v15 = vmax.f32 %v1654_v60, 0.0  ;;  %v1817_v11 = vmax.f32 %v1652_v4, 0.0  ;;  %v5557_v57 = vld [vmem:[#allocation5 + $0x564] ss:$8 sps:$4 sm:$0xff]  }
 0x331   : > { %v1657_v6 = vpop.f32.mrf.mxu0  ;;  %v1786_v7 = vpop.f32.mrf.mxu1  ;;  %2163 = vmatmul.mubr.bf16.gmra.mxu0 %v1898_v59  ;;  %2292 = vmatmul.mubr.bf16.gmra.mxu1 %v2195_v62  ;;  %v1850_v16 = vmax.f32 %v1783_v1, 0.0  ;;  %v5555_v62 = vld [vmem:[#allocation5 + $0x560] ss:$8 sps:$4 sm:$0xff]   ;;  %v5560_v1 = vld [vmem:[#allocation5 + $0x554] ss:$8 sps:$4 sm:$0xff]  }
 0x332   : > { %v1658_v36 = vadd.f32 %v1657_v6, %v6497_v37  ;;  %v1787_v8 = vadd.f32 %v1786_v7, %v6497_v37  ;;  %2554 = vmatpush2.bf16.msra.mxu0 %v5540_v58  ;;  %v1819_v13 = vmax.f32 %v1656_v2, 0.0  ;;  %v1851_v14 = vmax.f32 %v1785_v3, 0.0  ;;  %2683 = vmatpush2.bf16.msra.mxu1 %v5540_v58  ;;  %v5546_v37 = vld [vmem:[#allocation5 + $0x490] ss:$8 sps:$4 sm:$0xff]  }
 0x333   : > { %2555 = vmatprep.subr.bf16.mxu0 %v5545_v61  ;;  %2684 = vmatprep.subr.bf16.mxu1 %v5545_v61 }
 0x334   : > { %v1820_v17 = vmax.f32 %v1658_v36, 0.0  ;;  %v1852_v18 = vmax.f32 %v1787_v8, 0.0  ;;  %v1900_v22 = vpack.c.bf16 %v1819_v13, %v1817_v11  ;;  %v2197_v23 = vpack.c.bf16 %v1851_v14, %v1849_v19  ;;  %v5558_v14 = vld [vmem:[#allocation5 + $0x550] ss:$8 sps:$4 sm:$0xff]   ;;  %v5563_v11 = vld [vmem:[#allocation5 + $0x544] ss:$8 sps:$4 sm:$0xff]  }
 0x336   : > { %v1901_v20 = vpack.c.bf16 %v1820_v17, %v1818_v15  ;;  %v2198_v21 = vpack.c.bf16 %v1852_v18, %v1850_v16  ;;  %2556 = vmatpush2.bf16.msra.mxu0 %v5543_v12  ;;  %2685 = vmatpush2.bf16.msra.mxu1 %v5543_v12 }
 0x337   : > { %2557 = vmatprep.subr.bf16.mxu0 %v5548_v24  ;;  %2686 = vmatprep.subr.bf16.mxu1 %v5548_v24 }
 0x338   : > { %2172 = vmatprep.mubr.bf16.mxu0 %v1901_v20  ;;  %2301 = vmatprep.mubr.bf16.mxu1 %v2198_v21  ;;  %v5561_v21 = vld [vmem:[#allocation5 + $0x540] ss:$8 sps:$4 sm:$0xff]  }
 0x339   : > { %2173 = vmatmul.mubr.bf16.gmra.mxu0 %v1900_v22  ;;  %2302 = vmatmul.mubr.bf16.gmra.mxu1 %v2197_v23 }
 0x33a   : > { %2558 = vmatpush2.bf16.msra.mxu0 %v5546_v37  ;;  %2687 = vmatpush2.bf16.msra.mxu1 %v5546_v37 }
 0x33b   : > { %2559 = vmatprep.subr.bf16.mxu0 %v5551_v25  ;;  %2688 = vmatprep.subr.bf16.mxu1 %v5551_v25  ;;  %v5566_v25 = vld [vmem:[#allocation5 + $0x534] ss:$8 sps:$4 sm:$0xff]  }
 0x33e   : > { %2560 = vmatpush2.bf16.msra.mxu0 %v5549_v26  ;;  %2689 = vmatpush2.bf16.msra.mxu1 %v5549_v26 }
 0x33f   : > { %3052 = vmatprep.subr.bf16.mxu0 %v5554_v27  ;;  %3181 = vmatprep.subr.bf16.mxu1 %v5554_v27 }
 0x3c1   : > { %v2104_v29 = vpop.f32.mrf.mxu0  ;;  %v2233_v30 = vpop.f32.mrf.mxu1 }
 0x3c2   : > { %v2105_v41 = vadd.f32 %v2104_v29, %v6573_v35  ;;  %v2234_v10 = vadd.f32 %v2233_v30, %v6573_v35 }
 0x3c3   : > { %v2106_v31 = vpop.f32.mrf.mxu0  ;;  %v2235_v32 = vpop.f32.mrf.mxu1 }
 0x3c4   : > { %v2107_v46 = vadd.f32 %v2106_v31, %v6570_v33  ;;  %v2236_v47 = vadd.f32 %v2235_v32, %v6570_v33 }
 0x3c5   : > { %v2108_v38 = vpop.f32.mrf.mxu0  ;;  %v2237_v39 = vpop.f32.mrf.mxu1 }
 0x3c6   : > { %v2109_v42 = vadd.f32 %v2108_v38, %v6573_v35  ;;  %v2238_v43 = vadd.f32 %v2237_v39, %v6573_v35 }
 0x3c7   : > { %v2110_v44 = vpop.f32.mrf.mxu0  ;;  %v2239_v45 = vpop.f32.mrf.mxu1 }
 0x3c8   : > { %v2111_v48 = vadd.f32 %v2110_v44, %v6570_v33  ;;  %v2240_v9 = vadd.f32 %v2239_v45, %v6570_v33  ;;  %v2345_v53 = vpack.c.bf16 %v2109_v42, %v2105_v41  ;;  %v2642_v54 = vpack.c.bf16 %v2238_v43, %v2234_v10  ;;  %v5564_v43 = vld [vmem:[#allocation5 + $0x530] ss:$8 sps:$4 sm:$0xff]   ;;  %v5567_v10 = vld [vmem:[#allocation5 + $0x520] ss:$8 sps:$4 sm:$0xff]  }
 0x3c9   : > { %v2114_v49 = vpop.f32.mrf.mxu0  ;;  %v2243_v50 = vpop.f32.mrf.mxu1 }
 0x3ca   : > { %v2346_v51 = vpack.c.bf16 %v2111_v48, %v2107_v46  ;;  %v2643_v40 = vpack.c.bf16 %v2240_v9, %v2236_v47  ;;  %v2115_v6 = vadd.f32 %v2114_v49, %v6573_v35  ;;  %v2244_v7 = vadd.f32 %v2243_v50, %v6573_v35  ;;  %v5569_v48 = vld [vmem:[#allocation5 + $0x524] ss:$8 sps:$4 sm:$0xff]  }
 0x3cb   : > { %v2116_v55 = vpop.f32.mrf.mxu0  ;;  %v2245_v56 = vpop.f32.mrf.mxu1 }
 0x3cc   : > { %2561 = vmatprep.mubr.bf16.mxu0 %v2346_v51  ;;  %2690 = vmatprep.mubr.bf16.mxu1 %v2643_v40  ;;  %v2117_v2 = vadd.f32 %v2116_v55, %v6570_v33  ;;  %v2246_v3 = vadd.f32 %v2245_v56, %v6570_v33 }
 0x3cd   : > { %v2118_v58 = vpop.f32.mrf.mxu0  ;;  %v2247_v59 = vpop.f32.mrf.mxu1  ;;  %2562 = vmatmul.mubr.bf16.vlgmr.msra.gmra.mxu0 %v2345_v53  ;;  %2691 = vmatmul.mubr.bf16.vlgmr.msra.gmra.mxu1 %v2642_v54 }
 0x3ce   : > { %3053 = vmatpush1.bf16.msra.mxu0 %v5552_v52  ;;  %3182 = vmatpush1.bf16.msra.mxu1 %v5552_v52  ;;  %v2119_v60 = vadd.f32 %v2118_v58, %v6573_v35  ;;  %v2248_v63 = vadd.f32 %v2247_v59, %v6573_v35  ;;  %v5572_v52 = vld [vmem:[#allocation5 + $0x514] ss:$8 sps:$4 sm:$0xff]  }
 0x3cf   : > { %v2120_v0 = vpop.f32.mrf.mxu0  ;;  %v2249_v61 = vpop.f32.mrf.mxu1  ;;  %3054 = vmatprep.subr.bf16.mxu0 %v5557_v57  ;;  %3183 = vmatprep.subr.bf16.mxu1 %v5557_v57 }
 0x3d0   : > { %v2121_v4 = vadd.f32 %v2120_v0, %v6570_v33  ;;  %v2250_v5 = vadd.f32 %v2249_v61, %v6570_v33  ;;  %v2347_v15 = vpack.c.bf16 %v2119_v60, %v2115_v6  ;;  %v2644_v16 = vpack.c.bf16 %v2248_v63, %v2244_v7  ;;  %v5570_v0 = vld [vmem:[#allocation5 + $0x510] ss:$8 sps:$4 sm:$0xff]   ;;  %v5573_v7 = vld [vmem:[#allocation5 + $0x500] ss:$8 sps:$4 sm:$0xff]  }
 0x3d1   : > { %v2124_v36 = vpop.f32.mrf.mxu0  ;;  %v2253_v8 = vpop.f32.mrf.mxu1 }
 0x3d2   : > { %v2348_v12 = vpack.c.bf16 %v2121_v4, %v2117_v2  ;;  %v2645_v13 = vpack.c.bf16 %v2250_v5, %v2246_v3  ;;  %3055 = vmatpush1.bf16.msra.mxu0 %v5555_v62  ;;  %3184 = vmatpush1.bf16.msra.mxu1 %v5555_v62  ;;  %v2125_v30 = vadd.f32 %v2124_v36, %v6573_v35  ;;  %v5575_v4 = vld [vmem:[#allocation5 + $0x504] ss:$8 sps:$4 sm:$0xff]  }
 0x3d3   : > { %v2126_v17 = vpop.f32.mrf.mxu0  ;;  %v2255_v18 = vpop.f32.mrf.mxu1  ;;  %3056 = vmatprep.subr.bf16.mxu0 %v5560_v1  ;;  %3185 = vmatprep.subr.bf16.mxu1 %v5560_v1  ;;  %v2254_v31 = vadd.f32 %v2253_v8, %v6573_v35 }
 0x3d4   : > { %2571 = vmatprep.mubr.bf16.mxu0 %v2348_v12  ;;  %2700 = vmatprep.mubr.bf16.mxu1 %v2645_v13  ;;  %v2127_v26 = vadd.f32 %v2126_v17, %v6570_v33  ;;  %v2256_v27 = vadd.f32 %v2255_v18, %v6570_v33 }
 0x3d5   : > { %v2128_v19 = vpop.f32.mrf.mxu0  ;;  %v2257_v20 = vpop.f32.mrf.mxu1  ;;  %2572 = vmatmul.mubr.bf16.gmra.mxu0 %v2347_v15  ;;  %2701 = vmatmul.mubr.bf16.gmra.mxu1 %v2644_v16 }
 0x3d6   : > { %3057 = vmatpush1.bf16.msra.mxu0 %v5558_v14  ;;  %v2129_v22 = vadd.f32 %v2128_v19, %v6573_v35  ;;  %v2258_v23 = vadd.f32 %v2257_v20, %v6573_v35  ;;  %3186 = vmatpush1.bf16.msra.mxu1 %v5558_v14  ;;  %v5578_v14 = vld [vmem:[#allocation5 + $0x5f4] ss:$8 sps:$4 sm:$0xff]  }
 0x3d7   : > { %v2130_v37 = vpop.f32.mrf.mxu0  ;;  %v2259_v24 = vpop.f32.mrf.mxu1  ;;  %3058 = vmatprep.subr.bf16.mxu0 %v5563_v11  ;;  %3187 = vmatprep.subr.bf16.mxu1 %v5563_v11 }
 0x3d8   : > { %v2131_v28 = vadd.f32 %v2130_v37, %v6570_v33  ;;  %v2260_v29 = vadd.f32 %v2259_v24, %v6570_v33  ;;  %v2349_v44 = vpack.c.bf16 %v2129_v22, %v2125_v30  ;;  %v2646_v45 = vpack.c.bf16 %v2258_v23, %v2254_v31  ;;  %v5576_v37 = vld [vmem:[#allocation5 + $0x5f0] ss:$8 sps:$4 sm:$0xff]   ;;  %v5579_v31 = vld [vmem:[#allocation5 + $0x5e0] ss:$8 sps:$4 sm:$0xff]  }
 0x3d9   : > { %v2134_v32 = vpop.f32.mrf.mxu0  ;;  %v2263_v38 = vpop.f32.mrf.mxu1 }
 0x3da   : > { %v2350_v39 = vpack.c.bf16 %v2131_v28, %v2127_v26  ;;  %v2647_v42 = vpack.c.bf16 %v2260_v29, %v2256_v27  ;;  %3059 = vmatpush1.bf16.msra.mxu0 %v5561_v21  ;;  %3188 = vmatpush1.bf16.msra.mxu1 %v5561_v21  ;;  %v2135_v57 = vadd.f32 %v2134_v32, %v6573_v35  ;;  %v5581_v28 = vld [vmem:[#allocation5 + $0x5e4] ss:$8 sps:$4 sm:$0xff]  }
 0x3db   : > { %v2136_v46 = vpop.f32.mrf.mxu0  ;;  %v2265_v47 = vpop.f32.mrf.mxu1  ;;  %3060 = vmatprep.subr.bf16.mxu0 %v5566_v25  ;;  %3189 = vmatprep.subr.bf16.mxu1 %v5566_v25  ;;  %v2264_v58 = vadd.f32 %v2263_v38, %v6573_v35 }
 0x3dc   : > { %2581 = vmatprep.mubr.bf16.mxu0 %v2350_v39  ;;  %2710 = vmatprep.mubr.bf16.mxu1 %v2647_v42  ;;  %v2137_v53 = vadd.f32 %v2136_v46, %v6570_v33  ;;  %v2266_v54 = vadd.f32 %v2265_v47, %v6570_v33 }
 0x3dd   : > { %v2138_v9 = vpop.f32.mrf.mxu0  ;;  %v2267_v41 = vpop.f32.mrf.mxu1  ;;  %2582 = vmatmul.mubr.bf16.gmra.mxu0 %v2349_v44  ;;  %2711 = vmatmul.mubr.bf16.gmra.mxu1 %v2646_v45 }
 0x3de   : > { %3061 = vmatpush1.bf16.msra.mxu0 %v5564_v43  ;;  %v2139_v49 = vadd.f32 %v2138_v9, %v6573_v35  ;;  %v2268_v50 = vadd.f32 %v2267_v41, %v6573_v35  ;;  %3190 = vmatpush1.bf16.msra.mxu1 %v5564_v43  ;;  %v5584_v43 = vld [vmem:[#allocation5 + $0x5d4] ss:$8 sps:$4 sm:$0xff]  }
 0x3df   : > { %v2140_v51 = vpop.f32.mrf.mxu0  ;;  %v2269_v40 = vpop.f32.mrf.mxu1  ;;  %3062 = vmatprep.subr.bf16.mxu0 %v5569_v48  ;;  %3191 = vmatprep.subr.bf16.mxu1 %v5569_v48 }
 0x3e0   : > { %v2141_v55 = vadd.f32 %v2140_v51, %v6570_v33  ;;  %v2270_v56 = vadd.f32 %v2269_v40, %v6570_v33  ;;  %v2351_v61 = vpack.c.bf16 %v2139_v49, %v2135_v57  ;;  %v2648_v1 = vpack.c.bf16 %v2268_v50, %v2264_v58  ;;  %v5582_v51 = vld [vmem:[#allocation5 + $0x5d0] ss:$8 sps:$4 sm:$0xff]   ;;  %v5585_v58 = vld [vmem:[#allocation5 + $0x5c0] ss:$8 sps:$4 sm:$0xff]  }
 0x3e1   : > { %v2144_v59 = vpop.f32.mrf.mxu0  ;;  %v2273_v62 = vpop.f32.mrf.mxu1 }
 0x3e2   : > { %v2352_v60 = vpack.c.bf16 %v2141_v55, %v2137_v53  ;;  %v2649_v63 = vpack.c.bf16 %v2270_v56, %v2266_v54  ;;  %3063 = vmatpush1.bf16.msra.mxu0 %v5567_v10  ;;  %3192 = vmatpush1.bf16.msra.mxu1 %v5567_v10  ;;  %v2145_v11 = vadd.f32 %v2144_v59, %v6573_v35  ;;  %v5587_v55 = vld [vmem:[#allocation5 + $0x5c4] ss:$8 sps:$4 sm:$0xff]  }
 0x3e3   : > { %v2146_v2 = vpop.f32.mrf.mxu0  ;;  %v2275_v3 = vpop.f32.mrf.mxu1  ;;  %3064 = vmatprep.subr.bf16.mxu0 %v5572_v52  ;;  %3193 = vmatprep.subr.bf16.mxu1 %v5572_v52  ;;  %v2274_v19 = vadd.f32 %v2273_v62, %v6573_v35 }
 0x3e4   : > { %2591 = vmatprep.mubr.bf16.mxu0 %v2352_v60  ;;  %2720 = vmatprep.mubr.bf16.mxu1 %v2649_v63  ;;  %v2147_v15 = vadd.f32 %v2146_v2, %v6570_v33  ;;  %v2276_v16 = vadd.f32 %v2275_v3, %v6570_v33 }
 0x3e5   : > { %v2148_v5 = vpop.f32.mrf.mxu0  ;;  %v2277_v6 = vpop.f32.mrf.mxu1  ;;  %2592 = vmatmul.mubr.bf16.gmra.mxu0 %v2351_v61  ;;  %2721 = vmatmul.mubr.bf16.gmra.mxu1 %v2648_v1 }
 0x3e6   : > { %3065 = vmatpush1.bf16.msra.mxu0 %v5570_v0  ;;  %v2149_v36 = vadd.f32 %v2148_v5, %v6573_v35  ;;  %v2278_v8 = vadd.f32 %v2277_v6, %v6573_v35  ;;  %3194 = vmatpush1.bf16.msra.mxu1 %v5570_v0  ;;  %v5590_v0 = vld [vmem:[#allocation5 + $0x5b4] ss:$8 sps:$4 sm:$0xff]  }
 0x3e7   : > { %v2150_v12 = vpop.f32.mrf.mxu0  ;;  %v2279_v13 = vpop.f32.mrf.mxu1  ;;  %3066 = vmatprep.subr.bf16.mxu0 %v5575_v4  ;;  %3195 = vmatprep.subr.bf16.mxu1 %v5575_v4 }
 0x3e8   : > { %v2151_v17 = vadd.f32 %v2150_v12, %v6570_v33  ;;  %v2280_v18 = vadd.f32 %v2279_v13, %v6570_v33  ;;  %v2353_v24 = vpack.c.bf16 %v2149_v36, %v2145_v11  ;;  %v2650_v25 = vpack.c.bf16 %v2278_v8, %v2274_v19  ;;  %v5588_v12 = vld [vmem:[#allocation5 + $0x5b0] ss:$8 sps:$4 sm:$0xff]  }
 0x3e9   : > { %v2154_v20 = vpop.f32.mrf.mxu0  ;;  %v2283_v21 = vpop.f32.mrf.mxu1 }
 0x3ea   : > { %v2354_v22 = vpack.c.bf16 %v2151_v17, %v2147_v15  ;;  %v2651_v23 = vpack.c.bf16 %v2280_v18, %v2276_v16  ;;  %3067 = vmatpush1.bf16.msra.mxu0 %v5573_v7  ;;  %3196 = vmatpush1.bf16.msra.mxu1 %v5573_v7  ;;  %v2155_v48 = vadd.f32 %v2154_v20, %v6573_v35 }
 0x3eb   : > { %v2156_v26 = vpop.f32.mrf.mxu0  ;;  %v2285_v27 = vpop.f32.mrf.mxu1  ;;  %3068 = vmatprep.subr.bf16.mxu0 %v5578_v14  ;;  %3197 = vmatprep.subr.bf16.mxu1 %v5578_v14  ;;  %v2284_v9 = vadd.f32 %v2283_v21, %v6573_v35 }
 0x3ec   : > { %2601 = vmatprep.mubr.bf16.mxu0 %v2354_v22  ;;  %2730 = vmatprep.mubr.bf16.mxu1 %v2651_v23  ;;  %v2157_v44 = vadd.f32 %v2156_v26, %v6570_v33  ;;  %v2286_v45 = vadd.f32 %v2285_v27, %v6570_v33 }
 0x3ed   : > { %v2158_v29 = vpop.f32.mrf.mxu0  ;;  %v2287_v30 = vpop.f32.mrf.mxu1  ;;  %2602 = vmatmul.mubr.bf16.gmra.mxu0 %v2353_v24  ;;  %2731 = vmatmul.mubr.bf16.gmra.mxu1 %v2650_v25 }
 0x3ee   : > { %3069 = vmatpush2.bf16.msra.mxu0 %v5576_v37  ;;  %v2159_v32 = vadd.f32 %v2158_v29, %v6573_v35  ;;  %v2288_v38 = vadd.f32 %v2287_v30, %v6573_v35  ;;  %3198 = vmatpush2.bf16.msra.mxu1 %v5576_v37 }
 0x3ef   : > { %v2160_v39 = vpop.f32.mrf.mxu0  ;;  %v2289_v42 = vpop.f32.mrf.mxu1  ;;  %3070 = vmatprep.subr.bf16.mxu0 %v5581_v28  ;;  %3199 = vmatprep.subr.bf16.mxu1 %v5581_v28 }
 0x3f0   : > { %v2161_v46 = vadd.f32 %v2160_v39, %v6570_v33  ;;  %v2290_v47 = vadd.f32 %v2289_v42, %v6570_v33  ;;  %v2355_v40 = vpack.c.bf16 %v2159_v32, %v2155_v48  ;;  %v2652_v52 = vpack.c.bf16 %v2288_v38, %v2284_v9  ;;  %v5591_v32 = vld [vmem:[#allocation5 + $0x5a0] ss:$8 sps:$4 sm:$0xff]   ;;  %v5596_v38 = vld [vmem:[#allocation5 + $0x594] ss:$8 sps:$4 sm:$0xff]  }
 0x3f1   : > { %v2164_v41 = vpop.f32.mrf.mxu0  ;;  %v2293_v10 = vpop.f32.mrf.mxu1  ;;  %v5597_v39 = vld [vmem:[#allocation5 + $0x580] ss:$8 sps:$4 sm:$0xff]   ;;  %v5602_v42 = vld [vmem:[#allocation5 + $0x674] ss:$8 sps:$4 sm:$0xff]  }
 0x3f2   : > { %v2356_v49 = vpack.c.bf16 %v2161_v46, %v2157_v44  ;;  %v2653_v50 = vpack.c.bf16 %v2290_v47, %v2286_v45  ;;  %3071 = vmatpush2.bf16.msra.mxu0 %v5579_v31  ;;  %3200 = vmatpush2.bf16.msra.mxu1 %v5579_v31  ;;  %v2165_v4 = vadd.f32 %v2164_v41, %v6573_v35  ;;  %v5593_v31 = vld [vmem:[#allocation5 + $0x5a4] ss:$8 sps:$4 sm:$0xff]  }
 0x3f3   : > { %v2166_v53 = vpop.f32.mrf.mxu0  ;;  %v2295_v54 = vpop.f32.mrf.mxu1  ;;  %3072 = vmatprep.subr.bf16.mxu0 %v5584_v43  ;;  %3201 = vmatprep.subr.bf16.mxu1 %v5584_v43  ;;  %v2294_v5 = vadd.f32 %v2293_v10, %v6573_v35  ;;  %v2363_v43 = vsub.s32 4, %v6345_v34  ;;  %v6640_v46 = vld [vmem:[#allocation7 + $0x8] sm:$0xff]  ;;  %v6645_v48 = vld [vmem:[#allocation7] sm:$0xff] }
 0x3f4   : > { %2611 = vmatprep.mubr.bf16.mxu0 %v2356_v49  ;;  %2740 = vmatprep.mubr.bf16.mxu1 %v2653_v50  ;;  %v2167_v61 = vadd.f32 %v2166_v53, %v6570_v33  ;;  %v2296_v1 = vadd.f32 %v2295_v54, %v6570_v33 }
 0x3f5   : > { %v2168_v56 = vpop.f32.mrf.mxu0  ;;  %v2297_v57 = vpop.f32.mrf.mxu1  ;;  %2612 = vmatmul.mubr.bf16.gmra.mxu0 %v2355_v40  ;;  %2741 = vmatmul.mubr.bf16.gmra.mxu1 %v2652_v52  ;;  %v6643_v47 = vrot.slane %v6640_v46, %v2363_v43  ;;  %v6648_v9 = vrot.slane %v6645_v48, %v2363_v43 }
 0x3f6   : > { %3073 = vmatpush2.bf16.msra.mxu0 %v5582_v51  ;;  %v2169_v59 = vadd.f32 %v2168_v56, %v6573_v35  ;;  %v2298_v62 = vadd.f32 %v2297_v57, %v6573_v35  ;;  %3202 = vmatpush2.bf16.msra.mxu1 %v5582_v51 }
 0x3f7   : > { %v2170_v60 = vpop.f32.mrf.mxu0  ;;  %v2299_v63 = vpop.f32.mrf.mxu1  ;;  %3074 = vmatprep.subr.bf16.mxu0 %v5587_v55  ;;  %3203 = vmatprep.subr.bf16.mxu1 %v5587_v55 }
 0x3f8   : > { %v2171_v2 = vadd.f32 %v2170_v60, %v6570_v33  ;;  %v2300_v3 = vadd.f32 %v2299_v63, %v6570_v33  ;;  %v2357_v13 = vpack.c.bf16 %v2169_v59, %v2165_v4  ;;  %v2654_v14 = vpack.c.bf16 %v2298_v62, %v2294_v5 }
 0x3f9   : > { %v2174_v6 = vpop.f32.mrf.mxu0  ;;  %v2303_v7 = vpop.f32.mrf.mxu1 }
 0x3fa   : > { %v2358_v36 = vpack.c.bf16 %v2171_v2, %v2167_v61  ;;  %v2655_v8 = vpack.c.bf16 %v2300_v3, %v2296_v1  ;;  %3075 = vmatpush2.bf16.msra.mxu0 %v5585_v58  ;;  %3204 = vmatpush2.bf16.msra.mxu1 %v5585_v58  ;;  %v2175_v25 = vadd.f32 %v2174_v6, %v6573_v35 }
 0x3fb   : > { %v2176_v15 = vpop.f32.mrf.mxu0  ;;  %v2305_v16 = vpop.f32.mrf.mxu1  ;;  %3076 = vmatprep.subr.bf16.mxu0 %v5590_v0  ;;  %3205 = vmatprep.subr.bf16.mxu1 %v5590_v0  ;;  %v2304_v26 = vadd.f32 %v2303_v7, %v6573_v35 }
 0x3fc   : > { %2621 = vmatprep.mubr.bf16.mxu0 %v2358_v36  ;;  %2750 = vmatprep.mubr.bf16.mxu1 %v2655_v8  ;;  %v2177_v22 = vadd.f32 %v2176_v15, %v6570_v33  ;;  %v2306_v23 = vadd.f32 %v2305_v16, %v6570_v33 }
 0x3fd   : > { %v2178_v17 = vpop.f32.mrf.mxu0  ;;  %v2307_v18 = vpop.f32.mrf.mxu1  ;;  %2622 = vmatmul.mubr.bf16.gmra.mxu0 %v2357_v13  ;;  %2751 = vmatmul.mubr.bf16.gmra.mxu1 %v2654_v14 }
 0x3fe   : > { %3077 = vmatpush2.bf16.msra.mxu0 %v5588_v12  ;;  %v2179_v11 = vadd.f32 %v2178_v17, %v6573_v35  ;;  %v2308_v19 = vadd.f32 %v2307_v18, %v6573_v35  ;;  %3206 = vmatpush2.bf16.msra.mxu1 %v5588_v12  ;;  %v5599_v35 = vld [vmem:[#allocation5 + $0x584] ss:$8 sps:$4 sm:$0xff]   ;;  %v5600_v12 = vld [vmem:[#allocation5 + $0x670] ss:$8 sps:$4 sm:$0xff]  }
 0x3ff   : > { %v2180_v20 = vpop.f32.mrf.mxu0  ;;  %v2309_v21 = vpop.f32.mrf.mxu1  ;;  %3078 = vmatprep.subr.bf16.mxu0 %v5593_v31  ;;  %3207 = vmatprep.subr.bf16.mxu1 %v5593_v31  ;;  %v5605_v18 = vld [vmem:[#allocation5 + $0x664] ss:$8 sps:$4 sm:$0xff]   ;;  %v5608_v31 = vld [vmem:[#allocation5 + $0x654] ss:$8 sps:$4 sm:$0xff]  }
 0x400   : > { %v2181_v37 = vadd.f32 %v2180_v20, %v6570_v33  ;;  %v2310_v24 = vadd.f32 %v2309_v21, %v6570_v33  ;;  %v2359_v29 = vpack.c.bf16 %v2179_v11, %v2175_v25  ;;  %v2656_v30 = vpack.c.bf16 %v2308_v19, %v2304_v26  ;;  %v5594_v33 = vld [vmem:[#allocation5 + $0x590] ss:$8 sps:$4 sm:$0xff]   ;;  %v5603_v26 = vld [vmem:[#allocation5 + $0x660] ss:$8 sps:$4 sm:$0xff]  }
 0x402   : > { %v2360_v27 = vpack.c.bf16 %v2181_v37, %v2177_v22  ;;  %v2657_v28 = vpack.c.bf16 %v2310_v24, %v2306_v23  ;;  %3079 = vmatpush2.bf16.msra.mxu0 %v5591_v32  ;;  %3208 = vmatpush2.bf16.msra.mxu1 %v5591_v32 }
 0x403   : > { %3080 = vmatprep.subr.bf16.mxu0 %v5596_v38  ;;  %3209 = vmatprep.subr.bf16.mxu1 %v5596_v38 }
 0x404   : > { %2631 = vmatprep.mubr.bf16.mxu0 %v2360_v27  ;;  %2760 = vmatprep.mubr.bf16.mxu1 %v2657_v28 }
 0x405   : > { %2632 = vmatmul.mubr.bf16.gmra.mxu0 %v2359_v29  ;;  %2761 = vmatmul.mubr.bf16.gmra.mxu1 %v2656_v30 }
 0x406   : > { %3081 = vmatpush2.bf16.msra.mxu0 %v5594_v33  ;;  %3210 = vmatpush2.bf16.msra.mxu1 %v5594_v33 }
 0x407   : > { %3082 = vmatprep.subr.bf16.mxu0 %v5599_v35  ;;  %3211 = vmatprep.subr.bf16.mxu1 %v5599_v35 }
 0x40a   : > { %3083 = vmatpush2.bf16.msra.mxu0 %v5597_v39  ;;  %3212 = vmatpush2.bf16.msra.mxu1 %v5597_v39 }
 0x40b   : > { %3575 = vmatprep.subr.bf16.mxu0 %v5602_v42  ;;  %3704 = vmatprep.subr.bf16.mxu1 %v5602_v42 }
 0x48d   : > { %v2563_v44 = vpop.f32.mrf.mxu0  ;;  %v2692_v45 = vpop.f32.mrf.mxu1 }
 0x48e   : > { %v2564_v54 = vadd.f32 %v2563_v44, %v6648_v9  ;;  %v2693_v55 = vadd.f32 %v2692_v45, %v6648_v9 }
 0x48f   : > { %v2565_v41 = vpop.f32.mrf.mxu0  ;;  %v2694_v10 = vpop.f32.mrf.mxu1 }
 0x490   : > { %v2566_v51 = vadd.f32 %v2565_v41, %v6643_v47  ;;  %v2695_v40 = vadd.f32 %v2694_v10, %v6643_v47  ;;  %v2771_v4 = vmax.f32 %v2564_v54, 0.0  ;;  %v2803_v5 = vmax.f32 %v2693_v55, 0.0  ;;  %v5606_v10 = vld [vmem:[#allocation5 + $0x650] ss:$8 sps:$4 sm:$0xff]  }
 0x491   : > { %v2567_v49 = vpop.f32.mrf.mxu0  ;;  %v2696_v50 = vpop.f32.mrf.mxu1 }
 0x492   : > { %v2568_v52 = vadd.f32 %v2567_v49, %v6648_v9  ;;  %v2697_v53 = vadd.f32 %v2696_v50, %v6648_v9  ;;  %v2772_v61 = vmax.f32 %v2566_v51, 0.0  ;;  %v2804_v1 = vmax.f32 %v2695_v40, 0.0 }
 0x493   : > { %v2569_v56 = vpop.f32.mrf.mxu0  ;;  %v2698_v57 = vpop.f32.mrf.mxu1 }
 0x494   : > { %v2570_v58 = vadd.f32 %v2569_v56, %v6643_v47  ;;  %v2699_v59 = vadd.f32 %v2698_v57, %v6643_v47  ;;  %v2773_v62 = vmax.f32 %v2568_v52, 0.0  ;;  %v2805_v60 = vmax.f32 %v2697_v53, 0.0  ;;  %v5611_v53 = vld [vmem:[#allocation5 + $0x644] ss:$8 sps:$4 sm:$0xff]  }
 0x495   : > { %v2573_v63 = vpop.f32.mrf.mxu0  ;;  %v2702_v0 = vpop.f32.mrf.mxu1 }
 0x496   : > { %v2774_v2 = vmax.f32 %v2570_v58, 0.0  ;;  %v2806_v3 = vmax.f32 %v2699_v59, 0.0  ;;  %v2868_v13 = vpack.c.bf16 %v2773_v62, %v2771_v4  ;;  %v3165_v14 = vpack.c.bf16 %v2805_v60, %v2803_v5  ;;  %v5614_v4 = vld [vmem:[#allocation5 + $0x634] ss:$8 sps:$4 sm:$0xff]  }
 0x497   : > { %v2575_v6 = vpop.f32.mrf.mxu0  ;;  %v2704_v7 = vpop.f32.mrf.mxu1  ;;  %v2574_v21 = vadd.f32 %v2573_v63, %v6648_v9  ;;  %v2703_v22 = vadd.f32 %v2702_v0, %v6648_v9  ;;  %v5609_v0 = vld [vmem:[#allocation5 + $0x640] ss:$8 sps:$4 sm:$0xff]  }
 0x498   : > { %v2869_v36 = vpack.c.bf16 %v2774_v2, %v2772_v61  ;;  %v3166_v8 = vpack.c.bf16 %v2806_v3, %v2804_v1  ;;  %v2576_v15 = vadd.f32 %v2575_v6, %v6643_v47  ;;  %v2705_v11 = vadd.f32 %v2704_v7, %v6643_v47 }
 0x499   : > { %v2577_v16 = vpop.f32.mrf.mxu0  ;;  %v2706_v17 = vpop.f32.mrf.mxu1  ;;  %v2775_v39 = vmax.f32 %v2574_v21, 0.0  ;;  %v2807_v42 = vmax.f32 %v2703_v22, 0.0  ;;  %v5617_v22 = vld [vmem:[#allocation5 + $0x624] ss:$8 sps:$4 sm:$0xff]  }
 0x49a   : > { %v2578_v19 = vadd.f32 %v2577_v16, %v6648_v9  ;;  %v2707_v20 = vadd.f32 %v2706_v17, %v6648_v9  ;;  %3084 = vmatprep.mubr.bf16.mxu0 %v2869_v36  ;;  %3213 = vmatprep.mubr.bf16.mxu1 %v3166_v8  ;;  %v2776_v32 = vmax.f32 %v2576_v15, 0.0  ;;  %v2808_v38 = vmax.f32 %v2705_v11, 0.0  ;;  %v5612_v17 = vld [vmem:[#allocation5 + $0x630] ss:$8 sps:$4 sm:$0xff]  }
 0x49b   : > { %v2579_v23 = vpop.f32.mrf.mxu0  ;;  %v2708_v37 = vpop.f32.mrf.mxu1  ;;  %3085 = vmatmul.mubr.bf16.vlgmr.msra.gmra.mxu0 %v2868_v13  ;;  %3214 = vmatmul.mubr.bf16.vlgmr.msra.gmra.mxu1 %v3165_v14 }
 0x49c   : > { %v2580_v24 = vadd.f32 %v2579_v23, %v6643_v47  ;;  %v2709_v25 = vadd.f32 %v2708_v37, %v6643_v47  ;;  %3576 = vmatpush1.bf16.msra.mxu0 %v5600_v12  ;;  %3705 = vmatpush1.bf16.msra.mxu1 %v5600_v12  ;;  %v2777_v27 = vmax.f32 %v2578_v19, 0.0  ;;  %v2809_v28 = vmax.f32 %v2707_v20, 0.0 }
 0x49d   : > { %v2583_v29 = vpop.f32.mrf.mxu0  ;;  %v2712_v30 = vpop.f32.mrf.mxu1  ;;  %3577 = vmatprep.subr.bf16.mxu0 %v5605_v18  ;;  %3706 = vmatprep.subr.bf16.mxu1 %v5605_v18 }
 0x49e   : > { %v2778_v33 = vmax.f32 %v2580_v24, 0.0  ;;  %v2810_v35 = vmax.f32 %v2709_v25, 0.0  ;;  %v2870_v49 = vpack.c.bf16 %v2777_v27, %v2775_v39  ;;  %v3167_v50 = vpack.c.bf16 %v2809_v28, %v2807_v42  ;;  %v5620_v39 = vld [vmem:[#allocation5 + $0x614] ss:$8 sps:$4 sm:$0xff]  }
 0x49f   : > { %v2585_v43 = vpop.f32.mrf.mxu0  ;;  %v2714_v44 = vpop.f32.mrf.mxu1  ;;  %v2584_v57 = vadd.f32 %v2583_v29, %v6648_v9  ;;  %v2713_v58 = vadd.f32 %v2712_v30, %v6648_v9 }
 0x4a0   : > { %v2871_v45 = vpack.c.bf16 %v2778_v33, %v2776_v32  ;;  %v3168_v41 = vpack.c.bf16 %v2810_v35, %v2808_v38  ;;  %3578 = vmatpush1.bf16.msra.mxu0 %v5603_v26  ;;  %v2586_v51 = vadd.f32 %v2585_v43, %v6643_v47  ;;  %3707 = vmatpush1.bf16.msra.mxu1 %v5603_v26 }
 0x4a1   : > { %v2587_v40 = vpop.f32.mrf.mxu0  ;;  %v2716_v52 = vpop.f32.mrf.mxu1  ;;  %3579 = vmatprep.subr.bf16.mxu0 %v5608_v31  ;;  %v2715_v54 = vadd.f32 %v2714_v44, %v6643_v47  ;;  %3708 = vmatprep.subr.bf16.mxu1 %v5608_v31  ;;  %v2779_v8 = vmax.f32 %v2584_v57, 0.0  ;;  %v2811_v12 = vmax.f32 %v2713_v58, 0.0  ;;  %v5615_v31 = vld [vmem:[#allocation5 + $0x620] ss:$8 sps:$4 sm:$0xff]   ;;  %v5623_v58 = vld [vmem:[#allocation5 + $0x604] ss:$8 sps:$4 sm:$0xff]  }
 0x4a2   : > { %v2588_v55 = vadd.f32 %v2587_v40, %v6648_v9  ;;  %v2717_v56 = vadd.f32 %v2716_v52, %v6648_v9  ;;  %3094 = vmatprep.mubr.bf16.mxu0 %v2871_v45  ;;  %3223 = vmatprep.mubr.bf16.mxu1 %v3168_v41  ;;  %v2780_v5 = vmax.f32 %v2586_v51, 0.0  ;;  %v5618_v52 = vld [vmem:[#allocation5 + $0x610] ss:$8 sps:$4 sm:$0xff]  }
 0x4a3   : > { %v2589_v59 = vpop.f32.mrf.mxu0  ;;  %v2718_v62 = vpop.f32.mrf.mxu1  ;;  %3095 = vmatmul.mubr.bf16.gmra.mxu0 %v2870_v49  ;;  %3224 = vmatmul.mubr.bf16.gmra.mxu1 %v3167_v50  ;;  %v2812_v6 = vmax.f32 %v2715_v54, 0.0 }
 0x4a4   : > { %v2590_v60 = vadd.f32 %v2589_v59, %v6643_v47  ;;  %v2719_v63 = vadd.f32 %v2718_v62, %v6643_v47  ;;  %3580 = vmatpush1.bf16.msra.mxu0 %v5606_v10  ;;  %v2781_v61 = vmax.f32 %v2588_v55, 0.0  ;;  %v2813_v1 = vmax.f32 %v2717_v56, 0.0  ;;  %3709 = vmatpush1.bf16.msra.mxu1 %v5606_v10 }
 0x4a5   : > { %v2593_v2 = vpop.f32.mrf.mxu0  ;;  %v2722_v3 = vpop.f32.mrf.mxu1  ;;  %3581 = vmatprep.subr.bf16.mxu0 %v5611_v53  ;;  %3710 = vmatprep.subr.bf16.mxu1 %v5611_v53 }
 0x4a6   : > { %v2782_v7 = vmax.f32 %v2590_v60, 0.0  ;;  %v2814_v36 = vmax.f32 %v2719_v63, 0.0  ;;  %v2872_v18 = vpack.c.bf16 %v2781_v61, %v2779_v8  ;;  %v3169_v11 = vpack.c.bf16 %v2813_v1, %v2811_v12  ;;  %v5626_v8 = vld [vmem:[#allocation5 + $0x6f4] ss:$8 sps:$4 sm:$0xff]  }
 0x4a7   : > { %v2595_v13 = vpop.f32.mrf.mxu0  ;;  %v2724_v14 = vpop.f32.mrf.mxu1  ;;  %v2594_v25 = vadd.f32 %v2593_v2, %v6648_v9  ;;  %v2723_v26 = vadd.f32 %v2722_v3, %v6648_v9 }
 0x4a8   : > { %v2873_v15 = vpack.c.bf16 %v2782_v7, %v2780_v5  ;;  %v3170_v16 = vpack.c.bf16 %v2814_v36, %v2812_v6  ;;  %3582 = vmatpush1.bf16.msra.mxu0 %v5609_v0  ;;  %v2596_v19 = vadd.f32 %v2595_v13, %v6643_v47  ;;  %3711 = vmatpush1.bf16.msra.mxu1 %v5609_v0 }
 0x4a9   : > { %v2597_v20 = vpop.f32.mrf.mxu0  ;;  %v2726_v21 = vpop.f32.mrf.mxu1  ;;  %3583 = vmatprep.subr.bf16.mxu0 %v5614_v4  ;;  %v2725_v23 = vadd.f32 %v2724_v14, %v6643_v47  ;;  %3712 = vmatprep.subr.bf16.mxu1 %v5614_v4  ;;  %v2783_v41 = vmax.f32 %v2594_v25, 0.0  ;;  %v2815_v10 = vmax.f32 %v2723_v26, 0.0  ;;  %v5621_v4 = vld [vmem:[#allocation5 + $0x600] ss:$8 sps:$4 sm:$0xff]   ;;  %v5629_v26 = vld [vmem:[#allocation5 + $0x6e4] ss:$8 sps:$4 sm:$0xff]  }
 0x4aa   : > { %v2598_v37 = vadd.f32 %v2597_v20, %v6648_v9  ;;  %v2727_v24 = vadd.f32 %v2726_v21, %v6648_v9  ;;  %3104 = vmatprep.mubr.bf16.mxu0 %v2873_v15  ;;  %3233 = vmatprep.mubr.bf16.mxu1 %v3170_v16  ;;  %v2784_v42 = vmax.f32 %v2596_v19, 0.0  ;;  %v5624_v21 = vld [vmem:[#allocation5 + $0x6f0] ss:$8 sps:$4 sm:$0xff]  }
 0x4ab   : > { %v2599_v27 = vpop.f32.mrf.mxu0  ;;  %v2728_v28 = vpop.f32.mrf.mxu1  ;;  %3105 = vmatmul.mubr.bf16.gmra.mxu0 %v2872_v18  ;;  %3234 = vmatmul.mubr.bf16.gmra.mxu1 %v3169_v11  ;;  %v2816_v43 = vmax.f32 %v2725_v23, 0.0 }
 0x4ac   : > { %v2600_v29 = vadd.f32 %v2599_v27, %v6643_v47  ;;  %v2729_v30 = vadd.f32 %v2728_v28, %v6643_v47  ;;  %3584 = vmatpush1.bf16.msra.mxu0 %v5612_v17  ;;  %v2785_v32 = vmax.f32 %v2598_v37, 0.0  ;;  %v2817_v38 = vmax.f32 %v2727_v24, 0.0  ;;  %3713 = vmatpush1.bf16.msra.mxu1 %v5612_v17 }
 0x4ad   : > { %v2603_v33 = vpop.f32.mrf.mxu0  ;;  %v2732_v35 = vpop.f32.mrf.mxu1  ;;  %3585 = vmatprep.subr.bf16.mxu0 %v5617_v22  ;;  %3714 = vmatprep.subr.bf16.mxu1 %v5617_v22 }
 0x4ae   : > { %v2786_v44 = vmax.f32 %v2600_v29, 0.0  ;;  %v2818_v45 = vmax.f32 %v2729_v30, 0.0  ;;  %v2874_v53 = vpack.c.bf16 %v2785_v32, %v2783_v41  ;;  %v3171_v54 = vpack.c.bf16 %v2817_v38, %v2815_v10  ;;  %v5632_v41 = vld [vmem:[#allocation5 + $0x6d4] ss:$8 sps:$4 sm:$0xff]  }
 0x4af   : > { %v2605_v49 = vpop.f32.mrf.mxu0  ;;  %v2734_v50 = vpop.f32.mrf.mxu1  ;;  %v2604_v63 = vadd.f32 %v2603_v33, %v6648_v9  ;;  %v2733_v0 = vadd.f32 %v2732_v35, %v6648_v9 }
 0x4b0   : > { %v2875_v51 = vpack.c.bf16 %v2786_v44, %v2784_v42  ;;  %v3172_v40 = vpack.c.bf16 %v2818_v45, %v2816_v43  ;;  %3586 = vmatpush1.bf16.msra.mxu0 %v5615_v31  ;;  %v2606_v55 = vadd.f32 %v2605_v49, %v6643_v47  ;;  %3715 = vmatpush1.bf16.msra.mxu1 %v5615_v31 }
 0x4b1   : > { %v2607_v56 = vpop.f32.mrf.mxu0  ;;  %v2736_v57 = vpop.f32.mrf.mxu1  ;;  %3587 = vmatprep.subr.bf16.mxu0 %v5620_v39  ;;  %v2735_v59 = vadd.f32 %v2734_v50, %v6643_v47  ;;  %3716 = vmatprep.subr.bf16.mxu1 %v5620_v39  ;;  %v2787_v16 = vmax.f32 %v2604_v63, 0.0  ;;  %v2819_v17 = vmax.f32 %v2733_v0, 0.0  ;;  %v5627_v39 = vld [vmem:[#allocation5 + $0x6e0] ss:$8 sps:$4 sm:$0xff]   ;;  %v5635_v0 = vld [vmem:[#allocation5 + $0x6c4] ss:$8 sps:$4 sm:$0xff]  }
 0x4b2   : > { %v2608_v62 = vadd.f32 %v2607_v56, %v6648_v9  ;;  %v2737_v60 = vadd.f32 %v2736_v57, %v6648_v9  ;;  %3114 = vmatprep.mubr.bf16.mxu0 %v2875_v51  ;;  %3243 = vmatprep.mubr.bf16.mxu1 %v3172_v40  ;;  %v2788_v12 = vmax.f32 %v2606_v55, 0.0  ;;  %v5630_v57 = vld [vmem:[#allocation5 + $0x6d0] ss:$8 sps:$4 sm:$0xff]  }
 0x4b3   : > { %v2609_v61 = vpop.f32.mrf.mxu0  ;;  %v2738_v1 = vpop.f32.mrf.mxu1  ;;  %3115 = vmatmul.mubr.bf16.gmra.mxu0 %v2874_v53  ;;  %3244 = vmatmul.mubr.bf16.gmra.mxu1 %v3171_v54  ;;  %v2820_v13 = vmax.f32 %v2735_v59, 0.0 }
 0x4b4   : > { %v2610_v2 = vadd.f32 %v2609_v61, %v6643_v47  ;;  %v2739_v3 = vadd.f32 %v2738_v1, %v6643_v47  ;;  %3588 = vmatpush1.bf16.msra.mxu0 %v5618_v52  ;;  %v2789_v5 = vmax.f32 %v2608_v62, 0.0  ;;  %v2821_v6 = vmax.f32 %v2737_v60, 0.0  ;;  %3717 = vmatpush1.bf16.msra.mxu1 %v5618_v52 }
 0x4b5   : > { %v2613_v7 = vpop.f32.mrf.mxu0  ;;  %v2742_v36 = vpop.f32.mrf.mxu1  ;;  %3589 = vmatprep.subr.bf16.mxu0 %v5623_v58  ;;  %3718 = vmatprep.subr.bf16.mxu1 %v5623_v58 }
 0x4b6   : > { %v2790_v14 = vmax.f32 %v2610_v2, 0.0  ;;  %v2822_v15 = vmax.f32 %v2739_v3, 0.0  ;;  %v2876_v22 = vpack.c.bf16 %v2789_v5, %v2787_v16  ;;  %v3173_v23 = vpack.c.bf16 %v2821_v6, %v2819_v17  ;;  %v5638_v16 = vld [vmem:[#allocation5 + $0x6b4] ss:$8 sps:$4 sm:$0xff]  }
 0x4b7   : > { %v2615_v18 = vpop.f32.mrf.mxu0  ;;  %v2744_v11 = vpop.f32.mrf.mxu1  ;;  %v2614_v30 = vadd.f32 %v2613_v7, %v6648_v9  ;;  %v2743_v31 = vadd.f32 %v2742_v36, %v6648_v9 }
 0x4b8   : > { %v2877_v19 = vpack.c.bf16 %v2790_v14, %v2788_v12  ;;  %v3174_v20 = vpack.c.bf16 %v2822_v15, %v2820_v13  ;;  %3590 = vmatpush1.bf16.msra.mxu0 %v5621_v4  ;;  %v2616_v37 = vadd.f32 %v2615_v18, %v6643_v47  ;;  %3719 = vmatpush1.bf16.msra.mxu1 %v5621_v4 }
 0x4b9   : > { %v2617_v24 = vpop.f32.mrf.mxu0  ;;  %v2746_v25 = vpop.f32.mrf.mxu1  ;;  %3591 = vmatprep.subr.bf16.mxu0 %v5626_v8  ;;  %v2745_v27 = vadd.f32 %v2744_v11, %v6643_v47  ;;  %3720 = vmatprep.subr.bf16.mxu1 %v5626_v8  ;;  %v2791_v40 = vmax.f32 %v2614_v30, 0.0  ;;  %v2823_v52 = vmax.f32 %v2743_v31, 0.0  ;;  %v5633_v8 = vld [vmem:[#allocation5 + $0x6c0] ss:$8 sps:$4 sm:$0xff]  }
 0x4ba   : > { %v2618_v28 = vadd.f32 %v2617_v24, %v6648_v9  ;;  %v2747_v29 = vadd.f32 %v2746_v25, %v6648_v9  ;;  %3124 = vmatprep.mubr.bf16.mxu0 %v2877_v19  ;;  %3253 = vmatprep.mubr.bf16.mxu1 %v3174_v20  ;;  %v2792_v10 = vmax.f32 %v2616_v37, 0.0  ;;  %v5636_v25 = vld [vmem:[#allocation5 + $0x6b0] ss:$8 sps:$4 sm:$0xff]  }
 0x4bb   : > { %v2619_v32 = vpop.f32.mrf.mxu0  ;;  %v2748_v38 = vpop.f32.mrf.mxu1  ;;  %3125 = vmatmul.mubr.bf16.gmra.mxu0 %v2876_v22  ;;  %3254 = vmatmul.mubr.bf16.gmra.mxu1 %v3173_v23  ;;  %v2824_v49 = vmax.f32 %v2745_v27, 0.0 }
 0x4bc   : > { %v2620_v33 = vadd.f32 %v2619_v32, %v6643_v47  ;;  %v2749_v35 = vadd.f32 %v2748_v38, %v6643_v47  ;;  %3592 = vmatpush2.bf16.msra.mxu0 %v5624_v21  ;;  %v2793_v42 = vmax.f32 %v2618_v28, 0.0  ;;  %v2825_v43 = vmax.f32 %v2747_v29, 0.0  ;;  %3721 = vmatpush2.bf16.msra.mxu1 %v5624_v21 }
 0x4bd   : > { %v2623_v44 = vpop.f32.mrf.mxu0  ;;  %v2752_v45 = vpop.f32.mrf.mxu1  ;;  %3593 = vmatprep.subr.bf16.mxu0 %v5629_v26  ;;  %3722 = vmatprep.subr.bf16.mxu1 %v5629_v26 }
 0x4be   : > { %v2794_v50 = vmax.f32 %v2620_v33, 0.0  ;;  %v2826_v51 = vmax.f32 %v2749_v35, 0.0  ;;  %v2878_v58 = vpack.c.bf16 %v2793_v42, %v2791_v40  ;;  %v3175_v59 = vpack.c.bf16 %v2825_v43, %v2823_v52 }
 0x4bf   : > { %v2625_v53 = vpop.f32.mrf.mxu0  ;;  %v2754_v54 = vpop.f32.mrf.mxu1  ;;  %v2624_v3 = vadd.f32 %v2623_v44, %v6648_v9  ;;  %v2753_v4 = vadd.f32 %v2752_v45, %v6648_v9 }
 0x4c0   : > { %v2879_v55 = vpack.c.bf16 %v2794_v50, %v2792_v10  ;;  %v3176_v56 = vpack.c.bf16 %v2826_v51, %v2824_v49  ;;  %3594 = vmatpush2.bf16.msra.mxu0 %v5627_v39  ;;  %v2626_v62 = vadd.f32 %v2625_v53, %v6643_v47  ;;  %3723 = vmatpush2.bf16.msra.mxu1 %v5627_v39 }
 0x4c1   : > { %v2627_v60 = vpop.f32.mrf.mxu0  ;;  %v2756_v63 = vpop.f32.mrf.mxu1  ;;  %3595 = vmatprep.subr.bf16.mxu0 %v5632_v41  ;;  %v2755_v61 = vadd.f32 %v2754_v54, %v6643_v47  ;;  %3724 = vmatprep.subr.bf16.mxu1 %v5632_v41  ;;  %v2795_v20 = vmax.f32 %v2624_v3, 0.0  ;;  %v2827_v21 = vmax.f32 %v2753_v4, 0.0 }
 0x4c2   : > { %v2628_v1 = vadd.f32 %v2627_v60, %v6648_v9  ;;  %v2757_v2 = vadd.f32 %v2756_v63, %v6648_v9  ;;  %3134 = vmatprep.mubr.bf16.mxu0 %v2879_v55  ;;  %3263 = vmatprep.mubr.bf16.mxu1 %v3176_v56  ;;  %v2796_v17 = vmax.f32 %v2626_v62, 0.0  ;;  %v5639_v56 = vld [vmem:[#allocation5 + $0x6a0] ss:$8 sps:$4 sm:$0xff]   ;;  %v5650_v60 = vld [vmem:[#allocation5 + $0x774] ss:$8 sps:$4 sm:$0xff]   ;;  %v2886_v63 = vsub.s32 5, %v6345_v34 }
 0x4c3   : > { %v2629_v5 = vpop.f32.mrf.mxu0  ;;  %v2758_v6 = vpop.f32.mrf.mxu1  ;;  %3135 = vmatmul.mubr.bf16.gmra.mxu0 %v2878_v58  ;;  %3264 = vmatmul.mubr.bf16.gmra.mxu1 %v3175_v59  ;;  %v2828_v18 = vmax.f32 %v2755_v61, 0.0  ;;  %v5642_v58 = vld [vmem:[#allocation5 + $0x690] ss:$8 sps:$4 sm:$0xff]   ;;  %v5647_v59 = vld [vmem:[#allocation5 + $0x684] ss:$8 sps:$4 sm:$0xff]  }
 0x4c4   : > { %v2630_v7 = vadd.f32 %v2629_v5, %v6643_v47  ;;  %v2759_v36 = vadd.f32 %v2758_v6, %v6643_v47  ;;  %3596 = vmatpush2.bf16.msra.mxu0 %v5630_v57  ;;  %v2797_v12 = vmax.f32 %v2628_v1, 0.0  ;;  %v2829_v13 = vmax.f32 %v2757_v2, 0.0  ;;  %3725 = vmatpush2.bf16.msra.mxu1 %v5630_v57  ;;  %v5644_v57 = vld [vmem:[#allocation5 + $0x694] ss:$8 sps:$4 sm:$0xff]   ;;  %v5645_v62 = vld [vmem:[#allocation5 + $0x680] ss:$8 sps:$4 sm:$0xff]  }
 0x4c5   : > { %v2633_v14 = vpop.f32.mrf.mxu0  ;;  %v2762_v15 = vpop.f32.mrf.mxu1  ;;  %3597 = vmatprep.subr.bf16.mxu0 %v5635_v0  ;;  %3726 = vmatprep.subr.bf16.mxu1 %v5635_v0  ;;  %v6716_v1 = vrot.slane %v6640_v46, %v2886_v63  ;;  %v6719_v2 = vrot.slane %v6645_v48, %v2886_v63 }
 0x4c6   : > { %v2798_v11 = vmax.f32 %v2630_v7, 0.0  ;;  %v2830_v19 = vmax.f32 %v2759_v36, 0.0  ;;  %v2880_v26 = vpack.c.bf16 %v2797_v12, %v2795_v20  ;;  %v3177_v27 = vpack.c.bf16 %v2829_v13, %v2827_v21 }
 0x4c7   : > { %v2635_v22 = vpop.f32.mrf.mxu0  ;;  %v2764_v23 = vpop.f32.mrf.mxu1  ;;  %v2634_v33 = vadd.f32 %v2633_v14, %v6648_v9  ;;  %v2763_v35 = vadd.f32 %v2762_v15, %v6648_v9 }
 0x4c8   : > { %v2881_v37 = vpack.c.bf16 %v2798_v11, %v2796_v17  ;;  %v3178_v24 = vpack.c.bf16 %v2830_v19, %v2828_v18  ;;  %3598 = vmatpush2.bf16.msra.mxu0 %v5633_v8  ;;  %v2636_v28 = vadd.f32 %v2635_v22, %v6643_v47  ;;  %3727 = vmatpush2.bf16.msra.mxu1 %v5633_v8 }
 0x4c9   : > { %v2637_v29 = vpop.f32.mrf.mxu0  ;;  %v2766_v30 = vpop.f32.mrf.mxu1  ;;  %3599 = vmatprep.subr.bf16.mxu0 %v5638_v16  ;;  %v2765_v31 = vadd.f32 %v2764_v23, %v6643_v47  ;;  %3728 = vmatprep.subr.bf16.mxu1 %v5638_v16  ;;  %v2799_v40 = vmax.f32 %v2634_v33, 0.0  ;;  %v2831_v52 = vmax.f32 %v2763_v35, 0.0  ;;  %v5653_v35 = vld [vmem:[#allocation5 + $0x764] ss:$8 sps:$4 sm:$0xff]  }
 0x4ca   : > { %v2638_v32 = vadd.f32 %v2637_v29, %v6648_v9  ;;  %v2767_v38 = vadd.f32 %v2766_v30, %v6648_v9  ;;  %3144 = vmatprep.mubr.bf16.mxu0 %v2881_v37  ;;  %3273 = vmatprep.mubr.bf16.mxu1 %v3178_v24  ;;  %v2800_v10 = vmax.f32 %v2636_v28, 0.0  ;;  %v5648_v29 = vld [vmem:[#allocation5 + $0x770] ss:$8 sps:$4 sm:$0xff]  }
 0x4cb   : > { %v2639_v39 = vpop.f32.mrf.mxu0  ;;  %v2768_v42 = vpop.f32.mrf.mxu1  ;;  %3145 = vmatmul.mubr.bf16.gmra.mxu0 %v2880_v26  ;;  %3274 = vmatmul.mubr.bf16.gmra.mxu1 %v3177_v27  ;;  %v2832_v49 = vmax.f32 %v2765_v31, 0.0 }
 0x4cc   : > { %v2640_v43 = vadd.f32 %v2639_v39, %v6643_v47  ;;  %v2769_v44 = vadd.f32 %v2768_v42, %v6643_v47  ;;  %3600 = vmatpush2.bf16.msra.mxu0 %v5636_v25  ;;  %v2801_v45 = vmax.f32 %v2638_v32, 0.0  ;;  %v2833_v41 = vmax.f32 %v2767_v38, 0.0  ;;  %3729 = vmatpush2.bf16.msra.mxu1 %v5636_v25  ;;  %v5641_v47 = vld [vmem:[#allocation5 + $0x6a4] ss:$8 sps:$4 sm:$0xff]  }
 0x4cd   : > { %3601 = vmatprep.subr.bf16.mxu0 %v5641_v47  ;;  %3730 = vmatprep.subr.bf16.mxu1 %v5641_v47 }
 0x4ce   : > { %v2802_v50 = vmax.f32 %v2640_v43, 0.0  ;;  %v2834_v51 = vmax.f32 %v2769_v44, 0.0  ;;  %v2882_v54 = vpack.c.bf16 %v2801_v45, %v2799_v40  ;;  %v3179_v55 = vpack.c.bf16 %v2833_v41, %v2831_v52 }
 0x4d0   : > { %v2883_v9 = vpack.c.bf16 %v2802_v50, %v2800_v10  ;;  %v3180_v53 = vpack.c.bf16 %v2834_v51, %v2832_v49  ;;  %3602 = vmatpush2.bf16.msra.mxu0 %v5639_v56  ;;  %3731 = vmatpush2.bf16.msra.mxu1 %v5639_v56  ;;  %v5651_v51 = vld [vmem:[#allocation5 + $0x760] ss:$8 sps:$4 sm:$0xff]  }
 0x4d1   : > { %3603 = vmatprep.subr.bf16.mxu0 %v5644_v57  ;;  %3732 = vmatprep.subr.bf16.mxu1 %v5644_v57 }
 0x4d2   : > { %3154 = vmatprep.mubr.bf16.mxu0 %v2883_v9  ;;  %3283 = vmatprep.mubr.bf16.mxu1 %v3180_v53 }
 0x4d3   : > { %3155 = vmatmul.mubr.bf16.gmra.mxu0 %v2882_v54  ;;  %3284 = vmatmul.mubr.bf16.gmra.mxu1 %v3179_v55  ;;  %v5656_v54 = vld [vmem:[#allocation5 + $0x754] ss:$8 sps:$4 sm:$0xff]  }
 0x4d4   : > { %3604 = vmatpush2.bf16.msra.mxu0 %v5642_v58  ;;  %3733 = vmatpush2.bf16.msra.mxu1 %v5642_v58 }
 0x4d5   : > { %3605 = vmatprep.subr.bf16.mxu0 %v5647_v59  ;;  %3734 = vmatprep.subr.bf16.mxu1 %v5647_v59 }
 0x4d8   : > { %3606 = vmatpush2.bf16.msra.mxu0 %v5645_v62  ;;  %3735 = vmatpush2.bf16.msra.mxu1 %v5645_v62 }
 0x4d9   : > { %4098 = vmatprep.subr.bf16.mxu0 %v5650_v60  ;;  %4227 = vmatprep.subr.bf16.mxu1 %v5650_v60 }
 0x55b   : > { %v3086_v0 = vpop.f32.mrf.mxu0  ;;  %v3215_v61 = vpop.f32.mrf.mxu1 }
 0x55c   : > { %v3087_v13 = vadd.f32 %v3086_v0, %v6719_v2  ;;  %v3216_v46 = vadd.f32 %v3215_v61, %v6719_v2  ;;  %v5654_v61 = vld [vmem:[#allocation5 + $0x750] ss:$8 sps:$4 sm:$0xff]  }
 0x55d   : > { %v3088_v3 = vpop.f32.mrf.mxu0  ;;  %v3217_v4 = vpop.f32.mrf.mxu1 }
 0x55e   : > { %v3089_v7 = vadd.f32 %v3088_v3, %v6716_v1  ;;  %v3218_v36 = vadd.f32 %v3217_v4, %v6716_v1  ;;  %v3294_v37 = vmax.f32 %v3087_v13, 0.0  ;;  %v3326_v24 = vmax.f32 %v3216_v46, 0.0 }
 0x55f   : > { %v3090_v5 = vpop.f32.mrf.mxu0  ;;  %v3219_v6 = vpop.f32.mrf.mxu1 }
 0x560   : > { %v3091_v8 = vadd.f32 %v3090_v5, %v6719_v2  ;;  %v3220_v12 = vadd.f32 %v3219_v6, %v6719_v2  ;;  %v3295_v20 = vmax.f32 %v3089_v7, 0.0  ;;  %v3327_v21 = vmax.f32 %v3218_v36, 0.0  ;;  %v5659_v36 = vld [vmem:[#allocation5 + $0x744] ss:$8 sps:$4 sm:$0xff]  }
 0x561   : > { %v3092_v14 = vpop.f32.mrf.mxu0  ;;  %v3221_v15 = vpop.f32.mrf.mxu1 }
 0x562   : > { %v3093_v48 = vadd.f32 %v3092_v14, %v6716_v1  ;;  %v3222_v16 = vadd.f32 %v3221_v15, %v6716_v1  ;;  %v3296_v17 = vmax.f32 %v3091_v8, 0.0  ;;  %v3328_v18 = vmax.f32 %v3220_v12, 0.0 }
 0x563   : > { %v3096_v11 = vpop.f32.mrf.mxu0  ;;  %v3225_v19 = vpop.f32.mrf.mxu1 }
 0x564   : > { %v3297_v22 = vmax.f32 %v3093_v48, 0.0  ;;  %v3329_v23 = vmax.f32 %v3222_v16, 0.0  ;;  %v3391_v30 = vpack.c.bf16 %v3296_v17, %v3294_v37  ;;  %v3688_v31 = vpack.c.bf16 %v3328_v18, %v3326_v24  ;;  %v5657_v18 = vld [vmem:[#allocation5 + $0x740] ss:$8 sps:$4 sm:$0xff]  }
 0x565   : > { %v3098_v25 = vpop.f32.mrf.mxu0  ;;  %v3227_v26 = vpop.f32.mrf.mxu1  ;;  %v3097_v44 = vadd.f32 %v3096_v11, %v6719_v2  ;;  %v3226_v45 = vadd.f32 %v3225_v19, %v6719_v2 }
 0x566   : > { %v3392_v27 = vpack.c.bf16 %v3297_v22, %v3295_v20  ;;  %v3689_v28 = vpack.c.bf16 %v3329_v23, %v3327_v21  ;;  %v3099_v32 = vadd.f32 %v3098_v25, %v6716_v1  ;;  %v3228_v39 = vadd.f32 %v3227_v26, %v6716_v1  ;;  %v5662_v22 = vld [vmem:[#allocation5 + $0x734] ss:$8 sps:$4 sm:$0xff]  }
 0x567   : > { %v3100_v38 = vpop.f32.mrf.mxu0  ;;  %v3229_v33 = vpop.f32.mrf.mxu1  ;;  %v3298_v58 = vmax.f32 %v3097_v44, 0.0  ;;  %v3330_v59 = vmax.f32 %v3226_v45, 0.0 }
 0x568   : > { %v3101_v42 = vadd.f32 %v3100_v38, %v6719_v2  ;;  %v3230_v43 = vadd.f32 %v3229_v33, %v6719_v2  ;;  %3607 = vmatprep.mubr.bf16.mxu0 %v3392_v27  ;;  %3736 = vmatprep.mubr.bf16.mxu1 %v3689_v28  ;;  %v3299_v55 = vmax.f32 %v3099_v32, 0.0  ;;  %v3331_v47 = vmax.f32 %v3228_v39, 0.0  ;;  %v5660_v32 = vld [vmem:[#allocation5 + $0x730] ss:$8 sps:$4 sm:$0xff]  }
 0x569   : > { %v3102_v41 = vpop.f32.mrf.mxu0  ;;  %v3231_v10 = vpop.f32.mrf.mxu1  ;;  %3608 = vmatmul.mubr.bf16.vlgmr.msra.gmra.mxu0 %v3391_v30  ;;  %3737 = vmatmul.mubr.bf16.vlgmr.msra.gmra.mxu1 %v3688_v31 }
 0x56a   : > { %v3103_v49 = vadd.f32 %v3102_v41, %v6716_v1  ;;  %v3232_v50 = vadd.f32 %v3231_v10, %v6716_v1  ;;  %4099 = vmatpush1.bf16.msra.mxu0 %v5648_v29  ;;  %4228 = vmatpush1.bf16.msra.mxu1 %v5648_v29  ;;  %v3300_v40 = vmax.f32 %v3101_v42, 0.0  ;;  %v3332_v52 = vmax.f32 %v3230_v43, 0.0  ;;  %v5665_v43 = vld [vmem:[#allocation5 + $0x724] ss:$8 sps:$4 sm:$0xff]  }
 0x56b   : > { %v3106_v9 = vpop.f32.mrf.mxu0  ;;  %v3235_v53 = vpop.f32.mrf.mxu1  ;;  %4100 = vmatprep.subr.bf16.mxu0 %v5653_v35  ;;  %4229 = vmatprep.subr.bf16.mxu1 %v5653_v35 }
 0x56c   : > { %v3301_v56 = vmax.f32 %v3103_v49, 0.0  ;;  %v3333_v57 = vmax.f32 %v3232_v50, 0.0  ;;  %v3393_v3 = vpack.c.bf16 %v3300_v40, %v3298_v58  ;;  %v3690_v4 = vpack.c.bf16 %v3332_v52, %v3330_v59 }
 0x56d   : > { %v3108_v62 = vpop.f32.mrf.mxu0  ;;  %v3237_v60 = vpop.f32.mrf.mxu1  ;;  %v3107_v46 = vadd.f32 %v3106_v9, %v6719_v2  ;;  %v3236_v14 = vadd.f32 %v3235_v53, %v6719_v2  ;;  %v5663_v9 = vld [vmem:[#allocation5 + $0x720] ss:$8 sps:$4 sm:$0xff]  }
 0x56e   : > { %v3394_v63 = vpack.c.bf16 %v3301_v56, %v3299_v55  ;;  %v3691_v0 = vpack.c.bf16 %v3333_v57, %v3331_v47  ;;  %4101 = vmatpush1.bf16.msra.mxu0 %v5651_v51  ;;  %v3109_v5 = vadd.f32 %v3108_v62, %v6716_v1  ;;  %4230 = vmatpush1.bf16.msra.mxu1 %v5651_v51  ;;  %v5668_v56 = vld [vmem:[#allocation5 + $0x714] ss:$8 sps:$4 sm:$0xff]  }
 0x56f   : > { %v3110_v6 = vpop.f32.mrf.mxu0  ;;  %v3239_v7 = vpop.f32.mrf.mxu1  ;;  %4102 = vmatprep.subr.bf16.mxu0 %v5656_v54  ;;  %v3238_v8 = vadd.f32 %v3237_v60, %v6716_v1  ;;  %4231 = vmatprep.subr.bf16.mxu1 %v5656_v54  ;;  %v3302_v26 = vmax.f32 %v3107_v46, 0.0  ;;  %v3334_v27 = vmax.f32 %v3236_v14, 0.0 }
 0x570   : > { %v3111_v12 = vadd.f32 %v3110_v6, %v6719_v2  ;;  %v3240_v13 = vadd.f32 %v3239_v7, %v6719_v2  ;;  %3617 = vmatprep.mubr.bf16.mxu0 %v3394_v63  ;;  %3746 = vmatprep.mubr.bf16.mxu1 %v3691_v0  ;;  %v3303_v23 = vmax.f32 %v3109_v5, 0.0  ;;  %v5666_v5 = vld [vmem:[#allocation5 + $0x710] ss:$8 sps:$4 sm:$0xff]  }
 0x571   : > { %v3112_v15 = vpop.f32.mrf.mxu0  ;;  %v3241_v48 = vpop.f32.mrf.mxu1  ;;  %3618 = vmatmul.mubr.bf16.gmra.mxu0 %v3393_v3  ;;  %3747 = vmatmul.mubr.bf16.gmra.mxu1 %v3690_v4  ;;  %v3335_v37 = vmax.f32 %v3238_v8, 0.0 }
 0x572   : > { %v3113_v16 = vadd.f32 %v3112_v15, %v6716_v1  ;;  %v3242_v17 = vadd.f32 %v3241_v48, %v6716_v1  ;;  %4103 = vmatpush1.bf16.msra.mxu0 %v5654_v61  ;;  %v3304_v11 = vmax.f32 %v3111_v12, 0.0  ;;  %v3336_v19 = vmax.f32 %v3240_v13, 0.0  ;;  %4232 = vmatpush1.bf16.msra.mxu1 %v5654_v61  ;;  %v5671_v13 = vld [vmem:[#allocation5 + $0x704] ss:$8 sps:$4 sm:$0xff]  }
 0x573   : > { %v3116_v20 = vpop.f32.mrf.mxu0  ;;  %v3245_v21 = vpop.f32.mrf.mxu1  ;;  %4104 = vmatprep.subr.bf16.mxu0 %v5659_v36  ;;  %4233 = vmatprep.subr.bf16.mxu1 %v5659_v36 }
 0x574   : > { %v3305_v24 = vmax.f32 %v3113_v16, 0.0  ;;  %v3337_v25 = vmax.f32 %v3242_v17, 0.0  ;;  %v3395_v38 = vpack.c.bf16 %v3304_v11, %v3302_v26  ;;  %v3692_v33 = vpack.c.bf16 %v3336_v19, %v3334_v27 }
 0x575   : > { %v3118_v28 = vpop.f32.mrf.mxu0  ;;  %v3247_v29 = vpop.f32.mrf.mxu1  ;;  %v3117_v10 = vadd.f32 %v3116_v20, %v6719_v2  ;;  %v3246_v49 = vadd.f32 %v3245_v21, %v6719_v2  ;;  %v5669_v20 = vld [vmem:[#allocation5 + $0x700] ss:$8 sps:$4 sm:$0xff]  }
 0x576   : > { %v3396_v30 = vpack.c.bf16 %v3305_v24, %v3303_v23  ;;  %v3693_v31 = vpack.c.bf16 %v3337_v25, %v3335_v37  ;;  %4105 = vmatpush1.bf16.msra.mxu0 %v5657_v18  ;;  %v3119_v35 = vadd.f32 %v3118_v28, %v6716_v1  ;;  %4234 = vmatpush1.bf16.msra.mxu1 %v5657_v18  ;;  %v5674_v24 = vld [vmem:[#allocation5 + $0x7f4] ss:$8 sps:$4 sm:$0xff]  }
 0x577   : > { %v3120_v39 = vpop.f32.mrf.mxu0  ;;  %v3249_v42 = vpop.f32.mrf.mxu1  ;;  %4106 = vmatprep.subr.bf16.mxu0 %v5662_v22  ;;  %v3248_v44 = vadd.f32 %v3247_v29, %v6716_v1  ;;  %4235 = vmatprep.subr.bf16.mxu1 %v5662_v22  ;;  %v3306_v60 = vmax.f32 %v3117_v10, 0.0  ;;  %v3338_v63 = vmax.f32 %v3246_v49, 0.0 }
 0x578   : > { %v3121_v45 = vadd.f32 %v3120_v39, %v6719_v2  ;;  %v3250_v41 = vadd.f32 %v3249_v42, %v6719_v2  ;;  %3627 = vmatprep.mubr.bf16.mxu0 %v3396_v30  ;;  %3756 = vmatprep.mubr.bf16.mxu1 %v3693_v31  ;;  %v3307_v57 = vmax.f32 %v3119_v35, 0.0  ;;  %v5672_v35 = vld [vmem:[#allocation5 + $0x7f0] ss:$8 sps:$4 sm:$0xff]  }
 0x579   : > { %v3122_v50 = vpop.f32.mrf.mxu0  ;;  %v3251_v51 = vpop.f32.mrf.mxu1  ;;  %3628 = vmatmul.mubr.bf16.gmra.mxu0 %v3395_v38  ;;  %3757 = vmatmul.mubr.bf16.gmra.mxu1 %v3692_v33  ;;  %v3339_v58 = vmax.f32 %v3248_v44, 0.0 }
 0x57a   : > { %v3123_v40 = vadd.f32 %v3122_v50, %v6716_v1  ;;  %v3252_v52 = vadd.f32 %v3251_v51, %v6716_v1  ;;  %4107 = vmatpush1.bf16.msra.mxu0 %v5660_v32  ;;  %v3308_v53 = vmax.f32 %v3121_v45, 0.0  ;;  %v3340_v54 = vmax.f32 %v3250_v41, 0.0  ;;  %4236 = vmatpush1.bf16.msra.mxu1 %v5660_v32  ;;  %v5677_v41 = vld [vmem:[#allocation5 + $0x7e4] ss:$8 sps:$4 sm:$0xff]  }
 0x57b   : > { %v3126_v55 = vpop.f32.mrf.mxu0  ;;  %v3255_v47 = vpop.f32.mrf.mxu1  ;;  %4108 = vmatprep.subr.bf16.mxu0 %v5665_v43  ;;  %4237 = vmatprep.subr.bf16.mxu1 %v5665_v43 }
 0x57c   : > { %v3309_v59 = vmax.f32 %v3123_v40, 0.0  ;;  %v3341_v62 = vmax.f32 %v3252_v52, 0.0  ;;  %v3397_v6 = vpack.c.bf16 %v3308_v53, %v3306_v60  ;;  %v3694_v7 = vpack.c.bf16 %v3340_v54, %v3338_v63 }
 0x57d   : > { %v3128_v0 = vpop.f32.mrf.mxu0  ;;  %v3257_v61 = vpop.f32.mrf.mxu1  ;;  %v3127_v48 = vadd.f32 %v3126_v55, %v6719_v2  ;;  %v3256_v16 = vadd.f32 %v3255_v47, %v6719_v2  ;;  %v5675_v55 = vld [vmem:[#allocation5 + $0x7e0] ss:$8 sps:$4 sm:$0xff]  }
 0x57e   : > { %v3398_v3 = vpack.c.bf16 %v3309_v59, %v3307_v57  ;;  %v3695_v4 = vpack.c.bf16 %v3341_v62, %v3339_v58  ;;  %4109 = vmatpush1.bf16.msra.mxu0 %v5663_v9  ;;  %v3129_v36 = vadd.f32 %v3128_v0, %v6716_v1  ;;  %4238 = vmatpush1.bf16.msra.mxu1 %v5663_v9  ;;  %v5680_v59 = vld [vmem:[#allocation5 + $0x7d4] ss:$8 sps:$4 sm:$0xff]  }
 0x57f   : > { %v3130_v8 = vpop.f32.mrf.mxu0  ;;  %v3259_v12 = vpop.f32.mrf.mxu1  ;;  %4110 = vmatprep.subr.bf16.mxu0 %v5668_v56  ;;  %v3258_v46 = vadd.f32 %v3257_v61, %v6716_v1  ;;  %4239 = vmatprep.subr.bf16.mxu1 %v5668_v56  ;;  %v3310_v29 = vmax.f32 %v3127_v48, 0.0  ;;  %v3342_v30 = vmax.f32 %v3256_v16, 0.0 }
 0x580   : > { %v3131_v14 = vadd.f32 %v3130_v8, %v6719_v2  ;;  %v3260_v15 = vadd.f32 %v3259_v12, %v6719_v2  ;;  %3637 = vmatprep.mubr.bf16.mxu0 %v3398_v3  ;;  %3766 = vmatprep.mubr.bf16.mxu1 %v3695_v4  ;;  %v3311_v25 = vmax.f32 %v3129_v36, 0.0  ;;  %v5678_v36 = vld [vmem:[#allocation5 + $0x7d0] ss:$8 sps:$4 sm:$0xff]  }
 0x581   : > { %v3132_v17 = vpop.f32.mrf.mxu0  ;;  %v3261_v18 = vpop.f32.mrf.mxu1  ;;  %3638 = vmatmul.mubr.bf16.gmra.mxu0 %v3397_v6  ;;  %3767 = vmatmul.mubr.bf16.gmra.mxu1 %v3694_v7  ;;  %v3343_v26 = vmax.f32 %v3258_v46, 0.0 }
 0x582   : > { %v3133_v11 = vadd.f32 %v3132_v17, %v6716_v1  ;;  %v3262_v19 = vadd.f32 %v3261_v18, %v6716_v1  ;;  %4111 = vmatpush1.bf16.msra.mxu0 %v5666_v5  ;;  %v3312_v21 = vmax.f32 %v3131_v14, 0.0  ;;  %v3344_v22 = vmax.f32 %v3260_v15, 0.0  ;;  %4240 = vmatpush1.bf16.msra.mxu1 %v5666_v5  ;;  %v5683_v15 = vld [vmem:[#allocation5 + $0x7c4] ss:$8 sps:$4 sm:$0xff]  }
 0x583   : > { %v3136_v23 = vpop.f32.mrf.mxu0  ;;  %v3265_v37 = vpop.f32.mrf.mxu1  ;;  %4112 = vmatprep.subr.bf16.mxu0 %v5671_v13  ;;  %4241 = vmatprep.subr.bf16.mxu1 %v5671_v13 }
 0x584   : > { %v3313_v27 = vmax.f32 %v3133_v11, 0.0  ;;  %v3345_v28 = vmax.f32 %v3262_v19, 0.0  ;;  %v3399_v39 = vpack.c.bf16 %v3312_v21, %v3310_v29  ;;  %v3696_v42 = vpack.c.bf16 %v3344_v22, %v3342_v30 }
 0x585   : > { %v3138_v31 = vpop.f32.mrf.mxu0  ;;  %v3267_v32 = vpop.f32.mrf.mxu1  ;;  %v3137_v51 = vadd.f32 %v3136_v23, %v6719_v2  ;;  %v3266_v40 = vadd.f32 %v3265_v37, %v6719_v2  ;;  %v5681_v23 = vld [vmem:[#allocation5 + $0x7c0] ss:$8 sps:$4 sm:$0xff]  }
 0x586   : > { %v3400_v38 = vpack.c.bf16 %v3313_v27, %v3311_v25  ;;  %v3697_v33 = vpack.c.bf16 %v3345_v28, %v3343_v26  ;;  %4113 = vmatpush1.bf16.msra.mxu0 %v5669_v20  ;;  %v3139_v43 = vadd.f32 %v3138_v31, %v6716_v1  ;;  %4242 = vmatpush1.bf16.msra.mxu1 %v5669_v20  ;;  %v5686_v27 = vld [vmem:[#allocation5 + $0x7b4] ss:$8 sps:$4 sm:$0xff]  }
 0x587   : > { %v3140_v44 = vpop.f32.mrf.mxu0  ;;  %v3269_v45 = vpop.f32.mrf.mxu1  ;;  %4114 = vmatprep.subr.bf16.mxu0 %v5674_v24  ;;  %v3268_v10 = vadd.f32 %v3267_v32, %v6716_v1  ;;  %4243 = vmatprep.subr.bf16.mxu1 %v5674_v24  ;;  %v3314_v61 = vmax.f32 %v3137_v51, 0.0  ;;  %v3346_v3 = vmax.f32 %v3266_v40, 0.0 }
 0x588   : > { %v3141_v49 = vadd.f32 %v3140_v44, %v6719_v2  ;;  %v3270_v50 = vadd.f32 %v3269_v45, %v6719_v2  ;;  %3647 = vmatprep.mubr.bf16.mxu0 %v3400_v38  ;;  %3776 = vmatprep.mubr.bf16.mxu1 %v3697_v33  ;;  %v3315_v62 = vmax.f32 %v3139_v43, 0.0  ;;  %v5684_v43 = vld [vmem:[#allocation5 + $0x7b0] ss:$8 sps:$4 sm:$0xff]  }
 0x589   : > { %v3142_v52 = vpop.f32.mrf.mxu0  ;;  %v3271_v9 = vpop.f32.mrf.mxu1  ;;  %3648 = vmatmul.mubr.bf16.gmra.mxu0 %v3399_v39  ;;  %3777 = vmatmul.mubr.bf16.gmra.mxu1 %v3696_v42  ;;  %v3347_v60 = vmax.f32 %v3268_v10, 0.0 }
 0x58a   : > { %v3143_v53 = vadd.f32 %v3142_v52, %v6716_v1  ;;  %v3272_v54 = vadd.f32 %v3271_v9, %v6716_v1  ;;  %4115 = vmatpush2.bf16.msra.mxu0 %v5672_v35  ;;  %v3316_v47 = vmax.f32 %v3141_v49, 0.0  ;;  %v3348_v56 = vmax.f32 %v3270_v50, 0.0  ;;  %4244 = vmatpush2.bf16.msra.mxu1 %v5672_v35 }
 0x58b   : > { %v3146_v57 = vpop.f32.mrf.mxu0  ;;  %v3275_v58 = vpop.f32.mrf.mxu1  ;;  %4116 = vmatprep.subr.bf16.mxu0 %v5677_v41  ;;  %4245 = vmatprep.subr.bf16.mxu1 %v5677_v41 }
 0x58c   : > { %v3317_v63 = vmax.f32 %v3143_v53, 0.0  ;;  %v3349_v0 = vmax.f32 %v3272_v54, 0.0  ;;  %v3401_v8 = vpack.c.bf16 %v3316_v47, %v3314_v61  ;;  %v3698_v12 = vpack.c.bf16 %v3348_v56, %v3346_v3 }
 0x58d   : > { %v3148_v4 = vpop.f32.mrf.mxu0  ;;  %v3277_v5 = vpop.f32.mrf.mxu1  ;;  %v3147_v18 = vadd.f32 %v3146_v57, %v6719_v2  ;;  %v3276_v11 = vadd.f32 %v3275_v58, %v6719_v2 }
 0x58e   : > { %v3402_v6 = vpack.c.bf16 %v3317_v63, %v3315_v62  ;;  %v3699_v7 = vpack.c.bf16 %v3349_v0, %v3347_v60  ;;  %4117 = vmatpush2.bf16.msra.mxu0 %v5675_v55  ;;  %v3149_v13 = vadd.f32 %v3148_v4, %v6716_v1  ;;  %4246 = vmatpush2.bf16.msra.mxu1 %v5675_v55 }
 0x58f   : > { %v3150_v46 = vpop.f32.mrf.mxu0  ;;  %v3279_v14 = vpop.f32.mrf.mxu1  ;;  %4118 = vmatprep.subr.bf16.mxu0 %v5680_v59  ;;  %v3278_v48 = vadd.f32 %v3277_v5, %v6716_v1  ;;  %4247 = vmatprep.subr.bf16.mxu1 %v5680_v59  ;;  %v3318_v32 = vmax.f32 %v3147_v18, 0.0  ;;  %v3350_v38 = vmax.f32 %v3276_v11, 0.0  ;;  %v5687_v5 = vld [vmem:[#allocation5 + $0x7a0] ss:$8 sps:$4 sm:$0xff]  }
 0x590   : > { %v3151_v16 = vadd.f32 %v3150_v46, %v6719_v2  ;;  %v3280_v17 = vadd.f32 %v3279_v14, %v6719_v2  ;;  %3657 = vmatprep.mubr.bf16.mxu0 %v3402_v6  ;;  %3786 = vmatprep.mubr.bf16.mxu1 %v3699_v7  ;;  %v3319_v28 = vmax.f32 %v3149_v13, 0.0  ;;  %v5692_v6 = vld [vmem:[#allocation5 + $0x794] ss:$8 sps:$4 sm:$0xff]   ;;  %v5690_v7 = vld [vmem:[#allocation5 + $0x790] ss:$8 sps:$4 sm:$0xff]   ;;  %v6786_v14 = vld [vmem:[#allocation7 + $0x8] sm:$0xff] }
 0x591   : > { %v3152_v19 = vpop.f32.mrf.mxu0  ;;  %v3281_v20 = vpop.f32.mrf.mxu1  ;;  %3658 = vmatmul.mubr.bf16.gmra.mxu0 %v3401_v8  ;;  %3787 = vmatmul.mubr.bf16.gmra.mxu1 %v3698_v12  ;;  %v3351_v29 = vmax.f32 %v3278_v48, 0.0  ;;  %v5693_v8 = vld [vmem:[#allocation5 + $0x780] ss:$8 sps:$4 sm:$0xff]   ;;  %v3409_v12 = vsub.s32 6, %v6345_v34 }
 0x592   : > { %v3153_v21 = vadd.f32 %v3152_v19, %v6716_v1  ;;  %v3282_v22 = vadd.f32 %v3281_v20, %v6716_v1  ;;  %4119 = vmatpush2.bf16.msra.mxu0 %v5678_v36  ;;  %v3320_v37 = vmax.f32 %v3151_v16, 0.0  ;;  %v3352_v24 = vmax.f32 %v3280_v17, 0.0  ;;  %4248 = vmatpush2.bf16.msra.mxu1 %v5678_v36  ;;  %v5695_v36 = vld [vmem:[#allocation5 + $0x784] ss:$8 sps:$4 sm:$0xff]  }
 0x593   : > { %v3156_v25 = vpop.f32.mrf.mxu0  ;;  %v3285_v26 = vpop.f32.mrf.mxu1  ;;  %4120 = vmatprep.subr.bf16.mxu0 %v5683_v15  ;;  %4249 = vmatprep.subr.bf16.mxu1 %v5683_v15  ;;  %v6789_v15 = vrot.slane %v6786_v14, %v3409_v12  ;;  %v6791_v48 = vld [vmem:[#allocation7] sm:$0xff] }
 0x594   : > { %v3321_v30 = vmax.f32 %v3153_v21, 0.0  ;;  %v3353_v31 = vmax.f32 %v3282_v22, 0.0  ;;  %v3403_v44 = vpack.c.bf16 %v3320_v37, %v3318_v32  ;;  %v3700_v45 = vpack.c.bf16 %v3352_v24, %v3350_v38 }
 0x595   : > { %v3158_v33 = vpop.f32.mrf.mxu0  ;;  %v3287_v35 = vpop.f32.mrf.mxu1  ;;  %v3157_v52 = vadd.f32 %v3156_v25, %v6719_v2  ;;  %v3286_v9 = vadd.f32 %v3285_v26, %v6719_v2  ;;  %v6794_v16 = vrot.slane %v6791_v48, %v3409_v12 }
 0x596   : > { %v3404_v39 = vpack.c.bf16 %v3321_v30, %v3319_v28  ;;  %v3701_v42 = vpack.c.bf16 %v3353_v31, %v3351_v29  ;;  %4121 = vmatpush2.bf16.msra.mxu0 %v5681_v23  ;;  %v3159_v41 = vadd.f32 %v3158_v33, %v6716_v1  ;;  %4250 = vmatpush2.bf16.msra.mxu1 %v5681_v23 }
 0x597   : > { %v3160_v10 = vpop.f32.mrf.mxu0  ;;  %v3289_v49 = vpop.f32.mrf.mxu1  ;;  %4122 = vmatprep.subr.bf16.mxu0 %v5686_v27  ;;  %v3288_v50 = vadd.f32 %v3287_v35, %v6716_v1  ;;  %4251 = vmatprep.subr.bf16.mxu1 %v5686_v27  ;;  %v3322_v63 = vmax.f32 %v3157_v52, 0.0  ;;  %v3354_v0 = vmax.f32 %v3286_v9, 0.0 }
 0x598   : > { %v3161_v51 = vadd.f32 %v3160_v10, %v6719_v2  ;;  %v3290_v40 = vadd.f32 %v3289_v49, %v6719_v2  ;;  %3667 = vmatprep.mubr.bf16.mxu0 %v3404_v39  ;;  %3796 = vmatprep.mubr.bf16.mxu1 %v3701_v42  ;;  %v3323_v58 = vmax.f32 %v3159_v41, 0.0 }
 0x599   : > { %v3162_v53 = vpop.f32.mrf.mxu0  ;;  %v3291_v54 = vpop.f32.mrf.mxu1  ;;  %3668 = vmatmul.mubr.bf16.gmra.mxu0 %v3403_v44  ;;  %3797 = vmatmul.mubr.bf16.gmra.mxu1 %v3700_v45  ;;  %v3355_v59 = vmax.f32 %v3288_v50, 0.0 }
 0x59a   : > { %v3163_v55 = vadd.f32 %v3162_v53, %v6716_v1  ;;  %v3292_v47 = vadd.f32 %v3291_v54, %v6716_v1  ;;  %4123 = vmatpush2.bf16.msra.mxu0 %v5684_v43  ;;  %v3324_v56 = vmax.f32 %v3161_v51, 0.0  ;;  %v3356_v57 = vmax.f32 %v3290_v40, 0.0  ;;  %4252 = vmatpush2.bf16.msra.mxu1 %v5684_v43  ;;  %v5689_v1 = vld [vmem:[#allocation5 + $0x7a4] ss:$8 sps:$4 sm:$0xff]  }
 0x59b   : > { %4124 = vmatprep.subr.bf16.mxu0 %v5689_v1  ;;  %4253 = vmatprep.subr.bf16.mxu1 %v5689_v1 }
 0x59c   : > { %v3325_v62 = vmax.f32 %v3163_v55, 0.0  ;;  %v3357_v60 = vmax.f32 %v3292_v47, 0.0  ;;  %v3405_v3 = vpack.c.bf16 %v3324_v56, %v3322_v63  ;;  %v3702_v4 = vpack.c.bf16 %v3356_v57, %v3354_v0 }
 0x59e   : > { %v3406_v2 = vpack.c.bf16 %v3325_v62, %v3323_v58  ;;  %v3703_v61 = vpack.c.bf16 %v3357_v60, %v3355_v59  ;;  %4125 = vmatpush2.bf16.msra.mxu0 %v5687_v5  ;;  %4254 = vmatpush2.bf16.msra.mxu1 %v5687_v5 }
 0x59f   : > { %4126 = vmatprep.subr.bf16.mxu0 %v5692_v6  ;;  %4255 = vmatprep.subr.bf16.mxu1 %v5692_v6 }
 0x5a0   : > { %3677 = vmatprep.mubr.bf16.mxu0 %v3406_v2  ;;  %3806 = vmatprep.mubr.bf16.mxu1 %v3703_v61 }
 0x5a1   : > { %3678 = vmatmul.mubr.bf16.gmra.mxu0 %v3405_v3  ;;  %3807 = vmatmul.mubr.bf16.gmra.mxu1 %v3702_v4 }
 0x5a2   : > { %4127 = vmatpush2.bf16.msra.mxu0 %v5690_v7  ;;  %4256 = vmatpush2.bf16.msra.mxu1 %v5690_v7 }
 0x5a3   : > { %4128 = vmatprep.subr.bf16.mxu0 %v5695_v36  ;;  %4257 = vmatprep.subr.bf16.mxu1 %v5695_v36 }
 0x5a6   : > { %4129 = vmatpush2.bf16.msra.mxu0 %v5693_v8  ;;  %4258 = vmatpush2.bf16.msra.mxu1 %v5693_v8 }
 0x629   : > { %v3609_v13 = vpop.f32.mrf.mxu0  ;;  %v3738_v46 = vpop.f32.mrf.mxu1 }
 0x62a   : > { %v3610_v37 = vadd.f32 %v3609_v13, %v6794_v16  ;;  %v3739_v24 = vadd.f32 %v3738_v46, %v6794_v16 }
 0x62b   : > { %v3611_v17 = vpop.f32.mrf.mxu0  ;;  %v3740_v18 = vpop.f32.mrf.mxu1 }
 0x62c   : > { %v3612_v20 = vadd.f32 %v3611_v17, %v6789_v15  ;;  %v3741_v21 = vadd.f32 %v3740_v18, %v6789_v15  ;;  %v3817_v42 = vmax.f32 %v3610_v37, 0.0  ;;  %v3849_v43 = vmax.f32 %v3739_v24, 0.0 }
 0x62d   : > { %v3613_v11 = vpop.f32.mrf.mxu0  ;;  %v3742_v19 = vpop.f32.mrf.mxu1 }
 0x62e   : > { %v3614_v22 = vadd.f32 %v3613_v11, %v6794_v16  ;;  %v3743_v23 = vadd.f32 %v3742_v19, %v6794_v16  ;;  %v3818_v38 = vmax.f32 %v3612_v20, 0.0  ;;  %v3850_v33 = vmax.f32 %v3741_v21, 0.0 }
 0x62f   : > { %v3615_v25 = vpop.f32.mrf.mxu0  ;;  %v3744_v26 = vpop.f32.mrf.mxu1 }
 0x630   : > { %v3616_v27 = vadd.f32 %v3615_v25, %v6789_v15  ;;  %v3745_v28 = vadd.f32 %v3744_v26, %v6789_v15  ;;  %v3819_v29 = vmax.f32 %v3614_v22, 0.0  ;;  %v3851_v30 = vmax.f32 %v3743_v23, 0.0 }
 0x631   : > { %v3619_v31 = vpop.f32.mrf.mxu0  ;;  %v3748_v32 = vpop.f32.mrf.mxu1 }
 0x632   : > { %v3820_v35 = vmax.f32 %v3616_v27, 0.0  ;;  %v3852_v39 = vmax.f32 %v3745_v28, 0.0  ;;  %v3914_v49 = vpack.c.bf16 %v3819_v29, %v3817_v42  ;;  %v4211_v50 = vpack.c.bf16 %v3851_v30, %v3849_v43 }
 0x633   : > { %v3621_v44 = vpop.f32.mrf.mxu0  ;;  %v3750_v45 = vpop.f32.mrf.mxu1  ;;  %v3620_v55 = vadd.f32 %v3619_v31, %v6794_v16  ;;  %v3749_v47 = vadd.f32 %v3748_v32, %v6794_v16 }
 0x634   : > { %v3915_v41 = vpack.c.bf16 %v3820_v35, %v3818_v38  ;;  %v4212_v10 = vpack.c.bf16 %v3852_v39, %v3850_v33  ;;  %v3622_v51 = vadd.f32 %v3621_v44, %v6789_v15  ;;  %v3751_v9 = vadd.f32 %v3750_v45, %v6789_v15 }
 0x635   : > { %v3623_v40 = vpop.f32.mrf.mxu0  ;;  %v3752_v52 = vpop.f32.mrf.mxu1  ;;  %v3821_v1 = vmax.f32 %v3620_v55, 0.0  ;;  %v3853_v5 = vmax.f32 %v3749_v47, 0.0 }
 0x636   : > { %v3624_v53 = vadd.f32 %v3623_v40, %v6794_v16  ;;  %v3753_v54 = vadd.f32 %v3752_v52, %v6794_v16  ;;  %4130 = vmatprep.mubr.bf16.mxu0 %v3915_v41  ;;  %4259 = vmatprep.mubr.bf16.mxu1 %v4212_v10  ;;  %v3822_v2 = vmax.f32 %v3622_v51, 0.0  ;;  %v3854_v61 = vmax.f32 %v3751_v9, 0.0 }
 0x637   : > { %v3625_v56 = vpop.f32.mrf.mxu0  ;;  %v3754_v57 = vpop.f32.mrf.mxu1  ;;  %4131 = vmatmul.mubr.bf16.vlgmr.msra.gmra.mxu0 %v3914_v49  ;;  %4260 = vmatmul.mubr.bf16.vlgmr.msra.gmra.mxu1 %v4211_v50 }
 0x638   : > { %v3626_v58 = vadd.f32 %v3625_v56, %v6789_v15  ;;  %v3755_v59 = vadd.f32 %v3754_v57, %v6789_v15  ;;  %v3823_v62 = vmax.f32 %v3624_v53, 0.0  ;;  %v3855_v60 = vmax.f32 %v3753_v54, 0.0 }
 0x639   : > { %v3629_v63 = vpop.f32.mrf.mxu0  ;;  %v3758_v0 = vpop.f32.mrf.mxu1 }
 0x63a   : > { %v3824_v3 = vmax.f32 %v3626_v58, 0.0  ;;  %v3856_v4 = vmax.f32 %v3755_v59, 0.0  ;;  %v3916_v12 = vpack.c.bf16 %v3823_v62, %v3821_v1  ;;  %v4213_v13 = vpack.c.bf16 %v3855_v60, %v3853_v5 }
 0x63b   : > { %v3631_v6 = vpop.f32.mrf.mxu0  ;;  %v3760_v7 = vpop.f32.mrf.mxu1  ;;  %v3630_v21 = vadd.f32 %v3629_v63, %v6794_v16  ;;  %v3759_v22 = vadd.f32 %v3758_v0, %v6794_v16 }
 0x63c   : > { %v3917_v36 = vpack.c.bf16 %v3824_v3, %v3822_v2  ;;  %v4214_v8 = vpack.c.bf16 %v3856_v4, %v3854_v61  ;;  %v3632_v46 = vadd.f32 %v3631_v6, %v6789_v15  ;;  %v3761_v11 = vadd.f32 %v3760_v7, %v6789_v15 }
 0x63d   : > { %v3633_v17 = vpop.f32.mrf.mxu0  ;;  %v3762_v18 = vpop.f32.mrf.mxu1  ;;  %v3825_v33 = vmax.f32 %v3630_v21, 0.0  ;;  %v3857_v35 = vmax.f32 %v3759_v22, 0.0 }
 0x63e   : > { %v3634_v19 = vadd.f32 %v3633_v17, %v6794_v16  ;;  %v3763_v20 = vadd.f32 %v3762_v18, %v6794_v16  ;;  %4140 = vmatprep.mubr.bf16.mxu0 %v3917_v36  ;;  %4269 = vmatprep.mubr.bf16.mxu1 %v4214_v8  ;;  %v3826_v30 = vmax.f32 %v3632_v46, 0.0  ;;  %v3858_v31 = vmax.f32 %v3761_v11, 0.0 }
 0x63f   : > { %v3635_v23 = vpop.f32.mrf.mxu0  ;;  %v3764_v37 = vpop.f32.mrf.mxu1  ;;  %4141 = vmatmul.mubr.bf16.gmra.mxu0 %v3916_v12  ;;  %4270 = vmatmul.mubr.bf16.gmra.mxu1 %v4213_v13 }
 0x640   : > { %v3636_v24 = vadd.f32 %v3635_v23, %v6789_v15  ;;  %v3765_v25 = vadd.f32 %v3764_v37, %v6789_v15  ;;  %v3827_v26 = vmax.f32 %v3634_v19, 0.0  ;;  %v3859_v27 = vmax.f32 %v3763_v20, 0.0 }
 0x641   : > { %v3639_v28 = vpop.f32.mrf.mxu0  ;;  %v3768_v29 = vpop.f32.mrf.mxu1 }
 0x642   : > { %v3828_v32 = vmax.f32 %v3636_v24, 0.0  ;;  %v3860_v38 = vmax.f32 %v3765_v25, 0.0  ;;  %v3918_v45 = vpack.c.bf16 %v3827_v26, %v3825_v33  ;;  %v4215_v41 = vpack.c.bf16 %v3859_v27, %v3857_v35 }
 0x643   : > { %v3641_v39 = vpop.f32.mrf.mxu0  ;;  %v3770_v42 = vpop.f32.mrf.mxu1  ;;  %v3640_v9 = vadd.f32 %v3639_v28, %v6794_v16  ;;  %v3769_v53 = vadd.f32 %v3768_v29, %v6794_v16 }
 0x644   : > { %v3919_v43 = vpack.c.bf16 %v3828_v32, %v3826_v30  ;;  %v4216_v44 = vpack.c.bf16 %v3860_v38, %v3858_v31  ;;  %v3642_v10 = vadd.f32 %v3641_v39, %v6789_v15  ;;  %v3771_v51 = vadd.f32 %v3770_v42, %v6789_v15 }
 0x645   : > { %v3643_v49 = vpop.f32.mrf.mxu0  ;;  %v3772_v50 = vpop.f32.mrf.mxu1  ;;  %v3829_v61 = vmax.f32 %v3640_v9, 0.0  ;;  %v3861_v3 = vmax.f32 %v3769_v53, 0.0 }
 0x646   : > { %v3644_v40 = vadd.f32 %v3643_v49, %v6794_v16  ;;  %v3773_v52 = vadd.f32 %v3772_v50, %v6794_v16  ;;  %4150 = vmatprep.mubr.bf16.mxu0 %v3919_v43  ;;  %4279 = vmatprep.mubr.bf16.mxu1 %v4216_v44  ;;  %v3830_v60 = vmax.f32 %v3642_v10, 0.0  ;;  %v3862_v63 = vmax.f32 %v3771_v51, 0.0 }
 0x647   : > { %v3645_v54 = vpop.f32.mrf.mxu0  ;;  %v3774_v55 = vpop.f32.mrf.mxu1  ;;  %4151 = vmatmul.mubr.bf16.gmra.mxu0 %v3918_v45  ;;  %4280 = vmatmul.mubr.bf16.gmra.mxu1 %v4215_v41 }
 0x648   : > { %v3646_v47 = vadd.f32 %v3645_v54, %v6789_v15  ;;  %v3775_v56 = vadd.f32 %v3774_v55, %v6789_v15  ;;  %v3831_v57 = vmax.f32 %v3644_v40, 0.0  ;;  %v3863_v58 = vmax.f32 %v3773_v52, 0.0 }
 0x649   : > { %v3649_v59 = vpop.f32.mrf.mxu0  ;;  %v3778_v62 = vpop.f32.mrf.mxu1 }
 0x64a   : > { %v3832_v0 = vmax.f32 %v3646_v47, 0.0  ;;  %v3864_v2 = vmax.f32 %v3775_v56, 0.0  ;;  %v3920_v7 = vpack.c.bf16 %v3831_v57, %v3829_v61  ;;  %v4217_v36 = vpack.c.bf16 %v3863_v58, %v3861_v3 }
 0x64b   : > { %v3651_v4 = vpop.f32.mrf.mxu0  ;;  %v3780_v1 = vpop.f32.mrf.mxu1  ;;  %v3650_v11 = vadd.f32 %v3649_v59, %v6794_v16  ;;  %v3779_v19 = vadd.f32 %v3778_v62, %v6794_v16 }
 0x64c   : > { %v3921_v5 = vpack.c.bf16 %v3832_v0, %v3830_v60  ;;  %v4218_v6 = vpack.c.bf16 %v3864_v2, %v3862_v63  ;;  %v3652_v8 = vadd.f32 %v3651_v4, %v6789_v15  ;;  %v3781_v46 = vadd.f32 %v3780_v1, %v6789_v15 }
 0x64d   : > { %v3653_v12 = vpop.f32.mrf.mxu0  ;;  %v3782_v13 = vpop.f32.mrf.mxu1  ;;  %v3833_v31 = vmax.f32 %v3650_v11, 0.0  ;;  %v3865_v32 = vmax.f32 %v3779_v19, 0.0 }
 0x64e   : > { %v3654_v17 = vadd.f32 %v3653_v12, %v6794_v16  ;;  %v3783_v18 = vadd.f32 %v3782_v13, %v6794_v16  ;;  %4160 = vmatprep.mubr.bf16.mxu0 %v3921_v5  ;;  %4289 = vmatprep.mubr.bf16.mxu1 %v4218_v6  ;;  %v3834_v27 = vmax.f32 %v3652_v8, 0.0  ;;  %v3866_v28 = vmax.f32 %v3781_v46, 0.0 }
 0x64f   : > { %v3655_v20 = vpop.f32.mrf.mxu0  ;;  %v3784_v21 = vpop.f32.mrf.mxu1  ;;  %4161 = vmatmul.mubr.bf16.gmra.mxu0 %v3920_v7  ;;  %4290 = vmatmul.mubr.bf16.gmra.mxu1 %v4217_v36 }
 0x650   : > { %v3656_v22 = vadd.f32 %v3655_v20, %v6789_v15  ;;  %v3785_v23 = vadd.f32 %v3784_v21, %v6789_v15  ;;  %v3835_v37 = vmax.f32 %v3654_v17, 0.0  ;;  %v3867_v24 = vmax.f32 %v3783_v18, 0.0 }
 0x651   : > { %v3659_v25 = vpop.f32.mrf.mxu0  ;;  %v3788_v26 = vpop.f32.mrf.mxu1 }
 0x652   : > { %v3836_v29 = vmax.f32 %v3656_v22, 0.0  ;;  %v3868_v30 = vmax.f32 %v3785_v23, 0.0  ;;  %v3922_v42 = vpack.c.bf16 %v3835_v37, %v3833_v31  ;;  %v4219_v43 = vpack.c.bf16 %v3867_v24, %v3865_v32 }
 0x653   : > { %v3661_v38 = vpop.f32.mrf.mxu0  ;;  %v3790_v33 = vpop.f32.mrf.mxu1  ;;  %v3660_v51 = vadd.f32 %v3659_v25, %v6794_v16  ;;  %v3789_v40 = vadd.f32 %v3788_v26, %v6794_v16 }
 0x654   : > { %v3923_v35 = vpack.c.bf16 %v3836_v29, %v3834_v27  ;;  %v4220_v39 = vpack.c.bf16 %v3868_v30, %v3866_v28  ;;  %v3662_v44 = vadd.f32 %v3661_v38, %v6789_v15  ;;  %v3791_v10 = vadd.f32 %v3790_v33, %v6789_v15 }
 0x655   : > { %v3663_v45 = vpop.f32.mrf.mxu0  ;;  %v3792_v41 = vpop.f32.mrf.mxu1  ;;  %v3837_v63 = vmax.f32 %v3660_v51, 0.0  ;;  %v3869_v0 = vmax.f32 %v3789_v40, 0.0 }
 0x656   : > { %v3664_v49 = vadd.f32 %v3663_v45, %v6794_v16  ;;  %v3793_v50 = vadd.f32 %v3792_v41, %v6794_v16  ;;  %4170 = vmatprep.mubr.bf16.mxu0 %v3923_v35  ;;  %4299 = vmatprep.mubr.bf16.mxu1 %v4220_v39  ;;  %v3838_v58 = vmax.f32 %v3662_v44, 0.0  ;;  %v3870_v59 = vmax.f32 %v3791_v10, 0.0 }
 0x657   : > { %v3665_v52 = vpop.f32.mrf.mxu0  ;;  %v3794_v9 = vpop.f32.mrf.mxu1  ;;  %4171 = vmatmul.mubr.bf16.gmra.mxu0 %v3922_v42  ;;  %4300 = vmatmul.mubr.bf16.gmra.mxu1 %v4219_v43 }
 0x658   : > { %v3666_v53 = vadd.f32 %v3665_v52, %v6789_v15  ;;  %v3795_v54 = vadd.f32 %v3794_v9, %v6789_v15  ;;  %v3839_v55 = vmax.f32 %v3664_v49, 0.0  ;;  %v3871_v47 = vmax.f32 %v3793_v50, 0.0 }
 0x659   : > { %v3669_v56 = vpop.f32.mrf.mxu0  ;;  %v3798_v57 = vpop.f32.mrf.mxu1 }
 0x65a   : > { %v3840_v62 = vmax.f32 %v3666_v53, 0.0  ;;  %v3872_v60 = vmax.f32 %v3795_v54, 0.0  ;;  %v3924_v1 = vpack.c.bf16 %v3839_v55, %v3837_v63  ;;  %v4221_v5 = vpack.c.bf16 %v3871_v47, %v3869_v0 }
 0x65b   : > { %v3671_v2 = vpop.f32.mrf.mxu0  ;;  %v3800_v61 = vpop.f32.mrf.mxu1  ;;  %v3670_v46 = vadd.f32 %v3669_v56, %v6794_v16  ;;  %v3799_v17 = vadd.f32 %v3798_v57, %v6794_v16  ;;  %v3932_v63 = vsub.s32 7, %v6345_v34 }
 0x65c   : > { %v3925_v3 = vpack.c.bf16 %v3840_v62, %v3838_v58  ;;  %v4222_v4 = vpack.c.bf16 %v3872_v60, %v3870_v59  ;;  %v3672_v6 = vadd.f32 %v3671_v2, %v6789_v15  ;;  %v3801_v8 = vadd.f32 %v3800_v61, %v6789_v15 }
 0x65d   : > { %v3673_v7 = vpop.f32.mrf.mxu0  ;;  %v3802_v36 = vpop.f32.mrf.mxu1  ;;  %v3841_v28 = vmax.f32 %v3670_v46, 0.0  ;;  %v3873_v29 = vmax.f32 %v3799_v17, 0.0  ;;  %v6865_v0 = vrot.slane %v6786_v14, %v3932_v63 }
 0x65e   : > { %v3674_v12 = vadd.f32 %v3673_v7, %v6794_v16  ;;  %v3803_v13 = vadd.f32 %v3802_v36, %v6794_v16  ;;  %4180 = vmatprep.mubr.bf16.mxu0 %v3925_v3  ;;  %4309 = vmatprep.mubr.bf16.mxu1 %v4222_v4  ;;  %v3842_v24 = vmax.f32 %v3672_v6, 0.0  ;;  %v3874_v25 = vmax.f32 %v3801_v8, 0.0 }
 0x65f   : > { %v3675_v18 = vpop.f32.mrf.mxu0  ;;  %v3804_v11 = vpop.f32.mrf.mxu1  ;;  %4181 = vmatmul.mubr.bf16.gmra.mxu0 %v3924_v1  ;;  %4310 = vmatmul.mubr.bf16.gmra.mxu1 %v4221_v5 }
 0x660   : > { %v3676_v19 = vadd.f32 %v3675_v18, %v6789_v15  ;;  %v3805_v20 = vadd.f32 %v3804_v11, %v6789_v15  ;;  %v3843_v21 = vmax.f32 %v3674_v12, 0.0  ;;  %v3875_v22 = vmax.f32 %v3803_v13, 0.0 }
 0x661   : > { %v3679_v23 = vpop.f32.mrf.mxu0  ;;  %v3808_v37 = vpop.f32.mrf.mxu1 }
 0x662   : > { %v3844_v26 = vmax.f32 %v3676_v19, 0.0  ;;  %v3876_v27 = vmax.f32 %v3805_v20, 0.0  ;;  %v3926_v33 = vpack.c.bf16 %v3843_v21, %v3841_v28  ;;  %v4223_v35 = vpack.c.bf16 %v3875_v22, %v3873_v29 }
 0x663   : > { %v3681_v30 = vpop.f32.mrf.mxu0  ;;  %v3810_v31 = vpop.f32.mrf.mxu1  ;;  %v3680_v10 = vadd.f32 %v3679_v23, %v6794_v16  ;;  %v3809_v49 = vadd.f32 %v3808_v37, %v6794_v16 }
 0x664   : > { %v3927_v32 = vpack.c.bf16 %v3844_v26, %v3842_v24  ;;  %v4224_v38 = vpack.c.bf16 %v3876_v27, %v3874_v25  ;;  %v3682_v39 = vadd.f32 %v3681_v30, %v6789_v15  ;;  %v3811_v44 = vadd.f32 %v3810_v31, %v6789_v15 }
 0x665   : > { %v3683_v42 = vpop.f32.mrf.mxu0  ;;  %v3812_v43 = vpop.f32.mrf.mxu1  ;;  %v3845_v57 = vmax.f32 %v3680_v10, 0.0  ;;  %v3877_v58 = vmax.f32 %v3809_v49, 0.0 }
 0x666   : > { %v3684_v45 = vadd.f32 %v3683_v42, %v6794_v16  ;;  %v3813_v41 = vadd.f32 %v3812_v43, %v6794_v16  ;;  %4190 = vmatprep.mubr.bf16.mxu0 %v3927_v32  ;;  %4319 = vmatprep.mubr.bf16.mxu1 %v4224_v38  ;;  %v3846_v54 = vmax.f32 %v3682_v39, 0.0  ;;  %v3878_v55 = vmax.f32 %v3811_v44, 0.0 }
 0x667   : > { %v3685_v50 = vpop.f32.mrf.mxu0  ;;  %v3814_v51 = vpop.f32.mrf.mxu1  ;;  %4191 = vmatmul.mubr.bf16.gmra.mxu0 %v3926_v33  ;;  %4320 = vmatmul.mubr.bf16.gmra.mxu1 %v4223_v35 }
 0x668   : > { %v3686_v40 = vadd.f32 %v3685_v50, %v6789_v15  ;;  %v3815_v52 = vadd.f32 %v3814_v51, %v6789_v15  ;;  %v3847_v9 = vmax.f32 %v3684_v45, 0.0  ;;  %v3879_v53 = vmax.f32 %v3813_v41, 0.0 }
 0x669   : > { %v6862_v15 = vrot.slane %v6791_v48, %v3932_v63 }
 0x66a   : > { %v3848_v47 = vmax.f32 %v3686_v40, 0.0  ;;  %v3880_v56 = vmax.f32 %v3815_v52, 0.0  ;;  %v3928_v60 = vpack.c.bf16 %v3847_v9, %v3845_v57  ;;  %v4225_v16 = vpack.c.bf16 %v3879_v53, %v3877_v58 }
 0x66c   : > { %v3929_v59 = vpack.c.bf16 %v3848_v47, %v3846_v54  ;;  %v4226_v62 = vpack.c.bf16 %v3880_v56, %v3878_v55 }
 0x66e   : > { %4200 = vmatprep.mubr.bf16.mxu0 %v3929_v59  ;;  %4329 = vmatprep.mubr.bf16.mxu1 %v4226_v62 }
 0x66f   : > { %4201 = vmatmul.mubr.bf16.gmra.mxu0 %v3928_v60  ;;  %4330 = vmatmul.mubr.bf16.gmra.mxu1 %v4225_v16 }
 0x6f7   : > { %v4132_v2 = vpop.f32.mrf.mxu0  ;;  %v4261_v61 = vpop.f32.mrf.mxu1 }
 0x6f8   : > { %v4133_v3 = vadd.f32 %v4132_v2, %v6862_v15  ;;  %v4262_v4 = vadd.f32 %v4261_v61, %v6862_v15 }
 0x6f9   : > { %v4134_v1 = vpop.f32.mrf.mxu0  ;;  %v4263_v5 = vpop.f32.mrf.mxu1 }
 0x6fa   : > { %v5165_v6 = vmul.f32 -1.442695, %v4133_v3  ;;  %v5197_v7 = vmul.f32 -1.442695, %v4262_v4  ;;  %v4135_v36 = vadd.f32 %v4134_v1, %v6865_v0  ;;  %v4264_v34 = vadd.f32 %v4263_v5, %v6865_v0 }
 0x6fb   : > { %v4136_v8 = vpop.f32.mrf.mxu0  ;;  %v4265_v48 = vpop.f32.mrf.mxu1 }
 0x6fc   : > { %5696 = vpow2.f32 %v5165_v6  ;;  %v5166_v12 = vmul.f32 -1.442695, %v4135_v36  ;;  %v5198_v14 = vmul.f32 -1.442695, %v4264_v34  ;;  %v4137_v13 = vadd.f32 %v4136_v8, %v6862_v15 }
 0x6fd   : > { %5698 = vpow2.f32 %v5197_v7  ;;  %v4266_v46 = vadd.f32 %v4265_v48, %v6862_v15  ;;  %v4138_v17 = vpop.f32.mrf.mxu0  ;;  %v4267_v18 = vpop.f32.mrf.mxu1 }
 0x6fe   : > { %5700 = vpow2.f32 %v5166_v12  ;;  %v5167_v11 = vmul.f32 -1.442695, %v4137_v13  ;;  %v4139_v19 = vadd.f32 %v4138_v17, %v6865_v0  ;;  %v4268_v20 = vadd.f32 %v4267_v18, %v6865_v0 }
 0x6ff   : > { %5702 = vpow2.f32 %v5198_v14  ;;  %v5199_v21 = vmul.f32 -1.442695, %v4266_v46  ;;  %v4142_v22 = vpop.f32.mrf.mxu0  ;;  %v4271_v23 = vpop.f32.mrf.mxu1 }
 0x700   : > { %5704 = vpow2.f32 %v5167_v11  ;;  %v5168_v37 = vmul.f32 -1.442695, %v4139_v19  ;;  %v5200_v24 = vmul.f32 -1.442695, %v4268_v20  ;;  %v4143_v25 = vadd.f32 %v4142_v22, %v6862_v15 }
 0x701   : > { %5706 = vpow2.f32 %v5199_v21  ;;  %v4272_v26 = vadd.f32 %v4271_v23, %v6862_v15  ;;  %v4144_v27 = vpop.f32.mrf.mxu0  ;;  %v4273_v28 = vpop.f32.mrf.mxu1 }
 0x702   : > { %5708 = vpow2.f32 %v5168_v37  ;;  %v5169_v29 = vmul.f32 -1.442695, %v4143_v25  ;;  %v4145_v30 = vadd.f32 %v4144_v27, %v6865_v0  ;;  %v4274_v31 = vadd.f32 %v4273_v28, %v6865_v0 }
 0x703   : > { %5710 = vpow2.f32 %v5200_v24  ;;  %v5201_v32 = vmul.f32 -1.442695, %v4272_v26  ;;  %v4146_v38 = vpop.f32.mrf.mxu0  ;;  %v4275_v33 = vpop.f32.mrf.mxu1 }
 0x704   : > { %5712 = vpow2.f32 %v5169_v29  ;;  %v5170_v35 = vmul.f32 -1.442695, %v4145_v30  ;;  %v5202_v39 = vmul.f32 -1.442695, %v4274_v31  ;;  %v4147_v42 = vadd.f32 %v4146_v38, %v6862_v15 }
 0x705   : > { %5714 = vpow2.f32 %v5201_v32  ;;  %v4276_v43 = vadd.f32 %v4275_v33, %v6862_v15  ;;  %v4148_v44 = vpop.f32.mrf.mxu0  ;;  %v4277_v45 = vpop.f32.mrf.mxu1 }
 0x706   : > { %5716 = vpow2.f32 %v5170_v35  ;;  %v5171_v41 = vmul.f32 -1.442695, %v4147_v42  ;;  %v4149_v10 = vadd.f32 %v4148_v44, %v6865_v0  ;;  %v4278_v49 = vadd.f32 %v4277_v45, %v6865_v0 }
 0x707   : > { %5718 = vpow2.f32 %v5202_v39  ;;  %v5203_v50 = vmul.f32 -1.442695, %v4276_v43  ;;  %v4152_v51 = vpop.f32.mrf.mxu0  ;;  %v4281_v40 = vpop.f32.mrf.mxu1 }
 0x708   : > { %5720 = vpow2.f32 %v5171_v41  ;;  %v5172_v52 = vmul.f32 -1.442695, %v4149_v10  ;;  %v5204_v9 = vmul.f32 -1.442695, %v4278_v49  ;;  %v4153_v11 = vadd.f32 %v4152_v51, %v6862_v15 }
 0x709   : > { %v5697_v53 = vpop.eup %5696  ;;  %5722 = vpow2.f32 %v5203_v50  ;;  %v4154_v54 = vpop.f32.mrf.mxu0  ;;  %v4282_v22 = vadd.f32 %v4281_v40, %v6862_v15 }
 0x70a   : > { %v4283_v55 = vpop.f32.mrf.mxu1  ;;  %v5699_v47 = vpop.eup %5698  ;;  %v4436_v56 = vadd.f32 1.0, %v5697_v53  ;;  %5724 = vpow2.f32 %v5172_v52  ;;  %v4155_v24 = vadd.f32 %v4154_v54, %v6865_v0  ;;  %v5173_v31 = vmul.f32 -1.442695, %v4153_v11 }
 0x70b   : > { %v5701_v57 = vpop.eup %5700  ;;  %v4628_v58 = vadd.f32 1.0, %v5699_v47  ;;  %5726 = vpow2.f32 %v5204_v9  ;;  %v4156_v59 = vpop.f32.mrf.mxu0  ;;  %v4284_v27 = vadd.f32 %v4283_v55, %v6865_v0  ;;  %v5205_v39 = vmul.f32 -1.442695, %v4282_v22 }
 0x70c   : > { %v5703_v62 = vpop.eup %5702  ;;  %5728 = vrcp.f32 %v4436_v56  ;;  %v4437_v60 = vadd.f32 1.0, %v5701_v57  ;;  %v4285_v16 = vpop.f32.mrf.mxu1  ;;  %v4157_v32 = vadd.f32 %v4156_v59, %v6862_v15  ;;  %v5174_v44 = vmul.f32 -1.442695, %v4155_v24 }
 0x70d   : > { %v5705_v63 = vpop.eup %5704  ;;  %5730 = vrcp.f32 %v4628_v58  ;;  %v4629_v2 = vadd.f32 1.0, %v5703_v62  ;;  %v4158_v5 = vpop.f32.mrf.mxu0  ;;  %v4286_v42 = vadd.f32 %v4285_v16, %v6862_v15  ;;  %v5206_v10 = vmul.f32 -1.442695, %v4284_v27 }
 0x70e   : > { %v5707_v61 = vpop.eup %5706  ;;  %5732 = vrcp.f32 %v4437_v60  ;;  %v4438_v3 = vadd.f32 1.0, %v5705_v63  ;;  %v4287_v36 = vpop.f32.mrf.mxu1  ;;  %v4159_v45 = vadd.f32 %v4158_v5, %v6865_v0  ;;  %v5175_v40 = vmul.f32 -1.442695, %v4157_v32 }
 0x70f   : > { %v5709_v4 = vpop.eup %5708  ;;  %5734 = vrcp.f32 %v4629_v2  ;;  %v4630_v1 = vadd.f32 1.0, %v5707_v61  ;;  %v4162_v46 = vpop.f32.mrf.mxu0  ;;  %v4288_v49 = vadd.f32 %v4287_v36, %v6865_v0  ;;  %v5207_v54 = vmul.f32 -1.442695, %v4286_v42 }
 0x710   : > { %v5711_v6 = vpop.eup %5710  ;;  %5736 = vrcp.f32 %v4438_v3  ;;  %v4439_v7 = vadd.f32 1.0, %v5709_v4  ;;  %v4291_v19 = vpop.f32.mrf.mxu1  ;;  %v4163_v52 = vadd.f32 %v4162_v46, %v6862_v15  ;;  %v5176_v56 = vmul.f32 -1.442695, %v4159_v45 }
 0x711   : > { %v5713_v34 = vpop.eup %5712  ;;  %5738 = vrcp.f32 %v4630_v1  ;;  %v4631_v8 = vadd.f32 1.0, %v5711_v6  ;;  %v4164_v28 = vpop.f32.mrf.mxu0  ;;  %v4292_v55 = vadd.f32 %v4291_v19, %v6862_v15  ;;  %v5208_v59 = vmul.f32 -1.442695, %v4288_v49 }
 0x712   : > { %v5715_v48 = vpop.eup %5714  ;;  %5740 = vrcp.f32 %v4439_v7  ;;  %v4440_v12 = vadd.f32 1.0, %v5713_v34  ;;  %v4293_v38 = vpop.f32.mrf.mxu1  ;;  %v4165_v57 = vadd.f32 %v4164_v28, %v6865_v0  ;;  %v5177_v63 = vmul.f32 -1.442695, %v4163_v52 }
 0x713   : > { %v5717_v14 = vpop.eup %5716  ;;  %5742 = vrcp.f32 %v4631_v8  ;;  %v4632_v13 = vadd.f32 1.0, %v5715_v48  ;;  %v4166_v50 = vpop.f32.mrf.mxu0  ;;  %v4294_v62 = vadd.f32 %v4293_v38, %v6865_v0  ;;  %v5209_v4 = vmul.f32 -1.442695, %v4292_v55 }
 0x714   : > { %v5719_v17 = vpop.eup %5718  ;;  %5744 = vrcp.f32 %v4440_v12  ;;  %v4441_v18 = vadd.f32 1.0, %v5717_v14  ;;  %v4295_v9 = vpop.f32.mrf.mxu1  ;;  %v4167_v2 = vadd.f32 %v4166_v50, %v6862_v15  ;;  %v5178_v6 = vmul.f32 -1.442695, %v4165_v57 }
 0x715   : > { %v5721_v20 = vpop.eup %5720  ;;  %5746 = vrcp.f32 %v4632_v13  ;;  %v4633_v21 = vadd.f32 1.0, %v5719_v17  ;;  %v4168_v60 = vpop.f32.mrf.mxu0  ;;  %v4296_v1 = vadd.f32 %v4295_v9, %v6862_v15  ;;  %v5210_v34 = vmul.f32 -1.442695, %v4294_v62 }
 0x716   : > { %v5723_v23 = vpop.eup %5722  ;;  %5748 = vrcp.f32 %v4441_v18  ;;  %v4442_v37 = vadd.f32 1.0, %v5721_v20  ;;  %v4297_v61 = vpop.f32.mrf.mxu1  ;;  %v4169_v7 = vadd.f32 %v4168_v60, %v6865_v0  ;;  %v5179_v14 = vmul.f32 -1.442695, %v4167_v2 }
 0x717   : > { %v5725_v25 = vpop.eup %5724  ;;  %5750 = vrcp.f32 %v4633_v21  ;;  %v4634_v26 = vadd.f32 1.0, %v5723_v23  ;;  %v4298_v8 = vadd.f32 %v4297_v61, %v6865_v0  ;;  %v6913_v48 = vpop.f32.mrf.mxu0  ;;  %v5211_v17 = vmul.f32 -1.442695, %v4296_v1 }
 0x718   : > { %v5727_v29 = vpop.eup %5726  ;;  %5752 = vrcp.f32 %v4442_v37  ;;  %v4443_v30 = vadd.f32 1.0, %v5725_v25  ;;  %v6916_v13 = vpop.f32.mrf.mxu1  ;;  %v5180_v11 = vmul.f32 -1.442695, %v4169_v7  ;;  %v4173_v55 = vadd.f32 %v6913_v48, %v6862_v15 }
 0x719   : > { %v5729_v33 = vpop.eup %5728  ;;  %5754 = vrcp.f32 %v4634_v26  ;;  %v4635_v35 = vadd.f32 1.0, %v5727_v29  ;;  %v5212_v20 = vmul.f32 -1.442695, %v4298_v8  ;;  %v4174_v21 = vpop.f32.mrf.mxu0 }
 0x71a   : > { %v5731_v43 = vpop.eup %5730  ;;  %4724 = vst [vmem:[%s6891_s18] sm:$0xff] %v5729_v33  ;;  %5756 = vrcp.f32 %v4443_v30  ;;  %v4303_v23 = vpop.f32.mrf.mxu1  ;;  %v4175_v60 = vadd.f32 %v4174_v21, %v6865_v0  ;;  %v5181_v1 = vmul.f32 -1.442695, %v4173_v55 }
 0x71b   : > { %v5733_v41 = vpop.eup %5732  ;;  %4756 = vst [vmem:[%s6891_s18 + $0x100] sm:$0xff] %v5731_v43  ;;  %5758 = vrcp.f32 %v4635_v35  ;;  %v4176_v28 = vpop.f32.mrf.mxu0  ;;  %v4304_v2 = vadd.f32 %v4303_v23, %v6865_v0 }
 0x71c   : > { %v5735_v51 = vpop.eup %5734  ;;  %4725 = vst [vmem:[%s6891_s18 + $0x8] sm:$0xff] %v5733_v41  ;;  %5760 = vpow2.f32 %v5173_v31  ;;  %v4305_v31 = vpop.f32.mrf.mxu1 }
 0x71d   : > { %v5737_v53 = vpop.eup %5736  ;;  %4757 = vst [vmem:[%s6891_s18 + $0x108] sm:$0xff] %v5735_v51  ;;  %5762 = vpow2.f32 %v5205_v39  ;;  %v4178_v43 = vpop.f32.mrf.mxu0  ;;  %v4306_v8 = vadd.f32 %v4305_v31, %v6862_v15 }
 0x71e   : > { %v5739_v47 = vpop.eup %5738  ;;  %4726 = vst [vmem:[%s6891_s18 + $0x10] sm:$0xff] %v5737_v53  ;;  %5764 = vpow2.f32 %v5174_v44  ;;  %v4307_v41 = vpop.f32.mrf.mxu1 }
 0x71f   : > { %v5741_v58 = vpop.eup %5740  ;;  %4758 = vst [vmem:[%s6891_s18 + $0x110] sm:$0xff] %v5739_v47  ;;  %5766 = vpow2.f32 %v5206_v10  ;;  %v4182_v9 = vpop.f32.mrf.mxu0  ;;  %v5215_v23 = vmul.f32 -1.442695, %v4306_v8 }
 0x720   : > { %v5743_v16 = vpop.eup %5742  ;;  %4727 = vst [vmem:[%s6891_s18 + $0x18] sm:$0xff] %v5741_v58  ;;  %5768 = vpow2.f32 %v5175_v40  ;;  %v4311_v47 = vpop.f32.mrf.mxu1  ;;  %v4302_v58 = vadd.f32 %v6916_v13, %v6862_v15 }
 0x721   : > { %v5745_v3 = vpop.eup %5744  ;;  %4759 = vst [vmem:[%s6891_s18 + $0x118] sm:$0xff] %v5743_v16  ;;  %5770 = vpow2.f32 %v5207_v54  ;;  %v4184_v61 = vpop.f32.mrf.mxu0 }
 0x722   : > { %v5747_v5 = vpop.eup %5746  ;;  %4728 = vst [vmem:[%s6891_s18 + $0x20] sm:$0xff] %v5745_v3  ;;  %5772 = vpow2.f32 %v5176_v56 }
 0x723   : > { %v5749_v36 = vpop.eup %5748  ;;  %4760 = vst [vmem:[%s6891_s18 + $0x120] sm:$0xff] %v5747_v5  ;;  %5774 = vpow2.f32 %v5208_v59  ;;  %v4177_v5 = vadd.f32 %v4176_v28, %v6862_v15 }
 0x724   : > { %v5751_v12 = vpop.eup %5750  ;;  %4729 = vst [vmem:[%s6891_s18 + $0x28] sm:$0xff] %v5749_v36  ;;  %5776 = vpow2.f32 %v5177_v63 }
 0x725   : > { %v5753_v46 = vpop.eup %5752  ;;  %4761 = vst [vmem:[%s6891_s18 + $0x128] sm:$0xff] %v5751_v12  ;;  %5778 = vpow2.f32 %v5209_v4  ;;  %v5182_v12 = vmul.f32 -1.442695, %v4175_v60 }
 0x726   : > { %v5755_v18 = vpop.eup %5754  ;;  %4730 = vst [vmem:[%s6891_s18 + $0x30] sm:$0xff] %v5753_v46  ;;  %5780 = vpow2.f32 %v5178_v6  ;;  %v4313_v6 = vpop.f32.mrf.mxu1  ;;  %v5214_v46 = vmul.f32 -1.442695, %v4304_v2 }
 0x727   : > { %v5757_v19 = vpop.eup %5756  ;;  %4762 = vst [vmem:[%s6891_s18 + $0x130] sm:$0xff] %v5755_v18  ;;  %5782 = vpow2.f32 %v5210_v34  ;;  %v5213_v34 = vmul.f32 -1.442695, %v4302_v58  ;;  %v4186_v18 = vpop.f32.mrf.mxu0 }
 0x728   : > { %v5759_v22 = vpop.eup %5758  ;;  %4731 = vst [vmem:[%s6891_s18 + $0x38] sm:$0xff] %v5757_v19  ;;  %5784 = vpow2.f32 %v5179_v14  ;;  %v4179_v14 = vadd.f32 %v4178_v43, %v6865_v0  ;;  %v5183_v19 = vmul.f32 -1.442695, %v4177_v5  ;;  %v4315_v21 = vpop.f32.mrf.mxu1 }
 0x729   : > { %v5761_v37 = vpop.eup %5760  ;;  %4763 = vst [vmem:[%s6891_s18 + $0x138] sm:$0xff] %v5759_v22  ;;  %5786 = vpow2.f32 %v5211_v17  ;;  %v4308_v17 = vadd.f32 %v4307_v41, %v6865_v0 }
 0x72a   : > { %v5763_v24 = vpop.eup %5762  ;;  %v4444_v25 = vadd.f32 1.0, %v5761_v37  ;;  %5788 = vpow2.f32 %v5180_v11  ;;  %v4312_v37 = vadd.f32 %v4311_v47, %v6862_v15 }
 0x72b   : > { %v5765_v26 = vpop.eup %5764  ;;  %v4636_v27 = vadd.f32 1.0, %v5763_v24  ;;  %5790 = vpow2.f32 %v5212_v20  ;;  %v4183_v20 = vadd.f32 %v4182_v9, %v6862_v15  ;;  %v5216_v28 = vmul.f32 -1.442695, %v4308_v17 }
 0x72c   : > { %v5767_v29 = vpop.eup %5766  ;;  %5792 = vrcp.f32 %v4444_v25  ;;  %v4445_v30 = vadd.f32 1.0, %v5765_v26  ;;  %v5184_v25 = vmul.f32 -1.442695, %v4179_v14  ;;  %v4185_v26 = vadd.f32 %v4184_v61, %v6865_v0 }
 0x72d   : > { %v5769_v32 = vpop.eup %5768  ;;  %5794 = vrcp.f32 %v4636_v27  ;;  %v4637_v38 = vadd.f32 1.0, %v5767_v29  ;;  %v4314_v29 = vadd.f32 %v4313_v6, %v6865_v0 }
 0x72e   : > { %v5771_v33 = vpop.eup %5770  ;;  %5796 = vrcp.f32 %v4445_v30  ;;  %v4446_v35 = vadd.f32 1.0, %v5769_v32  ;;  %v4188_v30 = vpop.f32.mrf.mxu0  ;;  %v5185_v32 = vmul.f32 -1.442695, %v4183_v20 }
 0x72f   : > { %v5773_v39 = vpop.eup %5772  ;;  %5798 = vrcp.f32 %v4637_v38  ;;  %v4638_v42 = vadd.f32 1.0, %v5771_v33  ;;  %v4187_v38 = vadd.f32 %v4186_v18, %v6862_v15  ;;  %v4317_v33 = vpop.f32.mrf.mxu1 }
 0x730   : > { %v5775_v44 = vpop.eup %5774  ;;  %5800 = vrcp.f32 %v4446_v35  ;;  %v4447_v45 = vadd.f32 1.0, %v5773_v39  ;;  %v5217_v39 = vmul.f32 -1.442695, %v4312_v37 }
 0x731   : > { %v5777_v10 = vpop.eup %5776  ;;  %5802 = vrcp.f32 %v4638_v42  ;;  %v4639_v49 = vadd.f32 1.0, %v5775_v44  ;;  %v4316_v42 = vadd.f32 %v4315_v21, %v6862_v15  ;;  %v5186_v44 = vmul.f32 -1.442695, %v4185_v26 }
 0x732   : > { %v5779_v50 = vpop.eup %5778  ;;  %5804 = vrcp.f32 %v4447_v45  ;;  %v4448_v51 = vadd.f32 1.0, %v5777_v10  ;;  %v4189_v45 = vadd.f32 %v4188_v30, %v6865_v0  ;;  %v5218_v10 = vmul.f32 -1.442695, %v4314_v29 }
 0x733   : > { %v5781_v40 = vpop.eup %5780  ;;  %5806 = vrcp.f32 %v4639_v49  ;;  %v4640_v52 = vadd.f32 1.0, %v5779_v50  ;;  %v4318_v49 = vadd.f32 %v4317_v33, %v6865_v0  ;;  %v6951_v50 = vpop.f32.mrf.mxu0 }
 0x734   : > { %v5783_v53 = vpop.eup %5782  ;;  %5808 = vrcp.f32 %v4448_v51  ;;  %v4449_v54 = vadd.f32 1.0, %v5781_v40  ;;  %v5187_v40 = vmul.f32 -1.442695, %v4187_v38  ;;  %v5188_v55 = vmul.f32 -1.442695, %v4189_v45 }
 0x735   : > { %v5785_v56 = vpop.eup %5784  ;;  %5810 = vrcp.f32 %v4640_v52  ;;  %v4641_v57 = vadd.f32 1.0, %v5783_v53  ;;  %v6954_v52 = vpop.f32.mrf.mxu1  ;;  %v5219_v53 = vmul.f32 -1.442695, %v4316_v42  ;;  %v4193_v37 = vadd.f32 %v6951_v50, %v6862_v15 }
 0x736   : > { %v5787_v59 = vpop.eup %5786  ;;  %5812 = vrcp.f32 %v4449_v54  ;;  %v4450_v62 = vadd.f32 1.0, %v5785_v56  ;;  %v5220_v56 = vmul.f32 -1.442695, %v4318_v49 }
 0x737   : > { %v5789_v16 = vpop.eup %5788  ;;  %5814 = vrcp.f32 %v4641_v57  ;;  %v4642_v63 = vadd.f32 1.0, %v5787_v59  ;;  %v4194_v57 = vpop.f32.mrf.mxu0  ;;  %v5189_v42 = vmul.f32 -1.442695, %v4193_v37 }
 0x738   : > { %v5791_v3 = vpop.eup %5790  ;;  %5816 = vrcp.f32 %v4450_v62  ;;  %v4451_v4 = vadd.f32 1.0, %v5789_v16  ;;  %v4323_v59 = vpop.f32.mrf.mxu1  ;;  %v4195_v30 = vadd.f32 %v4194_v57, %v6865_v0 }
 0x739   : > { %v5793_v7 = vpop.eup %5792  ;;  %5818 = vrcp.f32 %v4642_v63  ;;  %v4643_v36 = vadd.f32 1.0, %v5791_v3  ;;  %v4196_v61 = vpop.f32.mrf.mxu0  ;;  %v4324_v38 = vadd.f32 %v4323_v59, %v6865_v0 }
 0x73a   : > { %v5795_v48 = vpop.eup %5794  ;;  %4732 = vst [vmem:[%s6891_s18 + $0x40] sm:$0xff] %v5793_v7  ;;  %5820 = vrcp.f32 %v4451_v4 }
 0x73b   : > { %v5797_v13 = vpop.eup %5796  ;;  %4764 = vst [vmem:[%s6891_s18 + $0x140] sm:$0xff] %v5795_v48  ;;  %5822 = vrcp.f32 %v4643_v36  ;;  %v4198_v48 = vpop.f32.mrf.mxu0 }
 0x73c   : > { %v5799_v11 = vpop.eup %5798  ;;  %4733 = vst [vmem:[%s6891_s18 + $0x48] sm:$0xff] %v5797_v13  ;;  %5824 = vpow2.f32 %v5181_v1  ;;  %v4325_v1 = vpop.f32.mrf.mxu1 }
 0x73d   : > { %v5801_v22 = vpop.eup %5800  ;;  %4765 = vst [vmem:[%s6891_s18 + $0x148] sm:$0xff] %v5799_v11  ;;  %5826 = vpow2.f32 %v5213_v34  ;;  %v4202_v21 = vpop.f32.mrf.mxu0  ;;  %v4326_v49 = vadd.f32 %v4325_v1, %v6862_v15 }
 0x73e   : > { %v5803_v24 = vpop.eup %5802  ;;  %4734 = vst [vmem:[%s6891_s18 + $0x50] sm:$0xff] %v5801_v22  ;;  %5828 = vpow2.f32 %v5182_v12  ;;  %v4327_v13 = vpop.f32.mrf.mxu1 }
 0x73f   : > { %v5805_v27 = vpop.eup %5804  ;;  %4766 = vst [vmem:[%s6891_s18 + $0x150] sm:$0xff] %v5803_v24  ;;  %5830 = vpow2.f32 %v5214_v46  ;;  %v4204_v33 = vpop.f32.mrf.mxu0  ;;  %v5223_v59 = vmul.f32 -1.442695, %v4326_v49 }
 0x740   : > { %v5807_v31 = vpop.eup %5806  ;;  %4735 = vst [vmem:[%s6891_s18 + $0x58] sm:$0xff] %v5805_v27  ;;  %5832 = vpow2.f32 %v5183_v19  ;;  %v4331_v24 = vpop.f32.mrf.mxu1  ;;  %v4322_v27 = vadd.f32 %v6954_v52, %v6862_v15 }
 0x741   : > { %v5809_v35 = vpop.eup %5808  ;;  %4767 = vst [vmem:[%s6891_s18 + $0x158] sm:$0xff] %v5807_v31  ;;  %5834 = vpow2.f32 %v5215_v23 }
 0x742   : > { %v5811_v43 = vpop.eup %5810  ;;  %4736 = vst [vmem:[%s6891_s18 + $0x60] sm:$0xff] %v5809_v35  ;;  %5836 = vpow2.f32 %v5184_v25 }
 0x743   : > { %v5813_v41 = vpop.eup %5812  ;;  %4768 = vst [vmem:[%s6891_s18 + $0x160] sm:$0xff] %v5811_v43  ;;  %5838 = vpow2.f32 %v5216_v28  ;;  %v4197_v43 = vadd.f32 %v4196_v61, %v6862_v15 }
 0x744   : > { %v5815_v51 = vpop.eup %5814  ;;  %4737 = vst [vmem:[%s6891_s18 + $0x68] sm:$0xff] %v5813_v41  ;;  %5840 = vpow2.f32 %v5185_v32 }
 0x745   : > { %v5817_v9 = vpop.eup %5816  ;;  %4769 = vst [vmem:[%s6891_s18 + $0x168] sm:$0xff] %v5815_v51  ;;  %5842 = vpow2.f32 %v5217_v39  ;;  %v5190_v51 = vmul.f32 -1.442695, %v4195_v30 }
 0x746   : > { %v5819_v54 = vpop.eup %5818  ;;  %4738 = vst [vmem:[%s6891_s18 + $0x70] sm:$0xff] %v5817_v9  ;;  %5844 = vpow2.f32 %v5186_v44  ;;  %v4333_v44 = vpop.f32.mrf.mxu1  ;;  %v5222_v9 = vmul.f32 -1.442695, %v4324_v38 }
 0x747   : > { %v5821_v47 = vpop.eup %5820  ;;  %4770 = vst [vmem:[%s6891_s18 + $0x170] sm:$0xff] %v5819_v54  ;;  %5846 = vpow2.f32 %v5218_v10  ;;  %v5221_v10 = vmul.f32 -1.442695, %v4322_v27  ;;  %v4206_v54 = vpop.f32.mrf.mxu0 }
 0x748   : > { %v5823_v58 = vpop.eup %5822  ;;  %4739 = vst [vmem:[%s6891_s18 + $0x78] sm:$0xff] %v5821_v47  ;;  %5848 = vpow2.f32 %v5187_v40  ;;  %v4199_v40 = vadd.f32 %v4198_v48, %v6865_v0  ;;  %v5191_v47 = vmul.f32 -1.442695, %v4197_v43  ;;  %v4335_v57 = vpop.f32.mrf.mxu1 }
 0x749   : > { %v5825_v62 = vpop.eup %5824  ;;  %4771 = vst [vmem:[%s6891_s18 + $0x178] sm:$0xff] %v5823_v58  ;;  %5850 = vpow2.f32 %v5219_v53  ;;  %v4328_v53 = vadd.f32 %v4327_v13, %v6865_v0 }
 0x74a   : > { %v5827_v60 = vpop.eup %5826  ;;  %v4452_v16 = vadd.f32 1.0, %v5825_v62  ;;  %5852 = vpow2.f32 %v5188_v55  ;;  %v4332_v62 = vadd.f32 %v4331_v24, %v6862_v15 }
 0x74b   : > { %v5829_v63 = vpop.eup %5828  ;;  %v4644_v2 = vadd.f32 1.0, %v5827_v60  ;;  %5854 = vpow2.f32 %v5220_v56  ;;  %v4203_v56 = vadd.f32 %v4202_v21, %v6862_v15  ;;  %v5224_v61 = vmul.f32 -1.442695, %v4328_v53 }
 0x74c   : > { %v5831_v3 = vpop.eup %5830  ;;  %5856 = vrcp.f32 %v4452_v16  ;;  %v4453_v4 = vadd.f32 1.0, %v5829_v63  ;;  %v5192_v16 = vmul.f32 -1.442695, %v4199_v40  ;;  %v4205_v63 = vadd.f32 %v4204_v33, %v6865_v0 }
 0x74d   : > { %v5833_v5 = vpop.eup %5832  ;;  %5858 = vrcp.f32 %v4644_v2  ;;  %v4645_v6 = vadd.f32 1.0, %v5831_v3  ;;  %v4334_v3 = vadd.f32 %v4333_v44, %v6865_v0 }
 0x74e   : > { %v5835_v7 = vpop.eup %5834  ;;  %5860 = vrcp.f32 %v4453_v4  ;;  %v4454_v36 = vadd.f32 1.0, %v5833_v5  ;;  %v4208_v4 = vpop.f32.mrf.mxu0  ;;  %v5193_v5 = vmul.f32 -1.442695, %v4203_v56 }
 0x74f   : > { %v5837_v34 = vpop.eup %5836  ;;  %5862 = vrcp.f32 %v4645_v6  ;;  %v4646_v8 = vadd.f32 1.0, %v5835_v7  ;;  %v4207_v6 = vadd.f32 %v4206_v54, %v6862_v15  ;;  %v4337_v7 = vpop.f32.mrf.mxu1 }
 0x750   : > { %v5839_v12 = vpop.eup %5838  ;;  %5864 = vrcp.f32 %v4454_v36  ;;  %v4455_v14 = vadd.f32 1.0, %v5837_v34  ;;  %v5225_v34 = vmul.f32 -1.442695, %v4332_v62 }
 0x751   : > { %v5841_v46 = vpop.eup %5840  ;;  %5866 = vrcp.f32 %v4646_v8  ;;  %v4647_v17 = vadd.f32 1.0, %v5839_v12  ;;  %v4336_v8 = vadd.f32 %v4335_v57, %v6862_v15  ;;  %v5194_v12 = vmul.f32 -1.442695, %v4205_v63 }
 0x752   : > { %v5843_v18 = vpop.eup %5842  ;;  %5868 = vrcp.f32 %v4455_v14  ;;  %v4456_v11 = vadd.f32 1.0, %v5841_v46  ;;  %v4209_v14 = vadd.f32 %v4208_v4, %v6865_v0  ;;  %v5226_v46 = vmul.f32 -1.442695, %v4334_v3 }
 0x753   : > { %v5845_v19 = vpop.eup %5844  ;;  %5870 = vrcp.f32 %v4647_v17  ;;  %v4648_v20 = vadd.f32 1.0, %v5843_v18  ;;  %v4338_v17 = vadd.f32 %v4337_v7, %v6865_v0  ;;  %v5195_v15 = vmul.f32 -1.442695, %v4207_v6 }
 0x754   : > { %v5847_v22 = vpop.eup %5846  ;;  %5872 = vrcp.f32 %v4456_v11  ;;  %v4457_v23 = vadd.f32 1.0, %v5845_v19  ;;  %v5227_v19 = vmul.f32 -1.442695, %v4336_v8  ;;  %v5196_v21 = vmul.f32 -1.442695, %v4209_v14 }
 0x755   : > { %v5849_v25 = vpop.eup %5848  ;;  %5874 = vrcp.f32 %v4648_v20  ;;  %v4649_v26 = vadd.f32 1.0, %v5847_v22 }
 0x756   : > { %v5851_v28 = vpop.eup %5850  ;;  %5876 = vrcp.f32 %v4457_v23  ;;  %v4458_v29 = vadd.f32 1.0, %v5849_v25  ;;  %v5228_v23 = vmul.f32 -1.442695, %v4338_v17 }
 0x757   : > { %v5853_v31 = vpop.eup %5852  ;;  %5878 = vrcp.f32 %v4649_v26  ;;  %v4650_v32 = vadd.f32 1.0, %v5851_v28 }
 0x758   : > { %v5855_v35 = vpop.eup %5854  ;;  %5880 = vrcp.f32 %v4458_v29  ;;  %v4459_v39 = vadd.f32 1.0, %v5853_v31 }
 0x759   : > { %v5857_v45 = vpop.eup %5856  ;;  %5882 = vrcp.f32 %v4650_v32  ;;  %v4651_v41 = vadd.f32 1.0, %v5855_v35 }
 0x75a   : > { %v5859_v50 = vpop.eup %5858  ;;  %4740 = vst [vmem:[%s6891_s18 + $0x80] sm:$0xff] %v5857_v45  ;;  %5884 = vrcp.f32 %v4459_v39 }
 0x75b   : > { %v5861_v52 = vpop.eup %5860  ;;  %4772 = vst [vmem:[%s6891_s18 + $0x180] sm:$0xff] %v5859_v50  ;;  %5886 = vrcp.f32 %v4651_v41 }
 0x75c   : > { %v5863_v55 = vpop.eup %5862  ;;  %4741 = vst [vmem:[%s6891_s18 + $0x88] sm:$0xff] %v5861_v52  ;;  %5888 = vpow2.f32 %v5189_v42 }
 0x75d   : > { %v5865_v58 = vpop.eup %5864  ;;  %4773 = vst [vmem:[%s6891_s18 + $0x188] sm:$0xff] %v5863_v55  ;;  %5890 = vpow2.f32 %v5221_v10 }
 0x75e   : > { %v5867_v60 = vpop.eup %5866  ;;  %4742 = vst [vmem:[%s6891_s18 + $0x90] sm:$0xff] %v5865_v58  ;;  %5892 = vpow2.f32 %v5190_v51 }
 0x75f   : > { %v5869_v2 = vpop.eup %5868  ;;  %4774 = vst [vmem:[%s6891_s18 + $0x190] sm:$0xff] %v5867_v60  ;;  %5894 = vpow2.f32 %v5222_v9 }
 0x760   : > { %v5871_v1 = vpop.eup %5870  ;;  %4743 = vst [vmem:[%s6891_s18 + $0x98] sm:$0xff] %v5869_v2  ;;  %5896 = vpow2.f32 %v5191_v47 }
 0x761   : > { %v5873_v36 = vpop.eup %5872  ;;  %4775 = vst [vmem:[%s6891_s18 + $0x198] sm:$0xff] %v5871_v1  ;;  %5898 = vpow2.f32 %v5223_v59 }
 0x762   : > { %v5875_v48 = vpop.eup %5874  ;;  %4744 = vst [vmem:[%s6891_s18 + $0xa0] sm:$0xff] %v5873_v36  ;;  %5900 = vpow2.f32 %v5192_v16 }
 0x763   : > { %v5877_v13 = vpop.eup %5876  ;;  %4776 = vst [vmem:[%s6891_s18 + $0x1a0] sm:$0xff] %v5875_v48  ;;  %5902 = vpow2.f32 %v5224_v61 }
 0x764   : > { %v5879_v18 = vpop.eup %5878  ;;  %4745 = vst [vmem:[%s6891_s18 + $0xa8] sm:$0xff] %v5877_v13  ;;  %5904 = vpow2.f32 %v5193_v5 }
 0x765   : > { %v5881_v11 = vpop.eup %5880  ;;  %4777 = vst [vmem:[%s6891_s18 + $0x1a8] sm:$0xff] %v5879_v18  ;;  %5906 = vpow2.f32 %v5225_v34 }
 0x766   : > { %v5883_v20 = vpop.eup %5882  ;;  %4746 = vst [vmem:[%s6891_s18 + $0xb0] sm:$0xff] %v5881_v11  ;;  %5908 = vpow2.f32 %v5194_v12 }
 0x767   : > { %v5885_v22 = vpop.eup %5884  ;;  %4778 = vst [vmem:[%s6891_s18 + $0x1b0] sm:$0xff] %v5883_v20  ;;  %5910 = vpow2.f32 %v5226_v46 }
 0x768   : > { %v5887_v37 = vpop.eup %5886  ;;  %4747 = vst [vmem:[%s6891_s18 + $0xb8] sm:$0xff] %v5885_v22  ;;  %5912 = vpow2.f32 %v5195_v15 }
 0x769   : > { %v5889_v0 = vpop.eup %5888  ;;  %4779 = vst [vmem:[%s6891_s18 + $0x1b8] sm:$0xff] %v5887_v37  ;;  %5914 = vpow2.f32 %v5227_v19 }
 0x76a   : > { %v5891_v24 = vpop.eup %5890  ;;  %v4460_v25 = vadd.f32 1.0, %v5889_v0  ;;  %5916 = vpow2.f32 %v5196_v21 }
 0x76b   : > { %v5893_v26 = vpop.eup %5892  ;;  %v4652_v27 = vadd.f32 1.0, %v5891_v24  ;;  %5918 = vpow2.f32 %v5228_v23 }
 0x76c   : > { %v5895_v28 = vpop.eup %5894  ;;  %5920 = vrcp.f32 %v4460_v25  ;;  %v4461_v29 = vadd.f32 1.0, %v5893_v26 }
 0x76d   : > { %v5897_v30 = vpop.eup %5896  ;;  %5922 = vrcp.f32 %v4652_v27  ;;  %v4653_v31 = vadd.f32 1.0, %v5895_v28 }
 0x76e   : > { %v5899_v32 = vpop.eup %5898  ;;  %5924 = vrcp.f32 %v4461_v29  ;;  %v4462_v38 = vadd.f32 1.0, %v5897_v30 }
 0x76f   : > { %v5901_v33 = vpop.eup %5900  ;;  %5926 = vrcp.f32 %v4653_v31  ;;  %v4654_v35 = vadd.f32 1.0, %v5899_v32 }
 0x770   : > { %v5903_v39 = vpop.eup %5902  ;;  %5928 = vrcp.f32 %v4462_v38  ;;  %v4463_v42 = vadd.f32 1.0, %v5901_v33 }
 0x771   : > { %v5905_v43 = vpop.eup %5904  ;;  %5930 = vrcp.f32 %v4654_v35  ;;  %v4655_v44 = vadd.f32 1.0, %v5903_v39 }
 0x772   : > { %v5907_v45 = vpop.eup %5906  ;;  %5932 = vrcp.f32 %v4463_v42  ;;  %v4464_v41 = vadd.f32 1.0, %v5905_v43 }
 0x773   : > { %v5909_v10 = vpop.eup %5908  ;;  %5934 = vrcp.f32 %v4655_v44  ;;  %v4656_v49 = vadd.f32 1.0, %v5907_v45 }
 0x774   : > { %v5911_v50 = vpop.eup %5910  ;;  %5936 = vrcp.f32 %v4464_v41  ;;  %v4465_v51 = vadd.f32 1.0, %v5909_v10 }
 0x775   : > { %v5913_v40 = vpop.eup %5912  ;;  %5938 = vrcp.f32 %v4656_v49  ;;  %v4657_v52 = vadd.f32 1.0, %v5911_v50 }
 0x776   : > { %v5915_v9 = vpop.eup %5914  ;;  %5940 = vrcp.f32 %v4465_v51  ;;  %v4466_v53 = vadd.f32 1.0, %v5913_v40 }
 0x777   : > { %v5917_v54 = vpop.eup %5916  ;;  %5942 = vrcp.f32 %v4657_v52  ;;  %v4658_v55 = vadd.f32 1.0, %v5915_v9 }
 0x778   : > { %v5919_v47 = vpop.eup %5918  ;;  %5944 = vrcp.f32 %v4466_v53  ;;  %v4467_v56 = vadd.f32 1.0, %v5917_v54 }
 0x779   : > { %v5921_v57 = vpop.eup %5920  ;;  %5946 = vrcp.f32 %v4658_v55  ;;  %v4659_v58 = vadd.f32 1.0, %v5919_v47 }
 0x77a   : > { %v5923_v59 = vpop.eup %5922  ;;  %4748 = vst [vmem:[%s6891_s18 + $0xc0] sm:$0xff] %v5921_v57  ;;  %5948 = vrcp.f32 %v4467_v56 }
 0x77b   : > { %v5925_v62 = vpop.eup %5924  ;;  %4780 = vst [vmem:[%s6891_s18 + $0x1c0] sm:$0xff] %v5923_v59  ;;  %5950 = vrcp.f32 %v4659_v58 }
 0x77c   : > { %v5927_v60 = vpop.eup %5926  ;;  %4749 = vst [vmem:[%s6891_s18 + $0xc8] sm:$0xff] %v5925_v62 }
 0x77d   : > { %v5929_v16 = vpop.eup %5928  ;;  %4781 = vst [vmem:[%s6891_s18 + $0x1c8] sm:$0xff] %v5927_v60 }
 0x77e   : > { %v5931_v63 = vpop.eup %5930  ;;  %4750 = vst [vmem:[%s6891_s18 + $0xd0] sm:$0xff] %v5929_v16 }
 0x77f   : > { %v5933_v2 = vpop.eup %5932  ;;  %4782 = vst [vmem:[%s6891_s18 + $0x1d0] sm:$0xff] %v5931_v63 }
 0x780   : > { %v5935_v61 = vpop.eup %5934  ;;  %4751 = vst [vmem:[%s6891_s18 + $0xd8] sm:$0xff] %v5933_v2 }
 0x781   : > { %v5937_v3 = vpop.eup %5936  ;;  %4783 = vst [vmem:[%s6891_s18 + $0x1d8] sm:$0xff] %v5935_v61 }
 0x782   : > { %v5939_v4 = vpop.eup %5938  ;;  %4752 = vst [vmem:[%s6891_s18 + $0xe0] sm:$0xff] %v5937_v3 }
 0x783   : > { %v5941_v1 = vpop.eup %5940  ;;  %4784 = vst [vmem:[%s6891_s18 + $0x1e0] sm:$0xff] %v5939_v4 }
 0x784   : > { %v5943_v5 = vpop.eup %5942  ;;  %4753 = vst [vmem:[%s6891_s18 + $0xe8] sm:$0xff] %v5941_v1 }
 0x785   : > { %v5945_v6 = vpop.eup %5944  ;;  %4785 = vst [vmem:[%s6891_s18 + $0x1e8] sm:$0xff] %v5943_v5 }
 0x786   : > { %v5947_v7 = vpop.eup %5946  ;;  %4754 = vst [vmem:[%s6891_s18 + $0xf0] sm:$0xff] %v5945_v6 }
 0x787   : > { %v5949_v36 = vpop.eup %5948  ;;  %4786 = vst [vmem:[%s6891_s18 + $0x1f0] sm:$0xff] %v5947_v7 }
 0x788   : > { %v5951_v34 = vpop.eup %5950  ;;  %4755 = vst [vmem:[%s6891_s18 + $0xf8] sm:$0xff] %v5949_v36 }
 0x789   : > { %4787 = vst [vmem:[%s6891_s18 + $0x1f8] sm:$0xff] %v5951_v34 }
 0x78a   : > { %6051 = shalt.err (!%p6048_p9)
}
 0x78b   : > { %s6052_s22 = scalar_lea.hbm %s7013_s29, 8192  ;;  %s6056_s26 = scalar_lea.hbm %s7064_s3, 16384 }
 0x78c   : > { %p6053_p13 = scmp.ne.s32.totalorder %s7013_s29, %s6052_s22  ;;  %p6057_p4 = scmp.lt.s32.totalorder %s7013_s29, %s7064_s3 }
 0x78d   : > { %p6058_p8 = scmp.lt.s32.totalorder %s6056_s26, %s6052_s22 }
 0x78e   : > { %p6054_p5 = pnand %p6053_p13, %p7080_p10 }
 0x78f   : > { %p6059_p3 = por %p6058_p8, %p6057_p4 }
 0x790   : > { %p6055_p0 = pneg %p6054_p5 }
 0x792   : > { %p6060_p11 = pnand %p6059_p3, %p6055_p0 }
 0x794   : > { %6063 = shalt.err (!%p6060_p11)
}
 0x795   : > { %s6116_s6 = smov 256   ;;  %s6117_s18 = smov 16  }
 0x796   : > { %5249 = dma.vmem_to_hbm [thread:$0]  (%p7080_p10), %s7015_s25, 8192, %s7013_s29, %s4789_s16, %s6116_s6, %s6116_s6, %s6117_s18  }
 0x797 PF: > { %s4818_s20 = sand.u32 1, %s6094_s12   ;;  %p7081_p1 = scmp.ne.s32.totalorder %s7070_s19, 0 }
 0x798   : > { %p7082_p2 = scmp.ge.s32.totalorder %s6106_s15, 2  ;;  %s4819_s27 = scalar_lea.sflag [#allocation4], %s4818_s20 }
 0x79a   : > { %p5263_p6 = pnand %p7082_p2, %p7081_p1 }
 0x79c   : > { %p5264_p12 = pneg %p5263_p6 }
 0x79e   : > { %6089 = dma.done.wait (%p5264_p12), %s4819_s27, 8192  }
 0x79f   : > { %6091 = vsyncadd (%p5264_p12), %s4819_s27, 4294959104  ;;  %p17_p7 = scmp.ge.s32.totalorder %s6210_s7, 4   ;;  %s7083_s12 = smov %s6098_s13 }
 0x7a0   : > { %s7084_s13 = smov %s6102_s14  ;;  %s7085_s14 = smov %s6226_s11 }
 0x7a1   : > { %s7086_s15 = smov %s6210_s7  ;;  %19 = sbr.rel (!%p17_p7) target bundleno = 6 (0x6), region = 92 }
 0x7a6   :  { %4824 = vsyncpa [#allocation3], 1 }
 0x7a7   :  { %4826 = vsyncpa [#allocation3 + $0x1], 1 }
 0x7a8   :  { %4827 = vsyncpa [#allocation6], 1 }
 0x7a9   :  { %4828 = vsyncpa [#allocation4], 1 }
 0x7aa   :  { %4830 = vsyncpa [#allocation4 + $0x1], 1 }

</bundles_post_ra>
